<compile_context>
chip_gen: v5e
topology: v5e:2x2
jax: 0.10.0
libtpu: 0.0.40
codegen_flags: <defaults>
</compile_context>

<pallas_src>
import functools

import jax
import jax.numpy as jnp
from jax import lax
from jax.experimental import pallas as pl
from jax.experimental.pallas import tpu as pltpu  # noqa: F401  (no TPU-specific knobs needed)


# ----------------------------------------------------------------------------
# Config (stands in for cfg)
# ----------------------------------------------------------------------------
class Cfg:
    obs_feature_dim = 32
    discrete_option = 4
    latent_dim = 16


# ----------------------------------------------------------------------------
# Pallas kernel: whole Prior forward in one call
# ----------------------------------------------------------------------------
def _nan_to_num(x, nan=0.0, posinf=1.0, neginf=-1.0):
    x = jnp.where(jnp.isnan(x), jnp.float32(nan), x)
    x = jnp.where(x == jnp.inf, jnp.float32(posinf), x)
    x = jnp.where(x == -jnp.inf, jnp.float32(neginf), x)
    return x


def prior_kernel(a_ref, g_ref,
                 w1_ref, b1_ref, w2_ref, b2_ref, w3_ref, b3_ref,
                 wfc_ref, bfc_ref, wd_ref, bd_ref, wm_ref, bm_ref, ws_ref, bs_ref,
                 zmean_ref, zstd_ref, logits_ref, y_ref, *, B, K, L):
    f32 = jnp.float32

    # --- conv1 (+BN0/BN1 folded; block-diagonal over 16x16x3 patches) + ReLU ---
    # a: (16*B, 768), rows = (h2, w2, b), cols = (hl, wl, cin)
    h1 = jnp.dot(a_ref[...], w1_ref[...], preferred_element_type=f32) + b1_ref[...]
    h1 = jnp.maximum(h1, 0.0)                        # (16*B, 128), cols = (kh2, kw2, c1)

    # Regroup to one row per image via cheap sublane-aligned slices + lane concat:
    # (B, 2048), cols = (h2, w2, kh2, kw2, c1)  == conv2 im2col for the whole image.
    h1_big = jnp.concatenate([h1[p * B:(p + 1) * B, :] for p in range(16)], axis=1)

    # --- conv2 (+BN2 folded; block-diagonal over the full image) + ReLU ---
    g2 = jnp.dot(h1_big, w2_ref[...], preferred_element_type=f32) + b2_ref[...]
    g2 = jnp.maximum(g2, 0.0)                        # (B, 256) == conv3 im2col

    # --- conv3 (+BN3 folded) + ReLU ---
    c3 = jnp.dot(g2, w3_ref[...], preferred_element_type=f32) + b3_ref[...]
    c3 = jnp.maximum(c3, 0.0)                        # (B, 32)

    # --- AdaptiveAvgPool2d((4,4)) on 1x1 output + Flatten + Linear (folded) + ReLU ---
    feat = jnp.dot(c3, wfc_ref[...], preferred_element_type=f32) + bfc_ref[...]
    feat = jnp.maximum(feat, 0.0)
    feat = _nan_to_num(feat)                         # (B, F)

    # --- discrete head + hard gumbel-softmax forward value ---
    logits = jnp.dot(feat, wd_ref[...], preferred_element_type=f32) + bd_ref[...]
    logits = _nan_to_num(logits)                     # (B, K)
    pert = logits + g_ref[...]
    iota = lax.broadcasted_iota(jnp.int32, pert.shape, 1)
    m = jnp.max(pert, axis=1, keepdims=True)
    first = jnp.min(jnp.where(pert >= m, iota, K), axis=1, keepdims=True)
    y = (iota == first).astype(f32)                  # one-hot; nan_to_num(one-hot) is a no-op

    # --- mixture-of-gaussians heads (all K linears fused into one matmul each) ---
    zm_all = jnp.dot(feat, wm_ref[...], preferred_element_type=f32) + bm_ref[...]
    ls_all = jnp.dot(feat, ws_ref[...], preferred_element_type=f32) + bs_ref[...]
    ls_all = jnp.clip(ls_all, -10.0, 2.0)
    zs_all = jnp.maximum(jnp.exp(ls_all), 0.001)

    zmean = jnp.zeros((B, L), f32)
    zstd = jnp.zeros((B, L), f32)
    for k in range(K):
        yk = y[:, k:k + 1]
        zmean = zmean + yk * zm_all[:, k * L:(k + 1) * L]
        zstd = zstd + yk * zs_all[:, k * L:(k + 1) * L]

    zmean_ref[...] = _nan_to_num(zmean)
    zstd_ref[...] = _nan_to_num(zstd)
    logits_ref[...] = logits
    y_ref[...] = y


def prior_call(fused, a, gumbel, cfg):
    B = gumbel.shape[0]
    K, L = cfg.discrete_option, cfg.latent_dim
    return pl.pallas_call(
        functools.partial(prior_kernel, B=B, K=K, L=L),
        out_shape=(jax.ShapeDtypeStruct((B, L), jnp.float32),
                   jax.ShapeDtypeStruct((B, L), jnp.float32),
                   jax.ShapeDtypeStruct((B, K), jnp.float32),
                   jax.ShapeDtypeStruct((B, K), jnp.float32)),
    )(a, gumbel,
      fused["w1"], fused["b1"], fused["w2"], fused["b2"],
      fused["w3"], fused["b3"], fused["wfc"], fused["bfc"],
      fused["wd"], fused["bd"], fused["wm"], fused["bm"],
      fused["ws"], fused["bs"])


def prior_forward(fused, state, gumbel_key, cfg):
    # Mirror the PyTorch layout check; internally we want NHWC.
    if state.ndim == 4 and state.shape[1] != 3 and state.shape[-1] == 3:
        x = state.astype(jnp.float32)                              # already NHWC
    else:
        x = jnp.transpose(state, (0, 2, 3, 1)).astype(jnp.float32)  # NCHW -> NHWC
    B, H, W, C = x.shape
    # Fused pipeline is specialized to the 3x64x64 geometry (conv3 output = 1x1).
    # TODO(synk): general spatial sizes need per-layer im2col instead.
    assert (H, W, C) == (64, 64, 3), "fused Prior kernel expects 3x64x64 inputs"

    # im2col at the conv2-patch level: rows (h2, w2, b), cols (hl, wl, cin).
    a = x.reshape(B, 4, 16, 4, 16, C)
    a = jnp.transpose(a, (1, 3, 0, 2, 4, 5))
    a = a.reshape(16 * B, 16 * 16 * C)                              # (16B, 768)

    gumbel = jax.random.gumbel(gumbel_key, (B, cfg.discrete_option), dtype=jnp.float32)
    return prior_call(fused, a, gumbel, cfg)


# ----------------------------------------------------------------------------
# Parameter construction: raw (PyTorch layout) params and kernel-ready fusion
# ----------------------------------------------------------------------------
def fold_bn_conv(w, b, bn_in=None, bn_out=None, eps=1e-5):
    """Fold eval-mode BatchNorm (before and/or after) into conv weight/bias."""
    w = w.astype(jnp.float32)
    b = b.astype(jnp.float32)
    if bn_in is not None:
        g, be, m, v = bn_in
        s = g / jnp.sqrt(v + eps)
        t = be - s * m
        b = b + jnp.einsum("ocij,c->o", w, t)
        w = w * s[None, :, None, None]
    if bn_out is not None:
        g, be, m, v = bn_out
        s = g / jnp.sqrt(v + eps)
        t = be - s * m
        w = w * s[:, None, None, None]
        b = b * s + t
    return w, b


def init_raw_params(key, cfg):
    keys = iter(jax.random.split(key, 64))

    def nrm(shape, scale=0.1):
        return (scale * jax.random.normal(next(keys), shape)).astype(jnp.float32)

    def bn(c):
        return (1.0 + nrm((c,), 0.02), nrm((c,), 0.02),
                jnp.zeros((c,), jnp.float32), jnp.ones((c,), jnp.float32))

    F, K, L = cfg.obs_feature_dim, cfg.discrete_option, cfg.latent_dim
    return {
        "bn0": bn(3), "bn1": bn(8), "bn2": bn(16), "bn3": bn(32),
        "conv1_w": nrm((8, 3, 4, 4)), "conv1_b": nrm((8,)),
        "conv2_w": nrm((16, 8, 4, 4)), "conv2_b": nrm((16,)),
        "conv3_w": nrm((32, 16, 4, 4)), "conv3_b": nrm((32,)),
        "fc_w": nrm((F, 32 * 4 * 4)), "fc_b": nrm((F,)),
        "disc_w": nrm((K, F)), "disc_b": nrm((K,)),
        "mean_w": [nrm((L, F)) for _ in range(K)], "mean_b": [nrm((L,)) for _ in range(K)],
        "lstd_w": [nrm((L, F)) for _ in range(K)], "lstd_b": [nrm((L,)) for _ in range(K)],
    }


def fuse_params(raw, cfg):
    F, K, L = cfg.obs_feature_dim, cfg.discrete_option, cfg.latent_dim
    w1f, b1f = fold_bn_conv(raw["conv1_w"], raw["conv1_b"], bn_in=raw["bn0"], bn_out=raw["bn1"])
    w2f, b2f = fold_bn_conv(raw["conv2_w"], raw["conv2_b"], bn_out=raw["bn2"])
    w3f, b3f = fold_bn_conv(raw["conv3_w"], raw["conv3_b"], bn_out=raw["bn3"])

    eye4 = jnp.eye(4, dtype=jnp.float32)
    eye16 = jnp.eye(16, dtype=jnp.float32)

    # conv1 as block-diagonal matmul over 16x16x3 conv2-level patches.
    # rows: (hl, wl, cin) = (i, kh, j, kw, cin); cols: (kh2, kw2, cout) = (i2, j2, cout)
    w1_blk = jnp.einsum("ocpq,ab,de->apdqcbeo", w1f, eye4, eye4).reshape(768, 128)
    b1_blk = jnp.tile(b1f, 16).reshape(1, 128)

    # conv2 as block-diagonal matmul over the whole per-image conv1 activation.
    # rows: (p, kh, kw, cin); cols: (p2, cout) with p = h2*4 + w2
    w2_blk = jnp.einsum("ocpq,ab->apqcbo", w2f, eye16).reshape(2048, 256)
    b2_blk = jnp.tile(b2f, 16).reshape(1, 256)

    # conv3: rows (kh3, kw3, cin), cols cout
    w3_mat = jnp.transpose(w3f, (2, 3, 1, 0)).reshape(256, 32)

    # AdaptiveAvgPool2d((4,4)) on the 1x1 conv3 output replicates the value, so
    # Linear(512, F) folds to a (32, F) weight (sum over the 16 spatial columns).
    wfc_eff = raw["fc_w"].reshape(F, 32, 16).sum(-1).T

    return {
        "w1": w1_blk, "b1": b1_blk,
        "w2": w2_blk, "b2": b2_blk,
        "w3": w3_mat, "b3": b3f.reshape(1, 32),
        "wfc": wfc_eff, "bfc": raw["fc_b"].reshape(1, F),
        "wd": raw["disc_w"].T, "bd": raw["disc_b"].reshape(1, K),
        "wm": jnp.concatenate([w.T for w in raw["mean_w"]], axis=1),
        "bm": jnp.concatenate(raw["mean_b"]).reshape(1, K * L),
        "ws": jnp.concatenate([w.T for w in raw["lstd_w"]], axis=1),
        "bs": jnp.concatenate(raw["lstd_b"]).reshape(1, K * L),
    }


# ----------------------------------------------------------------------------
# Pure-JAX reference (eval-mode BN), used as a correctness check in __main__
# ----------------------------------------------------------------------------
def prior_reference(raw, state, gumbel, cfg, eps=1e-5):
    def bn_apply(x, bn):  # x NCHW
        g, b, m, v = bn
        s = g / jnp.sqrt(v + eps)
        return x * s[None, :, None, None] + (b - s * m)[None, :, None, None]

    def conv(x, w, b, stride):
        y = lax.conv_general_dilated(x, w, (stride, stride), "VALID",
                                     dimension_numbers=("NCHW", "OIHW", "NCHW"))
        return y + b[None, :, None, None]

    x = state.astype(jnp.float32)
    if x.ndim == 4 and x.shape[1] != 3 and x.shape[-1] == 3:
        x = jnp.transpose(x, (0, 3, 1, 2))
    x = bn_apply(x, raw["bn0"])
    x = jax.nn.relu(bn_apply(conv(x, raw["conv1_w"], raw["conv1_b"], 4), raw["bn1"]))
    x = jax.nn.relu(bn_apply(conv(x, raw["conv2_w"], raw["conv2_b"], 4), raw["bn2"]))
    x = jax.nn.relu(bn_apply(conv(x, raw["conv3_w"], raw["conv3_b"], 2), raw["bn3"]))
    B = x.shape[0]
    x = jnp.broadcast_to(x, (B, 32, 4, 4))            # adaptive pool of a 1x1 map
    feat = jax.nn.relu(x.reshape(B, -1) @ raw["fc_w"].T + raw["fc_b"])
    feat = jnp.nan_to_num(feat, nan=0.0, posinf=1.0, neginf=-1.0)
    logits = feat @ raw["disc_w"].T + raw["disc_b"]
    logits = jnp.nan_to_num(logits, nan=0.0, posinf=1.0, neginf=-1.0)
    y = jax.nn.one_hot(jnp.argmax(logits + gumbel, axis=-1),
                       cfg.discrete_option, dtype=jnp.float32)
    z_means = jnp.stack([feat @ w.T + b for w, b in zip(raw["mean_w"], raw["mean_b"])], axis=1)
    z_lstds = jnp.stack([feat @ w.T + b for w, b in zip(raw["lstd_w"], raw["lstd_b"])], axis=1)
    z_lstds = jnp.clip(z_lstds, -10.0, 2.0)
    z_stds = jnp.maximum(jnp.exp(z_lstds), 0.001)
    z_mean = jnp.sum(y[:, :, None] * z_means, axis=1)
    z_std = jnp.sum(y[:, :, None] * z_stds, axis=1)
    z_mean = jnp.nan_to_num(z_mean, nan=0.0, posinf=1.0, neginf=-1.0)
    z_std = jnp.nan_to_num(z_std, nan=0.0, posinf=1.0, neginf=-1.0)
    return z_mean, z_std, logits, y


# ----------------------------------------------------------------------------
# Main
# ----------------------------------------------------------------------------
if __name__ == "__main__":
    cfg = Cfg()
    root = jax.random.PRNGKey(0)
    k_param, k_state, k_gumbel = jax.random.split(root, 3)

    raw = init_raw_params(k_param, cfg)
    fused = fuse_params(raw, cfg)

    B = 8
    state = jax.random.normal(k_state, (B, 3, 64, 64), dtype=jnp.float32)

    fwd = jax.jit(functools.partial(prior_forward, cfg=cfg))
    z_mean, z_std, logits, discrete_y = fwd(fused, state, k_gumbel)
    jax.block_until_ready((z_mean, z_std, logits, discrete_y))

    # Shape checks
    assert z_mean.shape == (B, cfg.latent_dim)
    assert z_std.shape == (B, cfg.latent_dim)
    assert logits.shape == (B, cfg.discrete_option)
    assert discrete_y.shape == (B, cfg.discrete_option)
    assert bool(jnp.all(jnp.sum(discrete_y, axis=-1) == 1.0))

    # Numerical check against the pure-JAX reference (same gumbel noise).
    gumbel = jax.random.gumbel(k_gumbel, (B, cfg.discrete_option), dtype=jnp.float32)
    zm_r, zs_r, lg_r, y_r = prior_reference(raw, state, gumbel, cfg)
    assert bool(jnp.allclose(logits, lg_r, atol=1e-3, rtol=1e-3))
    assert bool(jnp.array_equal(discrete_y, y_r))
    assert bool(jnp.allclose(z_mean, zm_r, atol=1e-3, rtol=1e-3))
    assert bool(jnp.allclose(z_std, zs_r, atol=1e-3, rtol=1e-3))

    print("KERNEL_OK")
</pallas_src>

<mosaic_0001>
module attributes {stable_mosaic.version = 11 : i64} {
  func.func @prior_kernel(%arg0: memref<128x768xf32, #tpu.memory_space<vmem>>, %arg1: memref<8x4xf32, #tpu.memory_space<vmem>>, %arg2: memref<768x128xf32, #tpu.memory_space<vmem>>, %arg3: memref<1x128xf32, #tpu.memory_space<vmem>>, %arg4: memref<2048x256xf32, #tpu.memory_space<vmem>>, %arg5: memref<1x256xf32, #tpu.memory_space<vmem>>, %arg6: memref<256x32xf32, #tpu.memory_space<vmem>>, %arg7: memref<1x32xf32, #tpu.memory_space<vmem>>, %arg8: memref<32x32xf32, #tpu.memory_space<vmem>>, %arg9: memref<1x32xf32, #tpu.memory_space<vmem>>, %arg10: memref<32x4xf32, #tpu.memory_space<vmem>>, %arg11: memref<1x4xf32, #tpu.memory_space<vmem>>, %arg12: memref<32x64xf32, #tpu.memory_space<vmem>>, %arg13: memref<1x64xf32, #tpu.memory_space<vmem>>, %arg14: memref<32x64xf32, #tpu.memory_space<vmem>>, %arg15: memref<1x64xf32, #tpu.memory_space<vmem>>, %arg16: memref<8x16xf32, #tpu.memory_space<vmem>>, %arg17: memref<8x16xf32, #tpu.memory_space<vmem>>, %arg18: memref<8x4xf32, #tpu.memory_space<vmem>>, %arg19: memref<8x4xf32, #tpu.memory_space<vmem>>) attributes {dimension_semantics = [], scalar_prefetch = 0 : i64, scratch_operands = 0 : i64, tpu.core_type = #tpu.core_type<tc>} {
    %c0 = arith.constant 0 : index
    %c0_0 = arith.constant 0 : index
    %0 = vector.load %arg0[%c0, %c0_0] : memref<128x768xf32, #tpu.memory_space<vmem>>, vector<128x768xf32>
    %c0_1 = arith.constant 0 : index
    %c0_2 = arith.constant 0 : index
    %1 = vector.load %arg2[%c0_1, %c0_2] : memref<768x128xf32, #tpu.memory_space<vmem>>, vector<768x128xf32>
    %cst = arith.constant dense<0.000000e+00> : vector<128x128xf32>
    %2 = tpu.matmul %0, %1, %cst {dimension_numbers = #tpu.dot_dimension_numbers<[1], [0], [0], [1], [0, 0, 1, 1], [], []>} : vector<128x768xf32>, vector<768x128xf32>, vector<128x128xf32> -> vector<128x128xf32>
    %c0_3 = arith.constant 0 : index
    %c0_4 = arith.constant 0 : index
    %3 = vector.load %arg3[%c0_3, %c0_4] : memref<1x128xf32, #tpu.memory_space<vmem>>, vector<1x128xf32>
    %4 = vector.broadcast %3 : vector<1x128xf32> to vector<128x128xf32>
    %5 = arith.addf %2, %4 : vector<128x128xf32>
    %cst_5 = arith.constant 0.000000e+00 : f32
    %6 = vector.broadcast %cst_5 : f32 to vector<128x128xf32>
    %7 = arith.maximumf %5, %6 : vector<128x128xf32>
    %8 = vector.extract_strided_slice %7 {offsets = [0, 0], sizes = [8, 128], strides = [1, 1]} : vector<128x128xf32> to vector<8x128xf32>
    %9 = vector.extract_strided_slice %7 {offsets = [8, 0], sizes = [8, 128], strides = [1, 1]} : vector<128x128xf32> to vector<8x128xf32>
    %10 = vector.extract_strided_slice %7 {offsets = [16, 0], sizes = [8, 128], strides = [1, 1]} : vector<128x128xf32> to vector<8x128xf32>
    %11 = vector.extract_strided_slice %7 {offsets = [24, 0], sizes = [8, 128], strides = [1, 1]} : vector<128x128xf32> to vector<8x128xf32>
    %12 = vector.extract_strided_slice %7 {offsets = [32, 0], sizes = [8, 128], strides = [1, 1]} : vector<128x128xf32> to vector<8x128xf32>
    %13 = vector.extract_strided_slice %7 {offsets = [40, 0], sizes = [8, 128], strides = [1, 1]} : vector<128x128xf32> to vector<8x128xf32>
    %14 = vector.extract_strided_slice %7 {offsets = [48, 0], sizes = [8, 128], strides = [1, 1]} : vector<128x128xf32> to vector<8x128xf32>
    %15 = vector.extract_strided_slice %7 {offsets = [56, 0], sizes = [8, 128], strides = [1, 1]} : vector<128x128xf32> to vector<8x128xf32>
    %16 = vector.extract_strided_slice %7 {offsets = [64, 0], sizes = [8, 128], strides = [1, 1]} : vector<128x128xf32> to vector<8x128xf32>
    %17 = vector.extract_strided_slice %7 {offsets = [72, 0], sizes = [8, 128], strides = [1, 1]} : vector<128x128xf32> to vector<8x128xf32>
    %18 = vector.extract_strided_slice %7 {offsets = [80, 0], sizes = [8, 128], strides = [1, 1]} : vector<128x128xf32> to vector<8x128xf32>
    %19 = vector.extract_strided_slice %7 {offsets = [88, 0], sizes = [8, 128], strides = [1, 1]} : vector<128x128xf32> to vector<8x128xf32>
    %20 = vector.extract_strided_slice %7 {offsets = [96, 0], sizes = [8, 128], strides = [1, 1]} : vector<128x128xf32> to vector<8x128xf32>
    %21 = vector.extract_strided_slice %7 {offsets = [104, 0], sizes = [8, 128], strides = [1, 1]} : vector<128x128xf32> to vector<8x128xf32>
    %22 = vector.extract_strided_slice %7 {offsets = [112, 0], sizes = [8, 128], strides = [1, 1]} : vector<128x128xf32> to vector<8x128xf32>
    %23 = vector.extract_strided_slice %7 {offsets = [120, 0], sizes = [8, 128], strides = [1, 1]} : vector<128x128xf32> to vector<8x128xf32>
    %24 = tpu.concatenate %8, %9, %10, %11, %12, %13, %14, %15, %16, %17, %18, %19, %20, %21, %22, %23 in 1 : vector<8x128xf32>, vector<8x128xf32>, vector<8x128xf32>, vector<8x128xf32>, vector<8x128xf32>, vector<8x128xf32>, vector<8x128xf32>, vector<8x128xf32>, vector<8x128xf32>, vector<8x128xf32>, vector<8x128xf32>, vector<8x128xf32>, vector<8x128xf32>, vector<8x128xf32>, vector<8x128xf32>, vector<8x128xf32> -> vector<8x2048xf32>
    %c0_6 = arith.constant 0 : index
    %c0_7 = arith.constant 0 : index
    %25 = vector.load %arg4[%c0_6, %c0_7] : memref<2048x256xf32, #tpu.memory_space<vmem>>, vector<2048x256xf32>
    %cst_8 = arith.constant dense<0.000000e+00> : vector<8x256xf32>
    %26 = tpu.matmul %24, %25, %cst_8 {dimension_numbers = #tpu.dot_dimension_numbers<[1], [0], [0], [1], [0, 0, 1, 1], [], []>} : vector<8x2048xf32>, vector<2048x256xf32>, vector<8x256xf32> -> vector<8x256xf32>
    %c0_9 = arith.constant 0 : index
    %c0_10 = arith.constant 0 : index
    %27 = vector.load %arg5[%c0_9, %c0_10] : memref<1x256xf32, #tpu.memory_space<vmem>>, vector<1x256xf32>
    %28 = vector.broadcast %27 : vector<1x256xf32> to vector<8x256xf32>
    %29 = arith.addf %26, %28 : vector<8x256xf32>
    %cst_11 = arith.constant 0.000000e+00 : f32
    %30 = vector.broadcast %cst_11 : f32 to vector<8x256xf32>
    %31 = arith.maximumf %29, %30 : vector<8x256xf32>
    %c0_12 = arith.constant 0 : index
    %c0_13 = arith.constant 0 : index
    %32 = vector.load %arg6[%c0_12, %c0_13] : memref<256x32xf32, #tpu.memory_space<vmem>>, vector<256x32xf32>
    %cst_14 = arith.constant dense<0.000000e+00> : vector<8x32xf32>
    %33 = tpu.matmul %31, %32, %cst_14 {dimension_numbers = #tpu.dot_dimension_numbers<[1], [0], [0], [1], [0, 0, 1, 1], [], []>} : vector<8x256xf32>, vector<256x32xf32>, vector<8x32xf32> -> vector<8x32xf32>
    %c0_15 = arith.constant 0 : index
    %c0_16 = arith.constant 0 : index
    %34 = vector.load %arg7[%c0_15, %c0_16] : memref<1x32xf32, #tpu.memory_space<vmem>>, vector<1x32xf32>
    %35 = vector.broadcast %34 : vector<1x32xf32> to vector<8x32xf32>
    %36 = arith.addf %33, %35 : vector<8x32xf32>
    %cst_17 = arith.constant 0.000000e+00 : f32
    %37 = vector.broadcast %cst_17 : f32 to vector<8x32xf32>
    %38 = arith.maximumf %36, %37 : vector<8x32xf32>
    %c0_18 = arith.constant 0 : index
    %c0_19 = arith.constant 0 : index
    %39 = vector.load %arg8[%c0_18, %c0_19] : memref<32x32xf32, #tpu.memory_space<vmem>>, vector<32x32xf32>
    %cst_20 = arith.constant dense<0.000000e+00> : vector<8x32xf32>
    %40 = tpu.matmul %38, %39, %cst_20 {dimension_numbers = #tpu.dot_dimension_numbers<[1], [0], [0], [1], [0, 0, 1, 1], [], []>} : vector<8x32xf32>, vector<32x32xf32>, vector<8x32xf32> -> vector<8x32xf32>
    %c0_21 = arith.constant 0 : index
    %c0_22 = arith.constant 0 : index
    %41 = vector.load %arg9[%c0_21, %c0_22] : memref<1x32xf32, #tpu.memory_space<vmem>>, vector<1x32xf32>
    %42 = vector.broadcast %41 : vector<1x32xf32> to vector<8x32xf32>
    %43 = arith.addf %40, %42 : vector<8x32xf32>
    %cst_23 = arith.constant 0.000000e+00 : f32
    %44 = vector.broadcast %cst_23 : f32 to vector<8x32xf32>
    %45 = arith.maximumf %43, %44 : vector<8x32xf32>
    %46 = arith.cmpf one, %45, %45 : vector<8x32xf32>
    %cst_24 = arith.constant 0.000000e+00 : f32
    %47 = vector.broadcast %cst_24 : f32 to vector<8x32xf32>
    %48 = arith.select %46, %47, %45 : vector<8x32xi1>, vector<8x32xf32>
    %cst_25 = arith.constant 0x7F800000 : f32
    %49 = vector.broadcast %cst_25 : f32 to vector<8x32xf32>
    %50 = arith.cmpf oeq, %48, %49 : vector<8x32xf32>
    %cst_26 = arith.constant 1.000000e+00 : f32
    %51 = vector.broadcast %cst_26 : f32 to vector<8x32xf32>
    %52 = arith.select %50, %51, %48 : vector<8x32xi1>, vector<8x32xf32>
    %cst_27 = arith.constant 0xFF800000 : f32
    %53 = vector.broadcast %cst_27 : f32 to vector<8x32xf32>
    %54 = arith.cmpf oeq, %52, %53 : vector<8x32xf32>
    %cst_28 = arith.constant -1.000000e+00 : f32
    %55 = vector.broadcast %cst_28 : f32 to vector<8x32xf32>
    %56 = arith.select %54, %55, %52 : vector<8x32xi1>, vector<8x32xf32>
    %c0_29 = arith.constant 0 : index
    %c0_30 = arith.constant 0 : index
    %57 = vector.load %arg10[%c0_29, %c0_30] : memref<32x4xf32, #tpu.memory_space<vmem>>, vector<32x4xf32>
    %cst_31 = arith.constant dense<0.000000e+00> : vector<8x4xf32>
    %58 = tpu.matmul %56, %57, %cst_31 {dimension_numbers = #tpu.dot_dimension_numbers<[1], [0], [0], [1], [0, 0, 1, 1], [], []>} : vector<8x32xf32>, vector<32x4xf32>, vector<8x4xf32> -> vector<8x4xf32>
    %c0_32 = arith.constant 0 : index
    %c0_33 = arith.constant 0 : index
    %59 = vector.load %arg11[%c0_32, %c0_33] : memref<1x4xf32, #tpu.memory_space<vmem>>, vector<1x4xf32>
    %60 = vector.broadcast %59 : vector<1x4xf32> to vector<8x4xf32>
    %61 = arith.addf %58, %60 : vector<8x4xf32>
    %62 = arith.cmpf one, %61, %61 : vector<8x4xf32>
    %cst_34 = arith.constant 0.000000e+00 : f32
    %63 = vector.broadcast %cst_34 : f32 to vector<8x4xf32>
    %64 = arith.select %62, %63, %61 : vector<8x4xi1>, vector<8x4xf32>
    %cst_35 = arith.constant 0x7F800000 : f32
    %65 = vector.broadcast %cst_35 : f32 to vector<8x4xf32>
    %66 = arith.cmpf oeq, %64, %65 : vector<8x4xf32>
    %cst_36 = arith.constant 1.000000e+00 : f32
    %67 = vector.broadcast %cst_36 : f32 to vector<8x4xf32>
    %68 = arith.select %66, %67, %64 : vector<8x4xi1>, vector<8x4xf32>
    %cst_37 = arith.constant 0xFF800000 : f32
    %69 = vector.broadcast %cst_37 : f32 to vector<8x4xf32>
    %70 = arith.cmpf oeq, %68, %69 : vector<8x4xf32>
    %cst_38 = arith.constant -1.000000e+00 : f32
    %71 = vector.broadcast %cst_38 : f32 to vector<8x4xf32>
    %72 = arith.select %70, %71, %68 : vector<8x4xi1>, vector<8x4xf32>
    %c0_39 = arith.constant 0 : index
    %c0_40 = arith.constant 0 : index
    %73 = vector.load %arg1[%c0_39, %c0_40] : memref<8x4xf32, #tpu.memory_space<vmem>>, vector<8x4xf32>
    %74 = arith.addf %72, %73 : vector<8x4xf32>
    %75 = tpu.iota {dimensions = array<i32: 1>} : vector<8x4xi32>
    %cst_41 = arith.constant dense<0xFF800000> : vector<8xf32>
    %76 = vector.multi_reduction <maximumf>, %74, %cst_41 [1] : vector<8x4xf32> to vector<8xf32>
    %77 = vector.shape_cast %76 : vector<8xf32> to vector<8x1xf32>
    %78 = vector.broadcast %77 : vector<8x1xf32> to vector<8x4xf32>
    %79 = arith.cmpf oge, %74, %78 : vector<8x4xf32>
    %c4_i32 = arith.constant 4 : i32
    %80 = vector.broadcast %c4_i32 : i32 to vector<8x4xi32>
    %81 = arith.select %79, %75, %80 : vector<8x4xi1>, vector<8x4xi32>
    %cst_42 = arith.constant dense<2147483647> : vector<8xi32>
    %82 = vector.multi_reduction <minsi>, %81, %cst_42 [1] : vector<8x4xi32> to vector<8xi32>
    %83 = vector.shape_cast %82 : vector<8xi32> to vector<8x1xi32>
    %84 = vector.broadcast %83 : vector<8x1xi32> to vector<8x4xi32>
    %85 = arith.cmpi eq, %75, %84 : vector<8x4xi32>
    %86 = arith.extui %85 : vector<8x4xi1> to vector<8x4xi32>
    %87 = arith.sitofp %86 : vector<8x4xi32> to vector<8x4xf32>
    %c0_43 = arith.constant 0 : index
    %c0_44 = arith.constant 0 : index
    %88 = vector.load %arg12[%c0_43, %c0_44] : memref<32x64xf32, #tpu.memory_space<vmem>>, vector<32x64xf32>
    %cst_45 = arith.constant dense<0.000000e+00> : vector<8x64xf32>
    %89 = tpu.matmul %56, %88, %cst_45 {dimension_numbers = #tpu.dot_dimension_numbers<[1], [0], [0], [1], [0, 0, 1, 1], [], []>} : vector<8x32xf32>, vector<32x64xf32>, vector<8x64xf32> -> vector<8x64xf32>
    %c0_46 = arith.constant 0 : index
    %c0_47 = arith.constant 0 : index
    %90 = vector.load %arg13[%c0_46, %c0_47] : memref<1x64xf32, #tpu.memory_space<vmem>>, vector<1x64xf32>
    %91 = vector.broadcast %90 : vector<1x64xf32> to vector<8x64xf32>
    %92 = arith.addf %89, %91 : vector<8x64xf32>
    %c0_48 = arith.constant 0 : index
    %c0_49 = arith.constant 0 : index
    %93 = vector.load %arg14[%c0_48, %c0_49] : memref<32x64xf32, #tpu.memory_space<vmem>>, vector<32x64xf32>
    %cst_50 = arith.constant dense<0.000000e+00> : vector<8x64xf32>
    %94 = tpu.matmul %56, %93, %cst_50 {dimension_numbers = #tpu.dot_dimension_numbers<[1], [0], [0], [1], [0, 0, 1, 1], [], []>} : vector<8x32xf32>, vector<32x64xf32>, vector<8x64xf32> -> vector<8x64xf32>
    %c0_51 = arith.constant 0 : index
    %c0_52 = arith.constant 0 : index
    %95 = vector.load %arg15[%c0_51, %c0_52] : memref<1x64xf32, #tpu.memory_space<vmem>>, vector<1x64xf32>
    %96 = vector.broadcast %95 : vector<1x64xf32> to vector<8x64xf32>
    %97 = arith.addf %94, %96 : vector<8x64xf32>
    %cst_53 = arith.constant -1.000000e+01 : f32
    %cst_54 = arith.constant 2.000000e+00 : f32
    %98 = vector.broadcast %cst_53 : f32 to vector<8x64xf32>
    %99 = arith.maximumf %98, %97 : vector<8x64xf32>
    %100 = vector.broadcast %cst_54 : f32 to vector<8x64xf32>
    %101 = arith.minimumf %100, %99 : vector<8x64xf32>
    %102 = math.exp %101 : vector<8x64xf32>
    %cst_55 = arith.constant 1.000000e-03 : f32
    %103 = vector.broadcast %cst_55 : f32 to vector<8x64xf32>
    %104 = arith.maximumf %102, %103 : vector<8x64xf32>
    %cst_56 = arith.constant 0.000000e+00 : f32
    %105 = vector.broadcast %cst_56 : f32 to vector<8x16xf32>
    %cst_57 = arith.constant 0.000000e+00 : f32
    %106 = vector.broadcast %cst_57 : f32 to vector<8x16xf32>
    %107 = vector.extract_strided_slice %87 {offsets = [0, 0], sizes = [8, 1], strides = [1, 1]} : vector<8x4xf32> to vector<8x1xf32>
    %108 = vector.extract_strided_slice %92 {offsets = [0, 0], sizes = [8, 16], strides = [1, 1]} : vector<8x64xf32> to vector<8x16xf32>
    %109 = vector.broadcast %107 : vector<8x1xf32> to vector<8x16xf32>
    %110 = arith.mulf %109, %108 : vector<8x16xf32>
    %111 = arith.addf %105, %110 : vector<8x16xf32>
    %112 = vector.extract_strided_slice %104 {offsets = [0, 0], sizes = [8, 16], strides = [1, 1]} : vector<8x64xf32> to vector<8x16xf32>
    %113 = vector.broadcast %107 : vector<8x1xf32> to vector<8x16xf32>
    %114 = arith.mulf %113, %112 : vector<8x16xf32>
    %115 = arith.addf %106, %114 : vector<8x16xf32>
    %116 = vector.extract_strided_slice %87 {offsets = [0, 1], sizes = [8, 1], strides = [1, 1]} : vector<8x4xf32> to vector<8x1xf32>
    %117 = vector.extract_strided_slice %92 {offsets = [0, 16], sizes = [8, 16], strides = [1, 1]} : vector<8x64xf32> to vector<8x16xf32>
    %118 = vector.broadcast %116 : vector<8x1xf32> to vector<8x16xf32>
    %119 = arith.mulf %118, %117 : vector<8x16xf32>
    %120 = arith.addf %111, %119 : vector<8x16xf32>
    %121 = vector.extract_strided_slice %104 {offsets = [0, 16], sizes = [8, 16], strides = [1, 1]} : vector<8x64xf32> to vector<8x16xf32>
    %122 = vector.broadcast %116 : vector<8x1xf32> to vector<8x16xf32>
    %123 = arith.mulf %122, %121 : vector<8x16xf32>
    %124 = arith.addf %115, %123 : vector<8x16xf32>
    %125 = vector.extract_strided_slice %87 {offsets = [0, 2], sizes = [8, 1], strides = [1, 1]} : vector<8x4xf32> to vector<8x1xf32>
    %126 = vector.extract_strided_slice %92 {offsets = [0, 32], sizes = [8, 16], strides = [1, 1]} : vector<8x64xf32> to vector<8x16xf32>
    %127 = vector.broadcast %125 : vector<8x1xf32> to vector<8x16xf32>
    %128 = arith.mulf %127, %126 : vector<8x16xf32>
    %129 = arith.addf %120, %128 : vector<8x16xf32>
    %130 = vector.extract_strided_slice %104 {offsets = [0, 32], sizes = [8, 16], strides = [1, 1]} : vector<8x64xf32> to vector<8x16xf32>
    %131 = vector.broadcast %125 : vector<8x1xf32> to vector<8x16xf32>
    %132 = arith.mulf %131, %130 : vector<8x16xf32>
    %133 = arith.addf %124, %132 : vector<8x16xf32>
    %134 = vector.extract_strided_slice %87 {offsets = [0, 3], sizes = [8, 1], strides = [1, 1]} : vector<8x4xf32> to vector<8x1xf32>
    %135 = vector.extract_strided_slice %92 {offsets = [0, 48], sizes = [8, 16], strides = [1, 1]} : vector<8x64xf32> to vector<8x16xf32>
    %136 = vector.broadcast %134 : vector<8x1xf32> to vector<8x16xf32>
    %137 = arith.mulf %136, %135 : vector<8x16xf32>
    %138 = arith.addf %129, %137 : vector<8x16xf32>
    %139 = vector.extract_strided_slice %104 {offsets = [0, 48], sizes = [8, 16], strides = [1, 1]} : vector<8x64xf32> to vector<8x16xf32>
    %140 = vector.broadcast %134 : vector<8x1xf32> to vector<8x16xf32>
    %141 = arith.mulf %140, %139 : vector<8x16xf32>
    %142 = arith.addf %133, %141 : vector<8x16xf32>
    %143 = arith.cmpf one, %138, %138 : vector<8x16xf32>
    %cst_58 = arith.constant 0.000000e+00 : f32
    %144 = vector.broadcast %cst_58 : f32 to vector<8x16xf32>
    %145 = arith.select %143, %144, %138 : vector<8x16xi1>, vector<8x16xf32>
    %cst_59 = arith.constant 0x7F800000 : f32
    %146 = vector.broadcast %cst_59 : f32 to vector<8x16xf32>
    %147 = arith.cmpf oeq, %145, %146 : vector<8x16xf32>
    %cst_60 = arith.constant 1.000000e+00 : f32
    %148 = vector.broadcast %cst_60 : f32 to vector<8x16xf32>
    %149 = arith.select %147, %148, %145 : vector<8x16xi1>, vector<8x16xf32>
    %cst_61 = arith.constant 0xFF800000 : f32
    %150 = vector.broadcast %cst_61 : f32 to vector<8x16xf32>
    %151 = arith.cmpf oeq, %149, %150 : vector<8x16xf32>
    %cst_62 = arith.constant -1.000000e+00 : f32
    %152 = vector.broadcast %cst_62 : f32 to vector<8x16xf32>
    %153 = arith.select %151, %152, %149 : vector<8x16xi1>, vector<8x16xf32>
    %c0_63 = arith.constant 0 : index
    %c0_64 = arith.constant 0 : index
    %154 = vector.load %arg16[%c0_63, %c0_64] : memref<8x16xf32, #tpu.memory_space<vmem>>, vector<8x16xf32>
    tpu.vector_store %arg16[%c0_63, %c0_64], %153 {strides = array<i32>} : memref<8x16xf32, #tpu.memory_space<vmem>>, vector<8x16xf32>,
    %155 = arith.cmpf one, %142, %142 : vector<8x16xf32>
    %cst_65 = arith.constant 0.000000e+00 : f32
    %156 = vector.broadcast %cst_65 : f32 to vector<8x16xf32>
    %157 = arith.select %155, %156, %142 : vector<8x16xi1>, vector<8x16xf32>
    %cst_66 = arith.constant 0x7F800000 : f32
    %158 = vector.broadcast %cst_66 : f32 to vector<8x16xf32>
    %159 = arith.cmpf oeq, %157, %158 : vector<8x16xf32>
    %cst_67 = arith.constant 1.000000e+00 : f32
    %160 = vector.broadcast %cst_67 : f32 to vector<8x16xf32>
    %161 = arith.select %159, %160, %157 : vector<8x16xi1>, vector<8x16xf32>
    %cst_68 = arith.constant 0xFF800000 : f32
    %162 = vector.broadcast %cst_68 : f32 to vector<8x16xf32>
    %163 = arith.cmpf oeq, %161, %162 : vector<8x16xf32>
    %cst_69 = arith.constant -1.000000e+00 : f32
    %164 = vector.broadcast %cst_69 : f32 to vector<8x16xf32>
    %165 = arith.select %163, %164, %161 : vector<8x16xi1>, vector<8x16xf32>
    %c0_70 = arith.constant 0 : index
    %c0_71 = arith.constant 0 : index
    %166 = vector.load %arg17[%c0_70, %c0_71] : memref<8x16xf32, #tpu.memory_space<vmem>>, vector<8x16xf32>
    tpu.vector_store %arg17[%c0_70, %c0_71], %165 {strides = array<i32>} : memref<8x16xf32, #tpu.memory_space<vmem>>, vector<8x16xf32>,
    %c0_72 = arith.constant 0 : index
    %c0_73 = arith.constant 0 : index
    %167 = vector.load %arg18[%c0_72, %c0_73] : memref<8x4xf32, #tpu.memory_space<vmem>>, vector<8x4xf32>
    tpu.vector_store %arg18[%c0_72, %c0_73], %72 {strides = array<i32>} : memref<8x4xf32, #tpu.memory_space<vmem>>, vector<8x4xf32>,
    %c0_74 = arith.constant 0 : index
    %c0_75 = arith.constant 0 : index
    %168 = vector.load %arg19[%c0_74, %c0_75] : memref<8x4xf32, #tpu.memory_space<vmem>>, vector<8x4xf32>
    tpu.vector_store %arg19[%c0_74, %c0_75], %87 {strides = array<i32>} : memref<8x4xf32, #tpu.memory_space<vmem>>, vector<8x4xf32>,
    return
  }
}

</mosaic_0001>

<bundles_post_ra>
// kernel: prior_forward.1
= control target key start
LH: loop header
LB: loop body
LE: loop exit
PB: predicated region body
PF: predicated region fallthrough
CT: control target
= control target key end

     0   :  { %s4968_s0 = inlined_call_operand.vmem [shape: f32[128,768], index: 0, kind: input, shape index: {}]   ;;  %s4969_s1 = inlined_call_operand.vmem [shape: f32[8,4], index: 1, kind: input, shape index: {}]   ;;  %s4970_s2 = inlined_call_operand.vmem [shape: f32[768,128], index: 2, kind: input, shape index: {}]   ;;  %s4971_s3 = inlined_call_operand.vmem [shape: f32[1,128], index: 3, kind: input, shape index: {}]   ;;  %s4972_s4 = inlined_call_operand.vmem [shape: f32[2048,256], index: 4, kind: input, shape index: {}]   ;;  %s4973_s5 = inlined_call_operand.vmem [shape: f32[1,256], index: 5, kind: input, shape index: {}]   ;;  %s4974_s6 = inlined_call_operand.vmem [shape: f32[256,32], index: 6, kind: input, shape index: {}]   ;;  %s4975_s7 = inlined_call_operand.vmem [shape: f32[1,32], index: 7, kind: input, shape index: {}]   ;;  %s4976_s8 = inlined_call_operand.vmem [shape: f32[32,32], index: 8, kind: input, shape index: {}]   ;;  %s4977_s9 = inlined_call_operand.vmem [shape: f32[1,32], index: 9, kind: input, shape index: {}]   ;;  %s4978_s10 = inlined_call_operand.vmem [shape: f32[32,4], index: 10, kind: input, shape index: {}]   ;;  %s4979_s11 = inlined_call_operand.vmem [shape: f32[1,4], index: 11, kind: input, shape index: {}]   ;;  %s4980_s12 = inlined_call_operand.vmem [shape: f32[32,64], index: 12, kind: input, shape index: {}]   ;;  %s4981_s13 = inlined_call_operand.vmem [shape: f32[1,64], index: 13, kind: input, shape index: {}]   ;;  %s4982_s14 = inlined_call_operand.vmem [shape: f32[32,64], index: 14, kind: input, shape index: {}]   ;;  %s4983_s15 = inlined_call_operand.vmem [shape: f32[1,64], index: 15, kind: input, shape index: {}]   ;;  %s4984_s16 = inlined_call_operand.hbm [shape: f32[8,16], index: 16, kind: output, shape index: {0}]   ;;  %s4985_s17 = inlined_call_operand.hbm [shape: f32[8,16], index: 17, kind: output, shape index: {1}]   ;;  %s4986_s18 = inlined_call_operand.vmem [shape: f32[8,4], index: 18, kind: output, shape index: {2}]   ;;  %s4987_s19 = inlined_call_operand.vmem [shape: f32[8,4], index: 19, kind: output, shape index: {3}]  }
   0x1   :  { %4991 = sst [smem:[#allocation8_spill]] %s4968_s0 }
   0x2   :  { %4992 = sst [smem:[#allocation9_spill]] %s4969_s1 }
   0x3   :  { %4993 = sst [smem:[#allocation10_spill]] %s4970_s2 }
   0x4   :  { %4994 = sst [smem:[#allocation11_spill]] %s4971_s3 }
   0x5   :  { %25 = vsyncpa [#allocation3], 0  ;;  %s4995_s20 = sld [smem:[#allocation10_spill]] }
   0x6   :  { %s4996_s0 = sld [smem:[#allocation8_spill]] }
   0xb   :  { %v170_v0 = vld [vmem:[%s4995_s20 + $0x78] sm:$0xff]  ;;  %v169_v2 = vld [vmem:[%s4995_s20 + $0x70] sm:$0xff]  ;;  %v168_v6 = vld [vmem:[%s4995_s20 + $0x68] sm:$0xff] }
   0xc   :  { %v202_v1 = vld [vmem:[%s4995_s20 + $0x178] sm:$0xff]  ;;  %255 = vmatpush.msra.mxu0 %v170_v0  ;;  %v201_v4 = vld [vmem:[%s4995_s20 + $0x170] sm:$0xff]  ;;  %v200_v8 = vld [vmem:[%s4995_s20 + $0x168] sm:$0xff] }
   0xd   :  { %385 = vmatpush.msra.mxu2 %v202_v1  ;;  %v186_v3 = vld [vmem:[%s4995_s20 + $0xf8] sm:$0xff]  ;;  %v185_v7 = vld [vmem:[%s4995_s20 + $0xf0] sm:$0xff]  ;;  %v184_v10 = vld [vmem:[%s4995_s20 + $0xe8] sm:$0xff] }
   0xe   :  { %v218_v5 = vld [vmem:[%s4995_s20 + $0x1f8] sm:$0xff]  ;;  %320 = vmatpush.msra.mxu1 %v186_v3  ;;  %256 = vmatpush.msra.mxu0 %v169_v2  ;;  %v217_v9 = vld [vmem:[%s4995_s20 + $0x1f0] sm:$0xff]  ;;  %v167_v11 = vld [vmem:[%s4995_s20 + $0x60] sm:$0xff] }
   0xf   :  { %450 = vmatpush.msra.mxu3 %v218_v5  ;;  %386 = vmatpush.msra.mxu2 %v201_v4  ;;  %v199_v12 = vld [vmem:[%s4995_s20 + $0x160] sm:$0xff]  ;;  %v216_v13 = vld [vmem:[%s4995_s20 + $0x1e8] sm:$0xff]  ;;  %v166_v16 = vld [vmem:[%s4995_s20 + $0x58] sm:$0xff] }
  0x10   :  { %321 = vmatpush.msra.mxu1 %v185_v7  ;;  %257 = vmatpush.msra.mxu0 %v168_v6  ;;  %v183_v14 = vld [vmem:[%s4995_s20 + $0xe0] sm:$0xff]  ;;  %v198_v17 = vld [vmem:[%s4995_s20 + $0x158] sm:$0xff]  ;;  %v165_v20 = vld [vmem:[%s4995_s20 + $0x50] sm:$0xff] }
  0x11   :  { %451 = vmatpush.msra.mxu3 %v217_v9  ;;  %387 = vmatpush.msra.mxu2 %v200_v8  ;;  %v215_v15 = vld [vmem:[%s4995_s20 + $0x1e0] sm:$0xff]  ;;  %v182_v18 = vld [vmem:[%s4995_s20 + $0xd8] sm:$0xff]  ;;  %v197_v21 = vld [vmem:[%s4995_s20 + $0x150] sm:$0xff] }
  0x12   :  { %322 = vmatpush.msra.mxu1 %v184_v10  ;;  %258 = vmatpush.msra.mxu0 %v167_v11  ;;  %v214_v19 = vld [vmem:[%s4995_s20 + $0x1d8] sm:$0xff]  ;;  %v181_v22 = vld [vmem:[%s4995_s20 + $0xd0] sm:$0xff]  ;;  %v164_v24 = vld [vmem:[%s4995_s20 + $0x48] sm:$0xff] }
  0x13   :  { %452 = vmatpush.msra.mxu3 %v216_v13  ;;  %388 = vmatpush.msra.mxu2 %v199_v12  ;;  %v213_v23 = vld [vmem:[%s4995_s20 + $0x1d0] sm:$0xff]  ;;  %v196_v25 = vld [vmem:[%s4995_s20 + $0x148] sm:$0xff]  ;;  %v163_v28 = vld [vmem:[%s4995_s20 + $0x40] sm:$0xff] }
  0x14   :  { %323 = vmatpush.msra.mxu1 %v183_v14  ;;  %259 = vmatpush.msra.mxu0 %v166_v16  ;;  %v180_v26 = vld [vmem:[%s4995_s20 + $0xc8] sm:$0xff]  ;;  %v195_v29 = vld [vmem:[%s4995_s20 + $0x140] sm:$0xff]  ;;  %v162_v32 = vld [vmem:[%s4995_s20 + $0x38] sm:$0xff] }
  0x15   :  { %453 = vmatpush.msra.mxu3 %v215_v15  ;;  %389 = vmatpush.msra.mxu2 %v198_v17  ;;  %v212_v27 = vld [vmem:[%s4995_s20 + $0x1c8] sm:$0xff]  ;;  %v179_v30 = vld [vmem:[%s4995_s20 + $0xc0] sm:$0xff]  ;;  %v194_v33 = vld [vmem:[%s4995_s20 + $0x138] sm:$0xff] }
  0x16   :  { %324 = vmatpush.msra.mxu1 %v182_v18  ;;  %260 = vmatpush.msra.mxu0 %v165_v20  ;;  %v211_v31 = vld [vmem:[%s4995_s20 + $0x1c0] sm:$0xff]  ;;  %v178_v34 = vld [vmem:[%s4995_s20 + $0xb8] sm:$0xff]  ;;  %v161_v36 = vld [vmem:[%s4995_s20 + $0x30] sm:$0xff] }
  0x17   :  { %454 = vmatpush.msra.mxu3 %v214_v19  ;;  %390 = vmatpush.msra.mxu2 %v197_v21  ;;  %v210_v35 = vld [vmem:[%s4995_s20 + $0x1b8] sm:$0xff]  ;;  %v193_v37 = vld [vmem:[%s4995_s20 + $0x130] sm:$0xff]  ;;  %v160_v40 = vld [vmem:[%s4995_s20 + $0x28] sm:$0xff] }
  0x18   :  { %325 = vmatpush.msra.mxu1 %v181_v22  ;;  %261 = vmatpush.msra.mxu0 %v164_v24  ;;  %v177_v38 = vld [vmem:[%s4995_s20 + $0xb0] sm:$0xff]  ;;  %v192_v41 = vld [vmem:[%s4995_s20 + $0x128] sm:$0xff]  ;;  %v159_v44 = vld [vmem:[%s4995_s20 + $0x20] sm:$0xff] }
  0x19   :  { %455 = vmatpush.msra.mxu3 %v213_v23  ;;  %391 = vmatpush.msra.mxu2 %v196_v25  ;;  %v209_v39 = vld [vmem:[%s4995_s20 + $0x1b0] sm:$0xff]  ;;  %v176_v42 = vld [vmem:[%s4995_s20 + $0xa8] sm:$0xff]  ;;  %v191_v45 = vld [vmem:[%s4995_s20 + $0x120] sm:$0xff] }
  0x1a   :  { %326 = vmatpush.msra.mxu1 %v180_v26  ;;  %262 = vmatpush.msra.mxu0 %v163_v28  ;;  %v208_v43 = vld [vmem:[%s4995_s20 + $0x1a8] sm:$0xff]  ;;  %v175_v46 = vld [vmem:[%s4995_s20 + $0xa0] sm:$0xff]  ;;  %v158_v48 = vld [vmem:[%s4995_s20 + $0x18] sm:$0xff] }
  0x1b   :  { %456 = vmatpush.msra.mxu3 %v212_v27  ;;  %392 = vmatpush.msra.mxu2 %v195_v29  ;;  %v207_v47 = vld [vmem:[%s4995_s20 + $0x1a0] sm:$0xff]  ;;  %v190_v49 = vld [vmem:[%s4995_s20 + $0x118] sm:$0xff]  ;;  %v157_v52 = vld [vmem:[%s4995_s20 + $0x10] sm:$0xff] }
  0x1c   :  { %327 = vmatpush.msra.mxu1 %v179_v30  ;;  %263 = vmatpush.msra.mxu0 %v162_v32  ;;  %v174_v50 = vld [vmem:[%s4995_s20 + $0x98] sm:$0xff]  ;;  %v189_v53 = vld [vmem:[%s4995_s20 + $0x110] sm:$0xff]  ;;  %v156_v54 = vld [vmem:[%s4995_s20 + $0x8] sm:$0xff] }
  0x1d   :  { %457 = vmatpush.msra.mxu3 %v211_v31  ;;  %393 = vmatpush.msra.mxu2 %v194_v33  ;;  %v206_v51 = vld [vmem:[%s4995_s20 + $0x198] sm:$0xff]  ;;  %v173_v55 = vld [vmem:[%s4995_s20 + $0x90] sm:$0xff]  ;;  %v188_v56 = vld [vmem:[%s4995_s20 + $0x108] sm:$0xff] }
  0x1e   :  { %328 = vmatpush.msra.mxu1 %v178_v34  ;;  %264 = vmatpush.msra.mxu0 %v161_v36  ;;  %v205_v57 = vld [vmem:[%s4995_s20 + $0x190] sm:$0xff]  ;;  %v155_v58 = vld [vmem:[%s4995_s20] sm:$0xff]  ;;  %v172_v59 = vld [vmem:[%s4995_s20 + $0x88] sm:$0xff] }
  0x1f   :  { %458 = vmatpush.msra.mxu3 %v210_v35  ;;  %394 = vmatpush.msra.mxu2 %v193_v37  ;;  %v187_v60 = vld [vmem:[%s4995_s20 + $0x100] sm:$0xff]  ;;  %v204_v61 = vld [vmem:[%s4995_s20 + $0x188] sm:$0xff]  ;;  %v61_v63 = vld [vmem:[%s4996_s0 + $0x10] sm:$0xff] }
  0x20   :  { %329 = vmatpush.msra.mxu1 %v177_v38  ;;  %265 = vmatpush.msra.mxu0 %v160_v40  ;;  %v59_v62 = vld [vmem:[%s4996_s0] sm:$0xff] }
  0x21   :  { %459 = vmatpush.msra.mxu3 %v209_v39  ;;  %395 = vmatpush.msra.mxu2 %v192_v41 }
  0x22   :  { %330 = vmatpush.msra.mxu1 %v176_v42  ;;  %266 = vmatpush.msra.mxu0 %v159_v44 }
  0x23   :  { %460 = vmatpush.msra.mxu3 %v208_v43  ;;  %396 = vmatpush.msra.mxu2 %v191_v45 }
  0x24   :  { %331 = vmatpush.msra.mxu1 %v175_v46  ;;  %267 = vmatpush.msra.mxu0 %v158_v48 }
  0x25   :  { %461 = vmatpush.msra.mxu3 %v207_v47  ;;  %397 = vmatpush.msra.mxu2 %v190_v49 }
  0x26   :  { %332 = vmatpush.msra.mxu1 %v174_v50  ;;  %268 = vmatpush.msra.mxu0 %v157_v52 }
  0x27   :  { %462 = vmatpush.msra.mxu3 %v206_v51  ;;  %398 = vmatpush.msra.mxu2 %v189_v53 }
  0x28   :  { %333 = vmatpush.msra.mxu1 %v173_v55  ;;  %269 = vmatpush.msra.mxu0 %v156_v54 }
  0x29   :  { %463 = vmatpush.msra.mxu3 %v205_v57  ;;  %399 = vmatpush.msra.mxu2 %v188_v56 }
  0x2a   :  { %26 = vsyncpa [#allocation5], 0  ;;  %334 = vmatpush.msra.mxu1 %v172_v59  ;;  %v171_v0 = vld [vmem:[%s4995_s20 + $0x80] sm:$0xff]  ;;  %270 = vmatpush.msra.mxu0 %v155_v58  ;;  %v60_v2 = vld [vmem:[%s4996_s0 + $0x8] sm:$0xff]  ;;  %s4997_s27 = sld [smem:[#allocation11_spill]]  ;;  %vm1906_vm0 = vcmask 261120  }
  0x2b   :  { %464 = vmatpush.msra.mxu3 %v204_v61  ;;  %v203_v1 = vld [vmem:[%s4995_s20 + $0x180] sm:$0xff]  ;;  %400 = vmatpush.msra.mxu2 %v187_v60  ;;  %v62_v3 = vld [vmem:[%s4996_s0 + $0x18] sm:$0xff]  ;;  %v65_v4 = vld [vmem:[%s4996_s0 + $0x30] sm:$0xff]  ;;  %s4998_s21 = sld [smem:[#allocation9_spill]]  ;;  %vm1978_vm6 = vcmask 31744   ;;  %s2264_s24 = smov 80  }
  0x2c   :  { %271 = vmatmul.f32.vlgmr.msra.gmra.mxu0 %v59_v62  ;;  %401 = vmatmul.f32.vlgmr.msra.gmra.mxu2 %v61_v63  ;;  %v67_v5 = vld [vmem:[%s4996_s0 + $0x40] sm:$0xff]  ;;  %v66_v6 = vld [vmem:[%s4996_s0 + $0x38] sm:$0xff]  ;;  %v68_v7 = vld [vmem:[%s4996_s0 + $0x48] sm:$0xff]  ;;  %vm2126_vm13 = vcmask 130048   ;;  %s2267_s26 = smov [#allocation2]   ;;  %s2144_s28 = sshll.u32 %s4984_s16, 4  ;;  %s2145_s28 = int_to_ptr.hbm [resolvable:$true] %s2144_s28 }
  0x2d   :  { %335 = vmatpush.msra.mxu1 %v171_v0  ;;  %465 = vmatpush.msra.mxu3 %v203_v1  ;;  %v71_v8 = vld [vmem:[%s4996_s0 + $0x60] sm:$0xff]  ;;  %v73_v9 = vld [vmem:[%s4996_s0 + $0x70] sm:$0xff]  ;;  %v72_v10 = vld [vmem:[%s4996_s0 + $0x68] sm:$0xff] }
  0x2e   :  { %336 = vmatmul.f32.vlgmr.msra.gmra.mxu1 %v60_v2  ;;  %466 = vmatmul.f32.vlgmr.msra.gmra.mxu3 %v62_v3  ;;  %v74_v11 = vld [vmem:[%s4996_s0 + $0x78] sm:$0xff]  ;;  %v77_v12 = vld [vmem:[%s4996_s0 + $0x90] sm:$0xff]  ;;  %v79_v13 = vld [vmem:[%s4996_s0 + $0xa0] sm:$0xff] }
  0x2f   :  { %v78_v14 = vld [vmem:[%s4996_s0 + $0x98] sm:$0xff]  ;;  %v80_v15 = vld [vmem:[%s4996_s0 + $0xa8] sm:$0xff]  ;;  %v83_v16 = vld [vmem:[%s4996_s0 + $0xc0] sm:$0xff] }
  0x30   :  { %v85_v17 = vld [vmem:[%s4996_s0 + $0xd0] sm:$0xff]  ;;  %v84_v18 = vld [vmem:[%s4996_s0 + $0xc8] sm:$0xff]  ;;  %v86_v19 = vld [vmem:[%s4996_s0 + $0xd8] sm:$0xff] }
  0x31   :  { %v89_v20 = vld [vmem:[%s4996_s0 + $0xf0] sm:$0xff]  ;;  %v91_v21 = vld [vmem:[%s4996_s0 + $0x100] sm:$0xff]  ;;  %v90_v22 = vld [vmem:[%s4996_s0 + $0xf8] sm:$0xff] }
  0x32   :  { %v92_v23 = vld [vmem:[%s4996_s0 + $0x108] sm:$0xff]  ;;  %v234_v24 = vld [vmem:[%s4995_s20 + $0x278] sm:$0xff]  ;;  %v95_v26 = vld [vmem:[%s4996_s0 + $0x120] sm:$0xff] }
  0x33   :  { %515 = vmatpush.msrb.mxu0 %v234_v24  ;;  %v250_v25 = vld [vmem:[%s4995_s20 + $0x2f8] sm:$0xff]  ;;  %v97_v27 = vld [vmem:[%s4996_s0 + $0x130] sm:$0xff]  ;;  %v96_v28 = vld [vmem:[%s4996_s0 + $0x128] sm:$0xff] }
  0x34   :  { %274 = vmatmul.f32.gmra.mxu0 %v65_v4  ;;  %404 = vmatmul.f32.gmra.mxu2 %v67_v5  ;;  %v98_v29 = vld [vmem:[%s4996_s0 + $0x138] sm:$0xff]  ;;  %v233_v30 = vld [vmem:[%s4995_s20 + $0x270] sm:$0xff]  ;;  %v103_v33 = vld [vmem:[%s4996_s0 + $0x160] sm:$0xff] }
  0x35   :  { %580 = vmatpush.msrb.mxu1 %v250_v25  ;;  %516 = vmatpush.msrb.mxu0 %v233_v30  ;;  %v249_v31 = vld [vmem:[%s4995_s20 + $0x2f0] sm:$0xff]  ;;  %v102_v34 = vld [vmem:[%s4996_s0 + $0x158] sm:$0xff]  ;;  %v104_v35 = vld [vmem:[%s4996_s0 + $0x168] sm:$0xff] }
  0x36   :  { %339 = vmatmul.f32.gmra.mxu1 %v66_v6  ;;  %469 = vmatmul.f32.gmra.mxu3 %v68_v7  ;;  %v101_v32 = vld [vmem:[%s4996_s0 + $0x150] sm:$0xff]  ;;  %v232_v36 = vld [vmem:[%s4995_s20 + $0x268] sm:$0xff]  ;;  %v107_v38 = vld [vmem:[%s4996_s0 + $0x180] sm:$0xff] }
  0x37   :  { %581 = vmatpush.msrb.mxu1 %v249_v31  ;;  %517 = vmatpush.msrb.mxu0 %v232_v36  ;;  %v248_v37 = vld [vmem:[%s4995_s20 + $0x2e8] sm:$0xff]  ;;  %v109_v39 = vld [vmem:[%s4996_s0 + $0x190] sm:$0xff]  ;;  %v110_v41 = vld [vmem:[%s4996_s0 + $0x198] sm:$0xff] }
  0x38   :  { %v108_v40 = vld [vmem:[%s4996_s0 + $0x188] sm:$0xff]  ;;  %v231_v42 = vld [vmem:[%s4995_s20 + $0x260] sm:$0xff]  ;;  %v113_v44 = vld [vmem:[%s4996_s0 + $0x1b0] sm:$0xff] }
  0x39   :  { %582 = vmatpush.msrb.mxu1 %v248_v37  ;;  %518 = vmatpush.msrb.mxu0 %v231_v42  ;;  %v247_v43 = vld [vmem:[%s4995_s20 + $0x2e0] sm:$0xff]  ;;  %v114_v46 = vld [vmem:[%s4996_s0 + $0x1b8] sm:$0xff]  ;;  %v116_v47 = vld [vmem:[%s4996_s0 + $0x1c8] sm:$0xff] }
  0x3a   :  { %v115_v45 = vld [vmem:[%s4996_s0 + $0x1c0] sm:$0xff]  ;;  %v230_v48 = vld [vmem:[%s4995_s20 + $0x258] sm:$0xff]  ;;  %v229_v49 = vld [vmem:[%s4995_s20 + $0x250] sm:$0xff] }
  0x3b   :  { %583 = vmatpush.msrb.mxu1 %v247_v43  ;;  %519 = vmatpush.msrb.mxu0 %v230_v48  ;;  %v246_v50 = vld [vmem:[%s4995_s20 + $0x2d8] sm:$0xff]  ;;  %v228_v51 = vld [vmem:[%s4995_s20 + $0x248] sm:$0xff]  ;;  %v245_v52 = vld [vmem:[%s4995_s20 + $0x2d0] sm:$0xff] }
  0x3c   :  { %277 = vmatmul.f32.gmra.mxu0 %v71_v8  ;;  %407 = vmatmul.f32.gmra.mxu2 %v73_v9  ;;  %v227_v53 = vld [vmem:[%s4995_s20 + $0x240] sm:$0xff]  ;;  %v244_v54 = vld [vmem:[%s4995_s20 + $0x2c8] sm:$0xff]  ;;  %v121_v56 = vld [vmem:[%s4996_s0 + $0x1f0] sm:$0xff] }
  0x3d   :  { %520 = vmatpush.msrb.mxu0 %v229_v49  ;;  %584 = vmatpush.msrb.mxu1 %v246_v50  ;;  %v119_v55 = vld [vmem:[%s4996_s0 + $0x1e0] sm:$0xff]  ;;  %v120_v57 = vld [vmem:[%s4996_s0 + $0x1e8] sm:$0xff]  ;;  %v122_v58 = vld [vmem:[%s4996_s0 + $0x1f8] sm:$0xff] }
  0x3e   :  { %342 = vmatmul.f32.gmra.mxu1 %v72_v10  ;;  %472 = vmatmul.f32.gmra.mxu3 %v74_v11  ;;  %v226_v59 = vld [vmem:[%s4995_s20 + $0x238] sm:$0xff]  ;;  %v243_v60 = vld [vmem:[%s4995_s20 + $0x2c0] sm:$0xff]  ;;  %v225_v61 = vld [vmem:[%s4995_s20 + $0x230] sm:$0xff] }
  0x3f   :  { %521 = vmatpush.msrb.mxu0 %v228_v51  ;;  %585 = vmatpush.msrb.mxu1 %v245_v52  ;;  %v242_v62 = vld [vmem:[%s4995_s20 + $0x2b8] sm:$0xff]  ;;  %v224_v63 = vld [vmem:[%s4995_s20 + $0x228] sm:$0xff]  ;;  %v241_v0 = vld [vmem:[%s4995_s20 + $0x2b0] sm:$0xff] }
  0x40   :  { %v223_v1 = vld [vmem:[%s4995_s20 + $0x220] sm:$0xff]  ;;  %v240_v2 = vld [vmem:[%s4995_s20 + $0x2a8] sm:$0xff]  ;;  %v125_v3 = vld [vmem:[%s4996_s0 + $0x210] sm:$0xff] }
  0x41   :  { %522 = vmatpush.msrb.mxu0 %v227_v53  ;;  %586 = vmatpush.msrb.mxu1 %v244_v54  ;;  %v127_v4 = vld [vmem:[%s4996_s0 + $0x220] sm:$0xff]  ;;  %v126_v5 = vld [vmem:[%s4996_s0 + $0x218] sm:$0xff]  ;;  %v128_v6 = vld [vmem:[%s4996_s0 + $0x228] sm:$0xff] }
  0x42   :  { %v222_v7 = vld [vmem:[%s4995_s20 + $0x218] sm:$0xff]  ;;  %v239_v8 = vld [vmem:[%s4995_s20 + $0x2a0] sm:$0xff]  ;;  %v221_v9 = vld [vmem:[%s4995_s20 + $0x210] sm:$0xff] }
  0x43   :  { %523 = vmatpush.msrb.mxu0 %v226_v59  ;;  %587 = vmatpush.msrb.mxu1 %v243_v60  ;;  %v238_v10 = vld [vmem:[%s4995_s20 + $0x298] sm:$0xff]  ;;  %v220_v11 = vld [vmem:[%s4995_s20 + $0x208] sm:$0xff]  ;;  %v143_v24 = vld [vmem:[%s4996_s0 + $0x2a0] sm:$0xff] }
  0x44   :  { %280 = vmatmul.f32.gmra.mxu0 %v77_v12  ;;  %410 = vmatmul.f32.gmra.mxu2 %v79_v13  ;;  %v237_v12 = vld [vmem:[%s4995_s20 + $0x290] sm:$0xff]  ;;  %v131_v13 = vld [vmem:[%s4996_s0 + $0x240] sm:$0xff]  ;;  %v150_v30 = vld [vmem:[%s4996_s0 + $0x2d8] sm:$0xff] }
  0x45   :  { %524 = vmatpush.msrb.mxu0 %v225_v61  ;;  %588 = vmatpush.msrb.mxu1 %v242_v62  ;;  %v145_v25 = vld [vmem:[%s4996_s0 + $0x2b0] sm:$0xff]  ;;  %v152_v31 = vld [vmem:[%s4996_s0 + $0x2e8] sm:$0xff]  ;;  %v87_v49 = vld [vmem:[%s4996_s0 + $0xe0] sm:$0xff] }
  0x46   :  { %345 = vmatmul.f32.gmra.mxu1 %v78_v14  ;;  %475 = vmatmul.f32.gmra.mxu3 %v80_v15  ;;  %v133_v14 = vld [vmem:[%s4996_s0 + $0x250] sm:$0xff]  ;;  %v219_v15 = vld [vmem:[%s4995_s20 + $0x200] sm:$0xff]  ;;  %v76_v43 = vld [vmem:[%s4996_s0 + $0x88] sm:$0xff] }
  0x47   :  { %525 = vmatpush.msrb.mxu0 %v224_v63  ;;  %589 = vmatpush.msrb.mxu1 %v241_v0  ;;  %v69_v37 = vld [vmem:[%s4996_s0 + $0x50] sm:$0xff]  ;;  %v88_v51 = vld [vmem:[%s4996_s0 + $0xe8] sm:$0xff]  ;;  %v685_v59 = vld [vmem:[%s4972_s4 + $0xc0] sm:$0xff] }
  0x48   :  { %v93_v53 = vld [vmem:[%s4996_s0 + $0x110] sm:$0xff]  ;;  %v99_v61 = vld [vmem:[%s4996_s0 + $0x140] sm:$0xff] }
  0x49   :  { %526 = vmatpush.msrb.mxu0 %v223_v1  ;;  %590 = vmatpush.msrb.mxu1 %v240_v2  ;;  %v691_v54 = vld [vmem:[%s4972_s4 + $0xf0] sm:$0xff]  ;;  %v100_v1 = vld [vmem:[%s4996_s0 + $0x148] sm:$0xff]  ;;  %v681_v2 = vld [vmem:[%s4972_s4 + $0xa0] sm:$0xff] }
  0x4a   :  { %1179 = vmatpush.msrb.mxu2 %v691_v54  ;;  %v683_v62 = vld [vmem:[%s4972_s4 + $0xb0] sm:$0xff]  ;;  %v693_v54 = vld [vmem:[%s4972_s4 + $0x100] sm:$0xff] }
  0x4b   :  { %527 = vmatpush.msrb.mxu0 %v222_v7  ;;  %591 = vmatpush.msrb.mxu1 %v239_v8  ;;  %v723_v63 = vld [vmem:[%s4972_s4 + $0x1f0] sm:$0xff]  ;;  %v717_v7 = vld [vmem:[%s4972_s4 + $0x1c0] sm:$0xff] }
  0x4c   :  { %283 = vmatmul.f32.gmra.mxu0 %v83_v16  ;;  %413 = vmatmul.f32.gmra.mxu2 %v85_v17  ;;  %v236_v16 = vld [vmem:[%s4995_s20 + $0x288] sm:$0xff] }
  0x4d   :  { %528 = vmatpush.msrb.mxu0 %v221_v9  ;;  %592 = vmatpush.msrb.mxu1 %v238_v10  ;;  %v132_v17 = vld [vmem:[%s4996_s0 + $0x248] sm:$0xff]  ;;  %v105_v9 = vld [vmem:[%s4996_s0 + $0x170] sm:$0xff] }
  0x4e   :  { %348 = vmatmul.f32.gmra.mxu1 %v84_v18  ;;  %478 = vmatmul.f32.gmra.mxu3 %v86_v19  ;;  %v134_v18 = vld [vmem:[%s4996_s0 + $0x258] sm:$0xff]  ;;  %v235_v19 = vld [vmem:[%s4995_s20 + $0x280] sm:$0xff]  ;;  %v675_v10 = vld [vmem:[%s4972_s4 + $0x70] sm:$0xff] }
  0x4f   :  { %529 = vmatpush.msrb.mxu0 %v220_v11  ;;  %593 = vmatpush.msrb.mxu1 %v237_v12  ;;  %v715_v11 = vld [vmem:[%s4972_s4 + $0x1b0] sm:$0xff] }
  0x50   :  { %1199 = vmatpush.msrb.mxu3 %v723_v63 }
  0x51   :  { %530 = vmatpush.msrb.mxu0 %v219_v15  ;;  %594 = vmatpush.msrb.mxu1 %v236_v16  ;;  %v713_v15 = vld [vmem:[%s4972_s4 + $0x1a0] sm:$0xff]  ;;  %v671_v16 = vld [vmem:[%s4972_s4 + $0x50] sm:$0xff] }
  0x53   :  { %595 = vmatpush.msrb.mxu1 %v235_v19  ;;  %v709_v19 = vld [vmem:[%s4972_s4 + $0x180] sm:$0xff] }
  0x54   :  { %286 = vmatmul.f32.gmra.mxu0 %v89_v20  ;;  %416 = vmatmul.f32.gmra.mxu2 %v91_v21  ;;  %v137_v20 = vld [vmem:[%s4996_s0 + $0x270] sm:$0xff]  ;;  %v139_v21 = vld [vmem:[%s4996_s0 + $0x280] sm:$0xff] }
  0x56   :  { %351 = vmatmul.f32.gmra.mxu1 %v90_v22  ;;  %481 = vmatmul.f32.gmra.mxu3 %v92_v23  ;;  %v138_v22 = vld [vmem:[%s4996_s0 + $0x278] sm:$0xff]  ;;  %v140_v23 = vld [vmem:[%s4996_s0 + $0x288] sm:$0xff] }
  0x5c   :  { %289 = vmatmul.f32.gmra.mxu0 %v95_v26  ;;  %419 = vmatmul.f32.gmra.mxu2 %v97_v27  ;;  %v144_v26 = vld [vmem:[%s4996_s0 + $0x2a8] sm:$0xff]  ;;  %v146_v27 = vld [vmem:[%s4996_s0 + $0x2b8] sm:$0xff] }
  0x5e   :  { %354 = vmatmul.f32.gmra.mxu1 %v96_v28  ;;  %484 = vmatmul.f32.gmra.mxu3 %v98_v29  ;;  %v149_v28 = vld [vmem:[%s4996_s0 + $0x2d0] sm:$0xff]  ;;  %v151_v29 = vld [vmem:[%s4996_s0 + $0x2e0] sm:$0xff] }
  0x64   :  { %292 = vmatmul.f32.gmra.mxu0 %v101_v32  ;;  %422 = vmatmul.f32.gmra.mxu2 %v103_v33  ;;  %v63_v33 = vld [vmem:[%s4996_s0 + $0x20] sm:$0xff] }
  0x66   :  { %357 = vmatmul.f32.gmra.mxu1 %v102_v34  ;;  %487 = vmatmul.f32.gmra.mxu3 %v104_v35  ;;  %v64_v35 = vld [vmem:[%s4996_s0 + $0x28] sm:$0xff] }
  0x6c   :  { %295 = vmatmul.f32.gmra.mxu0 %v107_v38  ;;  %425 = vmatmul.f32.gmra.mxu2 %v109_v39  ;;  %v70_v39 = vld [vmem:[%s4996_s0 + $0x58] sm:$0xff] }
  0x6e   :  { %360 = vmatmul.f32.gmra.mxu1 %v108_v40  ;;  %490 = vmatmul.f32.gmra.mxu3 %v110_v41  ;;  %v75_v41 = vld [vmem:[%s4996_s0 + $0x80] sm:$0xff] }
  0x74   :  { %298 = vmatmul.f32.gmra.mxu0 %v113_v44  ;;  %428 = vmatmul.f32.gmra.mxu2 %v115_v45  ;;  %v81_v45 = vld [vmem:[%s4996_s0 + $0xb0] sm:$0xff] }
  0x76   :  { %363 = vmatmul.f32.gmra.mxu1 %v114_v46  ;;  %493 = vmatmul.f32.gmra.mxu3 %v116_v47  ;;  %v82_v47 = vld [vmem:[%s4996_s0 + $0xb8] sm:$0xff] }
  0x7c   :  { %301 = vmatmul.f32.gmra.mxu0 %v119_v55  ;;  %431 = vmatmul.f32.gmra.mxu2 %v121_v56  ;;  %v94_v56 = vld [vmem:[%s4996_s0 + $0x118] sm:$0xff] }
  0x7e   :  { %366 = vmatmul.f32.gmra.mxu1 %v120_v57  ;;  %496 = vmatmul.f32.gmra.mxu3 %v122_v58  ;;  %v689_v57 = vld [vmem:[%s4972_s4 + $0xe0] sm:$0xff]  ;;  %v687_v58 = vld [vmem:[%s4972_s4 + $0xd0] sm:$0xff] }
  0x7f   :  { %1180 = vmatpush.msrb.mxu2 %v689_v57  ;;  %v787_v57 = vld [vmem:[%s4972_s4 + $0x3f0] sm:$0xff] }
  0x81   :  { %1181 = vmatpush.msrb.mxu2 %v687_v58 }
  0x83   :  { %1182 = vmatpush.msrb.mxu2 %v685_v59  ;;  %v123_v59 = vld [vmem:[%s4996_s0 + $0x200] sm:$0xff] }
  0x84   :  { %304 = vmatmul.f32.gmra.mxu0 %v125_v3  ;;  %434 = vmatmul.f32.gmra.mxu2 %v127_v4  ;;  %v721_v3 = vld [vmem:[%s4972_s4 + $0x1e0] sm:$0xff]  ;;  %v679_v4 = vld [vmem:[%s4972_s4 + $0x90] sm:$0xff] }
  0x85   :  { %1183 = vmatpush.msrb.mxu2 %v683_v62  ;;  %1200 = vmatpush.msrb.mxu3 %v721_v3  ;;  %v785_v62 = vld [vmem:[%s4972_s4 + $0x3e0] sm:$0xff]  ;;  %v783_v3 = vld [vmem:[%s4972_s4 + $0x3d0] sm:$0xff] }
  0x86   :  { %369 = vmatmul.f32.gmra.mxu1 %v126_v5  ;;  %499 = vmatmul.f32.gmra.mxu3 %v128_v6  ;;  %v719_v5 = vld [vmem:[%s4972_s4 + $0x1d0] sm:$0xff]  ;;  %v677_v6 = vld [vmem:[%s4972_s4 + $0x80] sm:$0xff] }
  0x87   :  { %1184 = vmatpush.msrb.mxu2 %v681_v2  ;;  %1201 = vmatpush.msrb.mxu3 %v719_v5  ;;  %v743_v2 = vld [vmem:[%s4972_s4 + $0x290] sm:$0xff]  ;;  %v781_v5 = vld [vmem:[%s4972_s4 + $0x3c0] sm:$0xff] }
  0x89   :  { %1185 = vmatpush.msrb.mxu2 %v679_v4  ;;  %1202 = vmatpush.msrb.mxu3 %v717_v7  ;;  %v741_v4 = vld [vmem:[%s4972_s4 + $0x280] sm:$0xff]  ;;  %v779_v7 = vld [vmem:[%s4972_s4 + $0x3b0] sm:$0xff] }
  0x8b   :  { %1186 = vmatpush.msrb.mxu2 %v677_v6  ;;  %1203 = vmatpush.msrb.mxu3 %v715_v11  ;;  %v739_v6 = vld [vmem:[%s4972_s4 + $0x270] sm:$0xff]  ;;  %v737_v11 = vld [vmem:[%s4972_s4 + $0x260] sm:$0xff] }
  0x8c   :  { %307 = vmatmul.f32.gmra.mxu0 %v131_v13  ;;  %437 = vmatmul.f32.gmra.mxu2 %v133_v14  ;;  %v106_v13 = vld [vmem:[%s4996_s0 + $0x178] sm:$0xff]  ;;  %v673_v14 = vld [vmem:[%s4972_s4 + $0x60] sm:$0xff] }
  0x8d   :  { %1187 = vmatpush.msrb.mxu2 %v675_v10  ;;  %1204 = vmatpush.msrb.mxu3 %v713_v15  ;;  %v129_v10 = vld [vmem:[%s4996_s0 + $0x230] sm:$0xff]  ;;  %v130_v15 = vld [vmem:[%s4996_s0 + $0x238] sm:$0xff] }
  0x8e   :  { %372 = vmatmul.f32.gmra.mxu1 %v132_v17  ;;  %502 = vmatmul.f32.gmra.mxu3 %v134_v18  ;;  %v711_v17 = vld [vmem:[%s4972_s4 + $0x190] sm:$0xff]  ;;  %v669_v18 = vld [vmem:[%s4972_s4 + $0x40] sm:$0xff] }
  0x8f   :  { %1188 = vmatpush.msrb.mxu2 %v673_v14  ;;  %1205 = vmatpush.msrb.mxu3 %v711_v17  ;;  %v775_v17 = vld [vmem:[%s4972_s4 + $0x390] sm:$0xff] }
  0x91   :  { %1189 = vmatpush.msrb.mxu2 %v671_v16  ;;  %1206 = vmatpush.msrb.mxu3 %v709_v19  ;;  %v735_v16 = vld [vmem:[%s4972_s4 + $0x250] sm:$0xff]  ;;  %v773_v19 = vld [vmem:[%s4972_s4 + $0x380] sm:$0xff] }
  0x93   :  { %1190 = vmatpush.msrb.mxu2 %v669_v18  ;;  %v733_v18 = vld [vmem:[%s4972_s4 + $0x240] sm:$0xff] }
  0x94   :  { %310 = vmatmul.f32.gmra.mxu0 %v137_v20  ;;  %440 = vmatmul.f32.gmra.mxu2 %v139_v21  ;;  %v111_v21 = vld [vmem:[%s4996_s0 + $0x1a0] sm:$0xff] }
  0x96   :  { %375 = vmatmul.f32.gmra.mxu1 %v138_v22  ;;  %505 = vmatmul.f32.gmra.mxu3 %v140_v23  ;;  %v667_v22 = vld [vmem:[%s4972_s4 + $0x30] sm:$0xff] }
  0x97   :  { %v707_v23 = vld [vmem:[%s4972_s4 + $0x170] sm:$0xff]  ;;  %1191 = vmatpush.msrb.mxu2 %v667_v22 }
  0x98   :  { %1207 = vmatpush.msrb.mxu3 %v707_v23  ;;  %v731_v22 = vld [vmem:[%s4972_s4 + $0x230] sm:$0xff] }
  0x99   :  { %v771_v23 = vld [vmem:[%s4972_s4 + $0x370] sm:$0xff] }
  0x9c   :  { %313 = vmatmul.f32.gmra.mxu0 %v143_v24  ;;  %443 = vmatmul.f32.gmra.mxu2 %v145_v25  ;;  %v112_v25 = vld [vmem:[%s4996_s0 + $0x1a8] sm:$0xff] }
  0x9e   :  { %378 = vmatmul.f32.gmra.mxu1 %v144_v26  ;;  %508 = vmatmul.f32.gmra.mxu3 %v146_v27  ;;  %v665_v26 = vld [vmem:[%s4972_s4 + $0x20] sm:$0xff] }
  0x9f   :  { %v705_v27 = vld [vmem:[%s4972_s4 + $0x160] sm:$0xff]  ;;  %1192 = vmatpush.msrb.mxu2 %v665_v26 }
  0xa0   :  { %1208 = vmatpush.msrb.mxu3 %v705_v27  ;;  %v135_v26 = vld [vmem:[%s4996_s0 + $0x260] sm:$0xff] }
  0xa1   :  { %v729_v27 = vld [vmem:[%s4972_s4 + $0x220] sm:$0xff] }
  0xa4   :  { %316 = vmatmul.f32.gmra.mxu0 %v149_v28  ;;  %446 = vmatmul.f32.gmra.mxu2 %v151_v29  ;;  %v663_v28 = vld [vmem:[%s4972_s4 + $0x10] sm:$0xff] }
  0xa5   :  { %v703_v29 = vld [vmem:[%s4972_s4 + $0x150] sm:$0xff]  ;;  %1193 = vmatpush.msrb.mxu2 %v663_v28  ;;  %v769_v28 = vld [vmem:[%s4972_s4 + $0x360] sm:$0xff] }
  0xa6   :  { %381 = vmatmul.f32.gmra.mxu1 %v150_v30  ;;  %511 = vmatmul.f32.gmra.mxu3 %v152_v31  ;;  %v661_v30 = vld [vmem:[%s4972_s4] sm:$0xff] }
  0xa7   :  { %1209 = vmatpush.msrb.mxu3 %v703_v29  ;;  %v701_v31 = vld [vmem:[%s4972_s4 + $0x140] sm:$0xff]  ;;  %1194 = vmatpush.msrb.mxu2 %v661_v30 }
  0xa9   :  { %v2848_v32 = vpop.f32.mrf.mxu0  ;;  %1210 = vmatpush.msrb.mxu3 %v701_v31  ;;  %v136_v31 = vld [vmem:[%s4996_s0 + $0x268] sm:$0xff] }
  0xab   :  { %v2853_v34 = vpop.f32.mrf.mxu1 }
  0xac   :  { %531 = vmatmul.f32.vlgmr.msrb.gmra.mxu0 %v63_v33  ;;  %v755_v33 = vld [vmem:[%s4972_s4 + $0x2f0] sm:$0xff] }
  0xad   :  { %1219 = vmatpush.msra.mxu2 %v755_v33  ;;  %v727_v33 = vld [vmem:[%s4972_s4 + $0x210] sm:$0xff] }
  0xae   :  { %596 = vmatmul.f32.vlgmr.msrb.gmra.mxu1 %v64_v35 }
  0xb1   :  { %v2858_v36 = vpop.f32.mrf.mxu0  ;;  %v3143_v29 = vpop.f32.mrf.mxu3 }
  0xb3   :  { %v2863_v38 = vpop.f32.mrf.mxu1 }
  0xb4   :  { %534 = vmatmul.f32.gmra.mxu0 %v69_v37  ;;  %v117_v37 = vld [vmem:[%s4996_s0 + $0x1d0] sm:$0xff] }
  0xb6   :  { %599 = vmatmul.f32.gmra.mxu1 %v70_v39  ;;  %v699_v39 = vld [vmem:[%s4972_s4 + $0x130] sm:$0xff] }
  0xb7   :  { %1211 = vmatpush.msrb.mxu3 %v699_v39  ;;  %v725_v39 = vld [vmem:[%s4972_s4 + $0x200] sm:$0xff] }
  0xb9   :  { %v2868_v40 = vpop.f32.mrf.mxu0 }
  0xbb   :  { %v2873_v42 = vpop.f32.mrf.mxu1 }
  0xbc   :  { %537 = vmatmul.f32.gmra.mxu0 %v75_v41  ;;  %v753_v41 = vld [vmem:[%s4972_s4 + $0x2e0] sm:$0xff] }
  0xbd   :  { %1220 = vmatpush.msra.mxu2 %v753_v41  ;;  %v765_v41 = vld [vmem:[%s4972_s4 + $0x340] sm:$0xff] }
  0xbe   :  { %602 = vmatmul.f32.gmra.mxu1 %v76_v43 }
  0xc1   :  { %v2878_v44 = vpop.f32.mrf.mxu0 }
  0xc3   :  { %v2883_v46 = vpop.f32.mrf.mxu1 }
  0xc4   :  { %540 = vmatmul.f32.gmra.mxu0 %v81_v45  ;;  %v118_v45 = vld [vmem:[%s4996_s0 + $0x1d8] sm:$0xff] }
  0xc6   :  { %605 = vmatmul.f32.gmra.mxu1 %v82_v47  ;;  %v697_v47 = vld [vmem:[%s4972_s4 + $0x120] sm:$0xff] }
  0xc7   :  { %1212 = vmatpush.msrb.mxu3 %v697_v47 }
  0xc9   :  { %v2888_v48 = vpop.f32.mrf.mxu0 }
  0xcb   :  { %v2893_v50 = vpop.f32.mrf.mxu1 }
  0xcc   :  { %543 = vmatmul.f32.gmra.mxu0 %v87_v49  ;;  %v751_v49 = vld [vmem:[%s4972_s4 + $0x2d0] sm:$0xff] }
  0xcd   :  { %1221 = vmatpush.msra.mxu2 %v751_v49  ;;  %v141_v49 = vld [vmem:[%s4996_s0 + $0x290] sm:$0xff] }
  0xce   :  { %608 = vmatmul.f32.gmra.mxu1 %v88_v51  ;;  %v695_v51 = vld [vmem:[%s4972_s4 + $0x110] sm:$0xff] }
  0xcf   :  { %1213 = vmatpush.msrb.mxu3 %v695_v51  ;;  %v763_v51 = vld [vmem:[%s4972_s4 + $0x330] sm:$0xff] }
  0xd1   :  { %v2898_v52 = vpop.f32.mrf.mxu0  ;;  %1214 = vmatpush.msrb.mxu3 %v693_v54  ;;  %v142_v54 = vld [vmem:[%s4996_s0 + $0x298] sm:$0xff] }
  0xd3   :  { %v2906_v55 = vpop.f32.mrf.mxu1  ;;  %1239 = vmatpush.msra.mxu3 %v787_v57  ;;  %v947_v57 = vld [vmem:[%s4972_s4 + $0x8f0] sm:$0xff] }
  0xd4   :  { %546 = vmatmul.f32.gmra.mxu0 %v93_v53  ;;  %v749_v53 = vld [vmem:[%s4972_s4 + $0x2c0] sm:$0xff] }
  0xd5   :  { %1222 = vmatpush.msra.mxu2 %v749_v53  ;;  %1240 = vmatpush.msra.mxu3 %v785_v62  ;;  %v945_v62 = vld [vmem:[%s4972_s4 + $0x8e0] sm:$0xff] }
  0xd6   :  { %611 = vmatmul.f32.gmra.mxu1 %v94_v56  ;;  %v747_v56 = vld [vmem:[%s4972_s4 + $0x2b0] sm:$0xff]  ;;  %1339 = vmatpush.msra.mxu0 %v947_v57  ;;  %v969_v57 = vld [vmem:[%s4972_s4 + $0x9a0] sm:$0xff] }
  0xd7   :  { %1223 = vmatpush.msra.mxu2 %v747_v56  ;;  %1241 = vmatpush.msra.mxu3 %v783_v3  ;;  %v761_v56 = vld [vmem:[%s4972_s4 + $0x320] sm:$0xff] }
  0xd8   :  { %1340 = vmatpush.msra.mxu0 %v945_v62  ;;  %v967_v62 = vld [vmem:[%s4972_s4 + $0x990] sm:$0xff] }
  0xd9   :  { %v2920_v60 = vpop.f32.mrf.mxu0  ;;  %1242 = vmatpush.msra.mxu3 %v781_v5  ;;  %v941_v5 = vld [vmem:[%s4972_s4 + $0x8c0] sm:$0xff] }
  0xdb   :  { %v2931_v0 = vpop.f32.mrf.mxu1  ;;  %1243 = vmatpush.msra.mxu3 %v779_v7 }
  0xdc   :  { %549 = vmatmul.f32.gmra.mxu0 %v99_v61  ;;  %v745_v61 = vld [vmem:[%s4972_s4 + $0x2a0] sm:$0xff] }
  0xdd   :  { %1224 = vmatpush.msra.mxu2 %v745_v61  ;;  %v759_v61 = vld [vmem:[%s4972_s4 + $0x310] sm:$0xff] }
  0xde   :  { %614 = vmatmul.f32.gmra.mxu1 %v100_v1  ;;  %v124_v1 = vld [vmem:[%s4996_s0 + $0x208] sm:$0xff] }
  0xdf   :  { %1225 = vmatpush.msra.mxu2 %v743_v2  ;;  %v943_v2 = vld [vmem:[%s4972_s4 + $0x8d0] sm:$0xff] }
  0xe0   :  { %1341 = vmatpush.msra.mxu0 %v943_v2 }
  0xe1   :  { %v2954_v8 = vpop.f32.mrf.mxu0  ;;  %1226 = vmatpush.msra.mxu2 %v741_v4  ;;  %v147_v4 = vld [vmem:[%s4996_s0 + $0x2c0] sm:$0xff] }
  0xe2   :  { %1342 = vmatpush.msra.mxu0 %v941_v5  ;;  %v965_v5 = vld [vmem:[%s4972_s4 + $0x980] sm:$0xff] }
  0xe3   :  { %v2965_v12 = vpop.f32.mrf.mxu1  ;;  %1227 = vmatpush.msra.mxu2 %v739_v6  ;;  %v3208_v6 = vld [vmem:[%s4997_s27] ss:$0 sm:$0xff] }
  0xe4   :  { %552 = vmatmul.f32.gmra.mxu0 %v105_v9 }
  0xe5   :  { %1228 = vmatpush.msra.mxu2 %v737_v11  ;;  %v148_v11 = vld [vmem:[%s4996_s0 + $0x2c8] sm:$0xff] }
  0xe6   :  { %617 = vmatmul.f32.gmra.mxu1 %v106_v13  ;;  %v777_v13 = vld [vmem:[%s4972_s4 + $0x3a0] sm:$0xff] }
  0xe7   :  { %1244 = vmatpush.msra.mxu3 %v777_v13  ;;  %1229 = vmatpush.msra.mxu2 %v735_v16  ;;  %v939_v13 = vld [vmem:[%s4972_s4 + $0x8b0] sm:$0xff]  ;;  %v937_v16 = vld [vmem:[%s4972_s4 + $0x8a0] sm:$0xff] }
  0xe8   :  { %1343 = vmatpush.msra.mxu0 %v939_v13 }
  0xe9   :  { %v2988_v20 = vpop.f32.mrf.mxu0  ;;  %1245 = vmatpush.msra.mxu3 %v775_v17  ;;  %1230 = vmatpush.msra.mxu2 %v733_v18  ;;  %v977_v17 = vld [vmem:[%s4972_s4 + $0x9e0] sm:$0xff]  ;;  %v273_v18 = vadd.f32 %v3208_v6, %v2848_v32 }
  0xea   :  { %1344 = vmatpush.msra.mxu0 %v937_v16  ;;  %v933_v32 = vld [vmem:[%s4972_s4 + $0x880] sm:$0xff]  ;;  %v963_v16 = vld [vmem:[%s4972_s4 + $0x970] sm:$0xff] }
  0xeb   :  { %v2999_v24 = vpop.f32.mrf.mxu1  ;;  %1246 = vmatpush.msra.mxu3 %v773_v19  ;;  %1231 = vmatpush.msra.mxu2 %v731_v22  ;;  %v935_v22 = vld [vmem:[%s4972_s4 + $0x890] sm:$0xff] }
  0xec   :  { %555 = vmatmul.f32.gmra.mxu0 %v111_v21  ;;  %v3124_v21 = vpop.f32.mrf.mxu2 }
  0xed   :  { %1247 = vmatpush.msra.mxu3 %v771_v23  ;;  %1232 = vmatpush.msra.mxu2 %v729_v27  ;;  %v975_v23 = vld [vmem:[%s4972_s4 + $0x9d0] sm:$0xff] }
  0xee   :  { %620 = vmatmul.f32.gmra.mxu1 %v112_v25  ;;  %v153_v27 = vld [vmem:[%s4996_s0 + $0x2f0] sm:$0xff]  ;;  %1345 = vmatpush.msra.mxu0 %v935_v22  ;;  %v961_v22 = vld [vmem:[%s4972_s4 + $0x960] sm:$0xff] }
  0xef   :  { %1248 = vmatpush.msra.mxu3 %v769_v28  ;;  %1233 = vmatpush.msra.mxu2 %v727_v33  ;;  %v973_v28 = vld [vmem:[%s4972_s4 + $0x9c0] sm:$0xff] }
  0xf0   :  { %1346 = vmatpush.msra.mxu0 %v933_v32  ;;  %v919_v32 = vld [vmem:[%s4972_s4 + $0x810] sm:$0xff] }
  0xf1   :  { %v3025_v35 = vpop.f32.mrf.mxu0  ;;  %1234 = vmatpush.msra.mxu2 %v725_v39  ;;  %v154_v39 = vld [vmem:[%s4996_s0 + $0x2f8] sm:$0xff]  ;;  %s2142_s0 = sshll.u32 %s2267_s26, 4  ;;  %s2143_s0 = int_to_ptr.vmem [resolvable:$true] %s2142_s0 }
  0xf3   :  { %v3036_v43 = vpop.f32.mrf.mxu1 }
  0xf4   :  { %558 = vmatmul.f32.gmra.mxu0 %v117_v37  ;;  %v767_v37 = vld [vmem:[%s4972_s4 + $0x350] sm:$0xff] }
  0xf5   :  { %1249 = vmatpush.msra.mxu3 %v767_v37 }
  0xf6   :  { %623 = vmatmul.f32.gmra.mxu1 %v118_v45  ;;  %v3162_v45 = vpop.f32.mrf.mxu2 }
  0xf7   :  { %1250 = vmatpush.msra.mxu3 %v765_v41  ;;  %v931_v41 = vld [vmem:[%s4972_s4 + $0x870] sm:$0xff] }
  0xf8   :  { %1347 = vmatpush.msra.mxu0 %v931_v41 }
  0xf9   :  { %v3062_v58 = vpop.f32.mrf.mxu0  ;;  %1251 = vmatpush.msra.mxu3 %v763_v51 }
  0xfb   :  { %v3073_v63 = vpop.f32.mrf.mxu1  ;;  %1252 = vmatpush.msra.mxu3 %v761_v56  ;;  %v929_v56 = vld [vmem:[%s4972_s4 + $0x860] sm:$0xff] }
  0xfc   :  { %561 = vmatmul.f32.gmra.mxu0 %v123_v59  ;;  %v3183_v59 = vpop.f32.mrf.mxu3 }
  0xfd   :  { %1253 = vmatpush.msra.mxu3 %v759_v61  ;;  %v276_v61 = vadd.f32 %v3208_v6, %v2858_v36  ;;  %1348 = vmatpush.msra.mxu0 %v929_v56  ;;  %v925_v36 = vld [vmem:[%s4972_s4 + $0x840] sm:$0xff] }
  0xfe   :  { %626 = vmatmul.f32.gmra.mxu1 %v124_v1  ;;  %v757_v1 = vld [vmem:[%s4972_s4 + $0x300] sm:$0xff]  ;;  %v3210_v7 = vpop.f32.mrf.mxu2 }
  0xff   :  { %1254 = vmatpush.msra.mxu3 %v757_v1 }
 0x101   :  { %v3096_v9 = vpop.f32.mrf.mxu0 }
 0x103   :  { %v3107_v14 = vpop.f32.mrf.mxu1 }
 0x104   :  { %564 = vmatmul.f32.gmra.mxu0 %v129_v10  ;;  %v3231_v19 = vpop.f32.mrf.mxu3 }
 0x106   :  { %629 = vmatmul.f32.gmra.mxu1 %v130_v15  ;;  %v979_v15 = vld [vmem:[%s4972_s4 + $0x9f0] sm:$0xff] }
 0x107   :  { %1359 = vmatpush.msra.mxu1 %v979_v15 }
 0x109   :  { %v3132_v25 = vpop.f32.mrf.mxu0  ;;  %1360 = vmatpush.msra.mxu1 %v977_v17 }
 0x10b   :  { %v3145_v30 = vpop.f32.mrf.mxu1  ;;  %1361 = vmatpush.msra.mxu1 %v975_v23  ;;  %v279_v23 = vadd.f32 %v3208_v6, %v2868_v40 }
 0x10c   :  { %567 = vmatmul.f32.gmra.mxu0 %v135_v26  ;;  %v3279_v2 = vpop.f32.mrf.mxu3 }
 0x10d   :  { %1362 = vmatpush.msra.mxu1 %v973_v28  ;;  %v959_v28 = vld [vmem:[%s4972_s4 + $0x950] sm:$0xff] }
 0x10e   :  { %632 = vmatmul.f32.gmra.mxu1 %v136_v31  ;;  %v338_v31 = vadd.f32 %v2853_v34, %v273_v18 }
 0x110   :  { %v403_v51 = vadd.f32 %v3124_v21, %v338_v31  ;;  %v927_v21 = vld [vmem:[%s4972_s4 + $0x850] sm:$0xff]  ;;  %v817_v31 = vld [vmem:[%s4972_s4 + $0x4e0] sm:$0xff] }
 0x111   :  { %v3164_v47 = vpop.f32.mrf.mxu0  ;;  %1349 = vmatpush.msra.mxu0 %v927_v21 }
 0x112   :  { %v468_v1 = vadd.f32 %v3143_v29, %v403_v51  ;;  %v923_v29 = vld [vmem:[%s4972_s4 + $0x830] sm:$0xff] }
 0x113   :  { %v3172_v53 = vpop.f32.mrf.mxu1  ;;  %1350 = vmatpush.msra.mxu0 %v925_v36  ;;  %v1075_v51 = vld [vmem:[%s4972_s4 + $0xcf0] sm:$0xff] }
 0x114   :  { %570 = vmatmul.f32.gmra.mxu0 %v141_v49  ;;  %v971_v49 = vld [vmem:[%s4972_s4 + $0x9b0] sm:$0xff]  ;;  %v3336_v56 = vpop.f32.mrf.mxu3 }
 0x115   :  { %1363 = vmatpush.msra.mxu1 %v971_v49  ;;  %1351 = vmatpush.msra.mxu0 %v923_v29  ;;  %v815_v49 = vld [vmem:[%s4972_s4 + $0x4d0] sm:$0xff]  ;;  %v809_v29 = vld [vmem:[%s4972_s4 + $0x4a0] sm:$0xff] }
 0x116   :  { %635 = vmatmul.f32.gmra.mxu1 %v142_v54  ;;  %v3262_v54 = vpop.f32.mrf.mxu2 }
 0x117   :  { %1364 = vmatpush.msra.mxu1 %v969_v57 }
 0x119   :  { %v3197_v3 = vpop.f32.mrf.mxu0  ;;  %1365 = vmatpush.msra.mxu1 %v967_v62  ;;  %v813_v62 = vld [vmem:[%s4972_s4 + $0x4c0] sm:$0xff] }
 0x11b   :  { %v3212_v10 = vpop.f32.mrf.mxu1  ;;  %1366 = vmatpush.msra.mxu1 %v965_v5  ;;  %v811_v5 = vld [vmem:[%s4972_s4 + $0x4b0] sm:$0xff] }
 0x11c   :  { %573 = vmatmul.f32.gmra.mxu0 %v147_v4 }
 0x11d   :  { %1367 = vmatpush.msra.mxu1 %v963_v16  ;;  %v849_v16 = vld [vmem:[%s4972_s4 + $0x5e0] sm:$0xff] }
 0x11e   :  { %638 = vmatmul.f32.gmra.mxu1 %v148_v11  ;;  %v341_v11 = vadd.f32 %v2863_v38, %v276_v61  ;;  %v921_v38 = vld [vmem:[%s4972_s4 + $0x820] sm:$0xff]  ;;  %v955_v61 = vld [vmem:[%s4972_s4 + $0x930] sm:$0xff] }
 0x11f   :  { %1352 = vmatpush.msra.mxu0 %v921_v38  ;;  %1368 = vmatpush.msra.mxu1 %v961_v22  ;;  %v949_v22 = vld [vmem:[%s4972_s4 + $0x900] sm:$0xff] }
 0x120   :  { %v406_v17 = vadd.f32 %v3162_v45, %v341_v11  ;;  %v819_v45 = vld [vmem:[%s4972_s4 + $0x4f0] sm:$0xff] }
 0x121   :  { %v317_v26 = vpop.f32.mrf.mxu0  ;;  %1353 = vmatpush.msra.mxu0 %v919_v32  ;;  %1369 = vmatpush.msra.mxu1 %v959_v28  ;;  %v851_v11 = vld [vmem:[%s4972_s4 + $0x5f0] sm:$0xff] }
 0x122   :  { %v318_v33 = vadd.f32 %v3208_v6, %v317_v26  ;;  %v471_v40 = vadd.f32 %v3183_v59, %v406_v17  ;;  %v344_v59 = vadd.f32 %v2873_v42, %v279_v23  ;;  %v807_v32 = vld [vmem:[%s4972_s4 + $0x490] sm:$0xff] }
 0x123   :  { %v382_v37 = vpop.f32.mrf.mxu1  ;;  %v847_v28 = vld [vmem:[%s4972_s4 + $0x5d0] sm:$0xff] }
 0x124   :  { %v3260_v34 = vadd.f32 %v382_v37, %v318_v33  ;;  %576 = vmatmul.f32.gmra.mxu0 %v153_v27  ;;  %v3309_v27 = vpop.f32.mrf.mxu2  ;;  %v917_v37 = vld [vmem:[%s4972_s4 + $0x800] sm:$0xff]  ;;  %v409_v42 = vadd.f32 %v3210_v7, %v344_v59  ;;  %v282_v7 = vadd.f32 %v3208_v6, %v2878_v44  ;;  %v951_v44 = vld [vmem:[%s4972_s4 + $0x910] sm:$0xff] }
 0x125   :  { %1354 = vmatpush.msra.mxu0 %v917_v37  ;;  %v845_v59 = vld [vmem:[%s4972_s4 + $0x5c0] sm:$0xff] }
 0x126   :  { %641 = vmatmul.f32.gmra.mxu1 %v154_v39  ;;  %v957_v39 = vld [vmem:[%s4972_s4 + $0x940] sm:$0xff]  ;;  %v347_v23 = vadd.f32 %v2883_v46, %v282_v7  ;;  %v1107_v46 = vld [vmem:[%s4972_s4 + $0xdf0] sm:$0xff] }
 0x127   :  { %1370 = vmatpush.msra.mxu1 %v957_v39  ;;  %1419 = vmatpush.msrb.mxu0 %v1075_v51  ;;  %v805_v39 = vld [vmem:[%s4972_s4 + $0x480] sm:$0xff] }
 0x129   :  { %v532_v4 = vpop.f32.mrf.mxu0  ;;  %1371 = vmatpush.msra.mxu1 %v955_v61  ;;  %v843_v61 = vld [vmem:[%s4972_s4 + $0x5b0] sm:$0xff] }
 0x12a   :  { %v533_v13 = vadd.f32 %v532_v4, %v468_v1  ;;  %v1073_v1 = vld [vmem:[%s4972_s4 + $0xce0] sm:$0xff] }
 0x12b   :  { %v597_v15 = vpop.f32.mrf.mxu1  ;;  %v953_v4 = vld [vmem:[%s4972_s4 + $0x920] sm:$0xff]  ;;  %1420 = vmatpush.msrb.mxu0 %v1073_v1 }
 0x12c   :  { %v3295_v18 = vadd.f32 %v597_v15, %v533_v13  ;;  %v1071_v13 = vld [vmem:[%s4972_s4 + $0xcd0] sm:$0xff]  ;;  %v474_v15 = vadd.f32 %v3231_v19, %v409_v42  ;;  %1372 = vmatpush.msra.mxu1 %v953_v4  ;;  %v3377_v17 = vpop.f32.mrf.mxu2  ;;  %v1069_v19 = vld [vmem:[%s4972_s4 + $0xcc0] sm:$0xff] }
 0x12d   :  { %1421 = vmatpush.msrb.mxu0 %v1071_v13  ;;  %v1105_v42 = vld [vmem:[%s4972_s4 + $0xde0] sm:$0xff] }
 0x12e   :  { %v645_v26 = vmax.f32 %v3295_v18, 0.0  ;;  %1373 = vmatpush.msra.mxu1 %v951_v44  ;;  %v801_v1 = vld [vmem:[%s4972_s4 + $0x460] sm:$0xff]  ;;  %v799_v44 = vld [vmem:[%s4972_s4 + $0x450] sm:$0xff] }
 0x12f   :  { %1422 = vmatpush.msrb.mxu0 %v1069_v19  ;;  %v841_v4 = vld [vmem:[%s4972_s4 + $0x5a0] sm:$0xff] }
 0x130   :  { %1195 = vmatmul.f32.vlgmr.msrb.gmra.mxu2 %v645_v26  ;;  %1374 = vmatpush.msra.mxu1 %v949_v22  ;;  %v1125_v18 = vld [vmem:[%s4972_s4 + $0xe80] sm:$0xff] }
 0x131   :  { %1259 = vmatpush.msrb.mxu2 %v819_v45  ;;  %v535_v33 = vpop.f32.mrf.mxu0 }
 0x132   :  { %v536_v41 = vadd.f32 %v535_v33, %v471_v40  ;;  %v412_v33 = vadd.f32 %v3262_v54, %v347_v23  ;;  %v1065_v54 = vld [vmem:[%s4972_s4 + $0xca0] sm:$0xff]  ;;  %1439 = vmatpush.msrb.mxu1 %v1107_v46 }
 0x133   :  { %1260 = vmatpush.msrb.mxu2 %v817_v31  ;;  %v600_v57 = vpop.f32.mrf.mxu1  ;;  %v1067_v31 = vld [vmem:[%s4972_s4 + $0xcb0] sm:$0xff]  ;;  %v797_v23 = vld [vmem:[%s4972_s4 + $0x440] sm:$0xff] }
 0x134   :  { %v3342_v21 = vadd.f32 %v600_v57, %v536_v41  ;;  %v3407_v41 = vpop.f32.mrf.mxu3  ;;  %v803_v57 = vld [vmem:[%s4972_s4 + $0x470] sm:$0xff]  ;;  %1423 = vmatpush.msrb.mxu0 %v1067_v31  ;;  %1440 = vmatpush.msrb.mxu1 %v1105_v42 }
 0x135   :  { %1261 = vmatpush.msrb.mxu2 %v815_v49  ;;  %v285_v49 = vadd.f32 %v3208_v6, %v2888_v48  ;;  %v1063_v48 = vld [vmem:[%s4972_s4 + $0xc90] sm:$0xff] }
 0x136   :  { %v646_v36 = vmax.f32 %v3342_v21, 0.0  ;;  %1424 = vmatpush.msrb.mxu0 %v1065_v54  ;;  %v835_v31 = vld [vmem:[%s4972_s4 + $0x570] sm:$0xff]  ;;  %v833_v54 = vld [vmem:[%s4972_s4 + $0x560] sm:$0xff] }
 0x137   :  { %1262 = vmatpush.msrb.mxu2 %v813_v62  ;;  %v477_v62 = vadd.f32 %v3279_v2, %v412_v33  ;;  %v1061_v2 = vld [vmem:[%s4972_s4 + $0xc80] sm:$0xff] }
 0x138   :  { %1215 = vmatmul.f32.vlgmr.msrb.gmra.mxu3 %v646_v36  ;;  %1425 = vmatpush.msrb.mxu0 %v1063_v48  ;;  %v1097_v33 = vld [vmem:[%s4972_s4 + $0xda0] sm:$0xff]  ;;  %v791_v48 = vld [vmem:[%s4972_s4 + $0x410] sm:$0xff] }
 0x139   :  { %1263 = vmatpush.msrb.mxu2 %v811_v5  ;;  %1279 = vmatpush.msrb.mxu3 %v851_v11  ;;  %v538_v38 = vpop.f32.mrf.mxu0  ;;  %v1103_v5 = vld [vmem:[%s4972_s4 + $0xdd0] sm:$0xff]  ;;  %v350_v11 = vadd.f32 %v2893_v50, %v285_v49  ;;  %v1101_v50 = vld [vmem:[%s4972_s4 + $0xdc0] sm:$0xff] }
 0x13a   :  { %v539_v45 = vadd.f32 %v538_v38, %v474_v15  ;;  %v839_v15 = vld [vmem:[%s4972_s4 + $0x590] sm:$0xff]  ;;  %1441 = vmatpush.msrb.mxu1 %v1103_v5  ;;  %1426 = vmatpush.msrb.mxu0 %v1061_v2  ;;  %v789_v2 = vld [vmem:[%s4972_s4 + $0x400] sm:$0xff] }
 0x13b   :  { %1264 = vmatpush.msrb.mxu2 %v809_v29  ;;  %1280 = vmatpush.msrb.mxu3 %v849_v16  ;;  %v603_v40 = vpop.f32.mrf.mxu1  ;;  %v3449_v29 = vpop.f32.mrf.mxu2  ;;  %v1059_v38 = vld [vmem:[%s4972_s4 + $0xc70] sm:$0xff]  ;;  %v415_v19 = vadd.f32 %v3309_v27, %v350_v11  ;;  %v288_v27 = vadd.f32 %v3208_v6, %v2898_v52  ;;  %v1057_v52 = vld [vmem:[%s4972_s4 + $0xc60] sm:$0xff] }
 0x13c   :  { %v3399_v37 = vadd.f32 %v603_v40, %v539_v45  ;;  %v837_v45 = vld [vmem:[%s4972_s4 + $0x580] sm:$0xff]  ;;  %v795_v40 = vld [vmem:[%s4972_s4 + $0x430] sm:$0xff]  ;;  %1442 = vmatpush.msrb.mxu1 %v1101_v50  ;;  %1427 = vmatpush.msrb.mxu0 %v1059_v38  ;;  %v3478_v46 = vpop.f32.mrf.mxu3 }
 0x13d   :  { %1265 = vmatpush.msrb.mxu2 %v807_v32  ;;  %1281 = vmatpush.msrb.mxu3 %v847_v28  ;;  %v1099_v32 = vld [vmem:[%s4972_s4 + $0xdb0] sm:$0xff]  ;;  %v829_v11 = vld [vmem:[%s4972_s4 + $0x540] sm:$0xff] }
 0x13e   :  { %v647_v51 = vmax.f32 %v3399_v37, 0.0  ;;  %1443 = vmatpush.msrb.mxu1 %v1099_v32  ;;  %1428 = vmatpush.msrb.mxu0 %v1057_v52  ;;  %v881_v50 = vld [vmem:[%s4972_s4 + $0x6e0] sm:$0xff]  ;;  %v1091_v38 = vld [vmem:[%s4972_s4 + $0xd70] sm:$0xff]  ;;  %v1076_v37 = vld [vmem:[%s4972_s4 + $0xcf8] sm:$0xff] }
 0x13f   :  { %1266 = vmatpush.msrb.mxu2 %v805_v39  ;;  %1282 = vmatpush.msrb.mxu3 %v845_v59  ;;  %v480_v39 = vadd.f32 %v3336_v56, %v415_v19  ;;  %v793_v59 = vld [vmem:[%s4972_s4 + $0x420] sm:$0xff]  ;;  %v1095_v56 = vld [vmem:[%s4972_s4 + $0xd90] sm:$0xff] }
 0x140   :  { %1235 = vmatmul.f32.vlgmr.msra.gmra.mxu2 %v647_v51  ;;  %1444 = vmatpush.msrb.mxu1 %v1097_v33  ;;  %v823_v52 = vld [vmem:[%s4972_s4 + $0x510] sm:$0xff]  ;;  %v1157_v21 = vld [vmem:[%s4972_s4 + $0xf80] sm:$0xff] }
 0x141   :  { %1267 = vmatpush.msrb.mxu2 %v803_v57  ;;  %1283 = vmatpush.msrb.mxu3 %v843_v61  ;;  %v541_v7 = vpop.f32.mrf.mxu0  ;;  %v1055_v57 = vld [vmem:[%s4972_s4 + $0xc50] sm:$0xff]  ;;  %v353_v61 = vadd.f32 %v2906_v55, %v288_v27  ;;  %v1093_v55 = vld [vmem:[%s4972_s4 + $0xd80] sm:$0xff] }
 0x142   :  { %v542_v13 = vadd.f32 %v541_v7, %v477_v62  ;;  %v831_v62 = vld [vmem:[%s4972_s4 + $0x550] sm:$0xff]  ;;  %1429 = vmatpush.msrb.mxu0 %v1055_v57  ;;  %1445 = vmatpush.msrb.mxu1 %v1095_v56  ;;  %v821_v57 = vld [vmem:[%s4972_s4 + $0x500] sm:$0xff] }
 0x143   :  { %1268 = vmatpush.msrb.mxu2 %v801_v1  ;;  %1284 = vmatpush.msrb.mxu3 %v841_v4  ;;  %v606_v16 = vpop.f32.mrf.mxu1  ;;  %v1053_v4 = vld [vmem:[%s4972_s4 + $0xc40] sm:$0xff]  ;;  %v418_v7 = vadd.f32 %v3377_v17, %v353_v61  ;;  %v883_v17 = vld [vmem:[%s4972_s4 + $0x6f0] sm:$0xff] }
 0x144   :  { %v3458_v22 = vadd.f32 %v606_v16, %v542_v13  ;;  %v3523_v13 = vpop.f32.mrf.mxu2  ;;  %v827_v16 = vld [vmem:[%s4972_s4 + $0x530] sm:$0xff]  ;;  %1430 = vmatpush.msrb.mxu0 %v1053_v4  ;;  %1446 = vmatpush.msrb.mxu1 %v1093_v55  ;;  %v3548_v32 = vpop.f32.mrf.mxu3  ;;  %v1045_v56 = vld [vmem:[%s4972_s4 + $0xc00] sm:$0xff] }
 0x145   :  { %1269 = vmatpush.msrb.mxu2 %v799_v44  ;;  %1285 = vmatpush.msrb.mxu3 %v839_v15  ;;  %v1051_v44 = vld [vmem:[%s4972_s4 + $0xc30] sm:$0xff]  ;;  %v483_v19 = vadd.f32 %v3407_v41, %v418_v7  ;;  %v873_v4 = vld [vmem:[%s4972_s4 + $0x6a0] sm:$0xff] }
 0x146   :  { %v648_v28 = vmax.f32 %v3458_v22, 0.0  ;;  %1431 = vmatpush.msrb.mxu0 %v1051_v44  ;;  %v879_v41 = vld [vmem:[%s4972_s4 + $0x6d0] sm:$0xff]  ;;  %1447 = vmatpush.msrb.mxu1 %v1091_v38  ;;  %v913_v55 = vld [vmem:[%s4972_s4 + $0x7e0] sm:$0xff]  ;;  %v872_v22 = vld [vmem:[%s4972_s4 + $0x698] sm:$0xff] }
 0x147   :  { %1270 = vmatpush.msrb.mxu2 %v797_v23  ;;  %1286 = vmatpush.msrb.mxu3 %v837_v45  ;;  %v825_v23 = vld [vmem:[%s4972_s4 + $0x520] sm:$0xff]  ;;  %v1047_v33 = vld [vmem:[%s4972_s4 + $0xc10] sm:$0xff] }
 0x148   :  { %1255 = vmatmul.f32.vlgmr.msra.gmra.mxu3 %v648_v28  ;;  %v1049_v45 = vld [vmem:[%s4972_s4 + $0xc20] sm:$0xff]  ;;  %v875_v61 = vld [vmem:[%s4972_s4 + $0x6b0] sm:$0xff] }
 0x149   :  { %1271 = vmatpush.msrb.mxu2 %v795_v40  ;;  %1287 = vmatpush.msrb.mxu3 %v835_v31  ;;  %v544_v49 = vpop.f32.mrf.mxu0  ;;  %v1089_v40 = vld [vmem:[%s4972_s4 + $0xd60] sm:$0xff]  ;;  %v1083_v7 = vld [vmem:[%s4972_s4 + $0xd30] sm:$0xff] }
 0x14a   :  { %v545_v42 = vadd.f32 %v544_v49, %v480_v39  ;;  %1432 = vmatpush.msrb.mxu0 %v1049_v45  ;;  %1448 = vmatpush.msrb.mxu1 %v1089_v40  ;;  %v911_v44 = vld [vmem:[%s4972_s4 + $0x7d0] sm:$0xff]  ;;  %v869_v38 = vld [vmem:[%s4972_s4 + $0x680] sm:$0xff]  ;;  %v297_v40 = vadd.f32 %v3208_v6, %v2988_v20  ;;  %v294_v20 = vadd.f32 %v3208_v6, %v2954_v8 }
 0x14b   :  { %1272 = vmatpush.msrb.mxu2 %v793_v59  ;;  %1288 = vmatpush.msrb.mxu3 %v833_v54  ;;  %v609_v1 = vpop.f32.mrf.mxu1  ;;  %v877_v59 = vld [vmem:[%s4972_s4 + $0x6c0] sm:$0xff]  ;;  %v1087_v54 = vld [vmem:[%s4972_s4 + $0xd50] sm:$0xff] }
 0x14c   :  { %v3515_v5 = vadd.f32 %v609_v1, %v545_v42  ;;  %v915_v42 = vld [vmem:[%s4972_s4 + $0x7f0] sm:$0xff]  ;;  %1433 = vmatpush.msrb.mxu0 %v1047_v33  ;;  %1449 = vmatpush.msrb.mxu1 %v1087_v54  ;;  %v426_v1 = vpop.f32.mrf.mxu2  ;;  %v905_v33 = vld [vmem:[%s4972_s4 + $0x7a0] sm:$0xff] }
 0x14d   :  { %1273 = vmatpush.msrb.mxu2 %v791_v48  ;;  %1289 = vmatpush.msrb.mxu3 %v831_v62  ;;  %v1085_v62 = vld [vmem:[%s4972_s4 + $0xd40] sm:$0xff]  ;;  %v903_v54 = vld [vmem:[%s4972_s4 + $0x790] sm:$0xff] }
 0x14e   :  { %v649_v15 = vmax.f32 %v3515_v5, 0.0  ;;  %1434 = vmatpush.msrb.mxu0 %v1045_v56  ;;  %1450 = vmatpush.msrb.mxu1 %v1085_v62  ;;  %v861_v8 = vld [vmem:[%s4972_s4 + $0x640] sm:$0xff]  ;;  %v944_v5 = vld [vmem:[%s4972_s4 + $0x8d8] sm:$0xff] }
 0x14f   :  { %1274 = vmatpush.msrb.mxu2 %v789_v2  ;;  %1290 = vmatpush.msrb.mxu3 %v829_v11  ;;  %v291_v2 = vadd.f32 %v3208_v6, %v2920_v60  ;;  %v491_v60 = vpop.f32.mrf.mxu3 }
 0x150   :  { %1275 = vmatmul.f32.vlgmr.msrb.gmra.mxu2 %v649_v15  ;;  %1451 = vmatpush.msrb.mxu1 %v1083_v7  ;;  %v899_v7 = vld [vmem:[%s4972_s4 + $0x770] sm:$0xff] }
 0x151   :  { %1299 = vmatpush.msra.mxu2 %v883_v17  ;;  %1291 = vmatpush.msrb.mxu3 %v827_v16  ;;  %v547_v27 = vpop.f32.mrf.mxu0  ;;  %v871_v17 = vld [vmem:[%s4972_s4 + $0x690] sm:$0xff]  ;;  %v1081_v16 = vld [vmem:[%s4972_s4 + $0xd20] sm:$0xff]  ;;  %v356_v45 = vadd.f32 %v2931_v0, %v291_v2  ;;  %v300_v2 = vadd.f32 %v3208_v6, %v3025_v35 }
 0x152   :  { %v548_v31 = vadd.f32 %v547_v27, %v483_v19  ;;  %v909_v19 = vld [vmem:[%s4972_s4 + $0x7c0] sm:$0xff]  ;;  %v867_v27 = vld [vmem:[%s4972_s4 + $0x670] sm:$0xff]  ;;  %1452 = vmatpush.msrb.mxu1 %v1081_v16 }
 0x153   :  { %1300 = vmatpush.msra.mxu2 %v881_v50  ;;  %1292 = vmatpush.msrb.mxu3 %v825_v23  ;;  %v612_v39 = vpop.f32.mrf.mxu1  ;;  %v1079_v23 = vld [vmem:[%s4972_s4 + $0xd10] sm:$0xff]  ;;  %v421_v0 = vadd.f32 %v3449_v29, %v356_v45  ;;  %v853_v45 = vld [vmem:[%s4972_s4 + $0x600] sm:$0xff] }
 0x154   :  { %v3570_v49 = vadd.f32 %v612_v39, %v548_v31  ;;  %v1077_v31 = vld [vmem:[%s4972_s4 + $0xd00] sm:$0xff]  ;;  %1453 = vmatpush.msrb.mxu1 %v1079_v23  ;;  %v429_v39 = vpop.f32.mrf.mxu2  ;;  %v863_v29 = vld [vmem:[%s4972_s4 + $0x650] sm:$0xff] }
 0x155   :  { %1301 = vmatpush.msra.mxu2 %v879_v41  ;;  %1293 = vmatpush.msrb.mxu3 %v823_v52  ;;  %v907_v41 = vld [vmem:[%s4972_s4 + $0x7b0] sm:$0xff]  ;;  %v865_v52 = vld [vmem:[%s4972_s4 + $0x660] sm:$0xff]  ;;  %v486_v56 = vadd.f32 %v3478_v46, %v421_v0 }
 0x156   :  { %v650_v48 = vmax.f32 %v3570_v49, 0.0  ;;  %1454 = vmatpush.msrb.mxu1 %v1077_v31  ;;  %v859_v46 = vld [vmem:[%s4972_s4 + $0x630] sm:$0xff]  ;;  %v740_v49 = vld [vmem:[%s4972_s4 + $0x278] sm:$0xff] }
 0x157   :  { %1302 = vmatpush.msra.mxu2 %v877_v59  ;;  %1294 = vmatpush.msrb.mxu3 %v821_v57  ;;  %v362_v57 = vadd.f32 %v2999_v24, %v297_v40  ;;  %v855_v35 = vld [vmem:[%s4972_s4 + $0x610] sm:$0xff] }
 0x158   :  { %1295 = vmatmul.f32.vlgmr.msrb.gmra.mxu3 %v650_v48  ;;  %v891_v0 = vld [vmem:[%s4972_s4 + $0x730] sm:$0xff] }
 0x159   :  { %1303 = vmatpush.msra.mxu2 %v875_v61  ;;  %1319 = vmatpush.msra.mxu3 %v915_v42  ;;  %v550_v11 = vpop.f32.mrf.mxu0  ;;  %v901_v42 = vld [vmem:[%s4972_s4 + $0x780] sm:$0xff]  ;;  %v427_v62 = vadd.f32 %v426_v1, %v362_v57 }
 0x15a   :  { %v551_v24 = vadd.f32 %v550_v11, %v486_v56  ;;  %v897_v11 = vld [vmem:[%s4972_s4 + $0x760] sm:$0xff]  ;;  %v1007_v56 = vld [vmem:[%s4972_s4 + $0xad0] sm:$0xff] }
 0x15b   :  { %1304 = vmatpush.msra.mxu2 %v873_v4  ;;  %1320 = vmatpush.msra.mxu3 %v913_v55  ;;  %v615_v50 = vpop.f32.mrf.mxu1  ;;  %v359_v4 = vadd.f32 %v2965_v12, %v294_v20  ;;  %v494_v55 = vpop.f32.mrf.mxu3  ;;  %v857_v12 = vld [vmem:[%s4972_s4 + $0x620] sm:$0xff] }
 0x15c   :  { %v3680_v23 = vpop.f32.mrf.mxu2  ;;  %v1009_v20 = vld [vmem:[%s4972_s4 + $0xae0] sm:$0xff] }
 0x15d   :  { %1305 = vmatpush.msra.mxu2 %v871_v17  ;;  %1321 = vmatpush.msra.mxu3 %v911_v44  ;;  %v424_v1 = vadd.f32 %v3523_v13, %v359_v4  ;;  %v492_v17 = vadd.f32 %v491_v60, %v427_v62  ;;  %v3670_v44 = vadd.f32 %v615_v50, %v551_v24  ;;  %v895_v13 = vld [vmem:[%s4972_s4 + $0x750] sm:$0xff]  ;;  %v1005_v4 = vld [vmem:[%s4972_s4 + $0xac0] sm:$0xff] }
 0x15f   :  { %1306 = vmatpush.msra.mxu2 %v869_v38  ;;  %1322 = vmatpush.msra.mxu3 %v909_v19  ;;  %v365_v38 = vadd.f32 %v3036_v43, %v300_v2  ;;  %v489_v60 = vadd.f32 %v3548_v32, %v424_v1  ;;  %v651_v43 = vmax.f32 %v3670_v44, 0.0  ;;  %v1011_v32 = vld [vmem:[%s4972_s4 + $0xaf0] sm:$0xff]  ;;  %v1008_v44 = vld [vmem:[%s4972_s4 + $0xad8] sm:$0xff] }
 0x160   :  { %v1003_v1 = vld [vmem:[%s4972_s4 + $0xab0] sm:$0xff] }
 0x161   :  { %1307 = vmatpush.msra.mxu2 %v867_v27  ;;  %1323 = vmatpush.msra.mxu3 %v907_v41  ;;  %v553_v59 = vpop.f32.mrf.mxu0  ;;  %v893_v27 = vld [vmem:[%s4972_s4 + $0x740] sm:$0xff]  ;;  %v430_v41 = vadd.f32 %v429_v39, %v365_v38  ;;  %v724_v38 = vld [vmem:[%s4972_s4 + $0x1f8] sm:$0xff] }
 0x162   :  { %v554_v31 = vadd.f32 %v553_v59, %v489_v60  ;;  %v889_v39 = vld [vmem:[%s4972_s4 + $0x720] sm:$0xff] }
 0x163   :  { %1308 = vmatpush.msra.mxu2 %v865_v52  ;;  %1324 = vmatpush.msra.mxu3 %v905_v33  ;;  %v618_v61 = vpop.f32.mrf.mxu1  ;;  %v3698_v33 = vpop.f32.mrf.mxu3  ;;  %v495_v59 = vadd.f32 %v494_v55, %v430_v41  ;;  %v885_v55 = vld [vmem:[%s4972_s4 + $0x700] sm:$0xff]  ;;  %v722_v41 = vld [vmem:[%s4972_s4 + $0x1e8] sm:$0xff] }
 0x165   :  { %1309 = vmatpush.msra.mxu2 %v863_v29  ;;  %1325 = vmatpush.msra.mxu3 %v903_v54  ;;  %v692_v29 = vld [vmem:[%s4972_s4 + $0xf8] sm:$0xff]  ;;  %v3711_v54 = vadd.f32 %v618_v61, %v554_v31  ;;  %v690_v61 = vld [vmem:[%s4972_s4 + $0xe8] sm:$0xff] }
 0x167   :  { %1310 = vmatpush.msra.mxu2 %v861_v8  ;;  %1326 = vmatpush.msra.mxu3 %v901_v42  ;;  %v887_v8 = vld [vmem:[%s4972_s4 + $0x710] sm:$0xff]  ;;  %v652_v2 = vmax.f32 %v3711_v54, 0.0  ;;  %v1040_v54 = vld [vmem:[%s4972_s4 + $0xbd8] sm:$0xff] }
 0x169   :  { %1311 = vmatpush.msra.mxu2 %v859_v46  ;;  %1327 = vmatpush.msra.mxu3 %v899_v7  ;;  %v556_v16 = vpop.f32.mrf.mxu0  ;;  %v688_v46 = vld [vmem:[%s4972_s4 + $0xd8] sm:$0xff]  ;;  %v3735_v7 = vpop.f32.mrf.mxu2 }
 0x16a   :  { %v557_v19 = vadd.f32 %v556_v16, %v492_v17  ;;  %v686_v17 = vld [vmem:[%s4972_s4 + $0xc8] sm:$0xff]  ;;  %v1001_v16 = vld [vmem:[%s4972_s4 + $0xaa0] sm:$0xff] }
 0x16b   :  { %1312 = vmatpush.msra.mxu2 %v857_v12  ;;  %1328 = vmatpush.msra.mxu3 %v897_v11  ;;  %v621_v50 = vpop.f32.mrf.mxu1  ;;  %v1043_v12 = vld [vmem:[%s4972_s4 + $0xbf0] sm:$0xff]  ;;  %v3764_v60 = vpop.f32.mrf.mxu3 }
 0x16c   :  { %v3688_v40 = vadd.f32 %v621_v50, %v557_v19  ;;  %v303_v19 = vadd.f32 %v3208_v6, %v3062_v58  ;;  %v682_v58 = vld [vmem:[%s4972_s4 + $0xa8] sm:$0xff] }
 0x16d   :  { %1313 = vmatpush.msra.mxu2 %v855_v35  ;;  %1329 = vmatpush.msra.mxu3 %v895_v13  ;;  %v1041_v35 = vld [vmem:[%s4972_s4 + $0xbe0] sm:$0xff]  ;;  %v684_v13 = vld [vmem:[%s4972_s4 + $0xb8] sm:$0xff] }
 0x16e   :  { %v653_v52 = vmax.f32 %v3688_v40, 0.0  ;;  %v1072_v40 = vld [vmem:[%s4972_s4 + $0xcd8] sm:$0xff] }
 0x16f   :  { %1314 = vmatpush.msra.mxu2 %v853_v45  ;;  %1330 = vmatpush.msra.mxu3 %v893_v27  ;;  %v999_v45 = vld [vmem:[%s4972_s4 + $0xa90] sm:$0xff] }
 0x170   :  { %1315 = vmatmul.f32.vlgmr.msra.gmra.mxu2 %v651_v43  ;;  %1355 = vmatmul.f32.vlgmr.msra.gmra.mxu0 %v653_v52  ;;  %v1039_v27 = vld [vmem:[%s4972_s4 + $0xbd0] sm:$0xff] }
 0x171   :  { %1379 = vmatpush.msrb.mxu2 %v1011_v32  ;;  %1331 = vmatpush.msra.mxu3 %v891_v0  ;;  %v559_v57 = vpop.f32.mrf.mxu0  ;;  %v997_v32 = vld [vmem:[%s4972_s4 + $0xa80] sm:$0xff] }
 0x172   :  { %v560_v42 = vadd.f32 %v559_v57, %v495_v59  ;;  %1499 = vmatpush.msra.mxu0 %v692_v29  ;;  %v1037_v0 = vld [vmem:[%s4972_s4 + $0xbc0] sm:$0xff]  ;;  %v368_v59 = vadd.f32 %v3073_v63, %v303_v19  ;;  %v995_v29 = vld [vmem:[%s4972_s4 + $0xa70] sm:$0xff]  ;;  %v718_v63 = vld [vmem:[%s4972_s4 + $0x1c8] sm:$0xff] }
 0x173   :  { %1380 = vmatpush.msrb.mxu2 %v1009_v20  ;;  %1332 = vmatpush.msra.mxu3 %v889_v39  ;;  %v624_v62 = vpop.f32.mrf.mxu1  ;;  %v680_v20 = vld [vmem:[%s4972_s4 + $0x98] sm:$0xff]  ;;  %v1035_v57 = vld [vmem:[%s4972_s4 + $0xbb0] sm:$0xff] }
 0x174   :  { %v3730_v24 = vadd.f32 %v624_v62, %v560_v42  ;;  %1500 = vmatpush.msra.mxu0 %v690_v61  ;;  %v720_v39 = vld [vmem:[%s4972_s4 + $0x1d8] sm:$0xff]  ;;  %v433_v42 = vadd.f32 %v3680_v23, %v368_v59  ;;  %v438_v61 = vpop.f32.mrf.mxu2  ;;  %v993_v62 = vld [vmem:[%s4972_s4 + $0xa60] sm:$0xff] }
 0x175   :  { %1381 = vmatpush.msrb.mxu2 %v1007_v56  ;;  %1333 = vmatpush.msra.mxu3 %v887_v8  ;;  %v309_v56 = vadd.f32 %v3208_v6, %v3132_v25  ;;  %v678_v8 = vld [vmem:[%s4972_s4 + $0x88] sm:$0xff]  ;;  %v1033_v25 = vld [vmem:[%s4972_s4 + $0xba0] sm:$0xff]  ;;  %v716_v23 = vld [vmem:[%s4972_s4 + $0x1b8] sm:$0xff] }
 0x176   :  { %v654_v11 = vmax.f32 %v3730_v24, 0.0  ;;  %1501 = vmatpush.msra.mxu0 %v688_v46  ;;  %v991_v46 = vld [vmem:[%s4972_s4 + $0xa50] sm:$0xff]  ;;  %v985_v59 = vld [vmem:[%s4972_s4 + $0xa20] sm:$0xff]  ;;  %v868_v24 = vld [vmem:[%s4972_s4 + $0x678] sm:$0xff] }
 0x177   :  { %1382 = vmatpush.msrb.mxu2 %v1005_v4  ;;  %1334 = vmatpush.msra.mxu3 %v885_v55  ;;  %v676_v4 = vld [vmem:[%s4972_s4 + $0x78] sm:$0xff] }
 0x178   :  { %1335 = vmatmul.f32.vlgmr.msra.gmra.mxu3 %v652_v2  ;;  %1502 = vmatpush.msra.mxu0 %v686_v17  ;;  %v374_v17 = vadd.f32 %v3145_v30, %v309_v56  ;;  %v1029_v30 = vld [vmem:[%s4972_s4 + $0xb80] sm:$0xff] }
 0x179   :  { %1383 = vmatpush.msrb.mxu2 %v1003_v1  ;;  %1399 = vmatpush.msrb.mxu3 %v1043_v12  ;;  %v562_v50 = vpop.f32.mrf.mxu0  ;;  %v1031_v1 = vld [vmem:[%s4972_s4 + $0xb90] sm:$0xff]  ;;  %v306_v12 = vadd.f32 %v3208_v6, %v3096_v9  ;;  %v989_v9 = vld [vmem:[%s4972_s4 + $0xa40] sm:$0xff] }
 0x17a   :  { %1375 = vmatmul.f32.vlgmr.msra.gmra.mxu1 %v654_v11  ;;  %1503 = vmatpush.msra.mxu0 %v684_v13  ;;  %v498_v13 = vadd.f32 %v3698_v33, %v433_v42  ;;  %v672_v33 = vld [vmem:[%s4972_s4 + $0x58] sm:$0xff]  ;;  %v1023_v42 = vld [vmem:[%s4972_s4 + $0xb50] sm:$0xff] }
 0x17b   :  { %1384 = vmatpush.msrb.mxu2 %v1001_v16  ;;  %1400 = vmatpush.msrb.mxu3 %v1041_v35  ;;  %v3780_v31 = vpop.f32.mrf.mxu1  ;;  %v674_v16 = vld [vmem:[%s4972_s4 + $0x68] sm:$0xff] }
 0x17c   :  { %1519 = vmatpush.msra.mxu1 %v724_v38  ;;  %1504 = vmatpush.msra.mxu0 %v682_v58  ;;  %v714_v35 = vld [vmem:[%s4972_s4 + $0x1a8] sm:$0xff]  ;;  %v503_v38 = vpop.f32.mrf.mxu3  ;;  %v563_v58 = vadd.f32 %v562_v50, %v498_v13  ;;  %v441_v56 = vpop.f32.mrf.mxu2  ;;  %v1139_v13 = vld [vmem:[%s4972_s4 + $0xef0] sm:$0xff] }
 0x17d   :  { %1385 = vmatpush.msrb.mxu2 %v999_v45  ;;  %1401 = vmatpush.msrb.mxu3 %v1039_v27  ;;  %v439_v45 = vadd.f32 %v438_v61, %v374_v17  ;;  %v712_v27 = vld [vmem:[%s4972_s4 + $0x198] sm:$0xff]  ;;  %v670_v50 = vld [vmem:[%s4972_s4 + $0x48] sm:$0xff] }
 0x17e   :  { %1520 = vmatpush.msra.mxu1 %v722_v41  ;;  %1505 = vmatpush.msra.mxu0 %v680_v20  ;;  %v987_v41 = vld [vmem:[%s4972_s4 + $0xa30] sm:$0xff]  ;;  %v312_v20 = vadd.f32 %v3208_v6, %v3164_v47  ;;  %v664_v17 = vld [vmem:[%s4972_s4 + $0x18] sm:$0xff] }
 0x17f   :  { %1386 = vmatpush.msrb.mxu2 %v997_v32  ;;  %1402 = vmatpush.msrb.mxu3 %v1037_v0  ;;  %v1027_v32 = vld [vmem:[%s4972_s4 + $0xb70] sm:$0xff]  ;;  %v371_v0 = vadd.f32 %v3107_v14, %v306_v12  ;;  %v1025_v14 = vld [vmem:[%s4972_s4 + $0xb60] sm:$0xff]  ;;  %v504_v6 = vadd.f32 %v503_v38, %v439_v45 }
 0x180   :  { %1521 = vmatpush.msra.mxu1 %v720_v39  ;;  %1506 = vmatpush.msra.mxu0 %v678_v8  ;;  %v710_v39 = vld [vmem:[%s4972_s4 + $0x188] sm:$0xff]  ;;  %v3883_v8 = vadd.f32 %v3780_v31, %v563_v58  ;;  %v377_v61 = vadd.f32 %v3172_v53, %v312_v20  ;;  %v1021_v53 = vld [vmem:[%s4972_s4 + $0xb40] sm:$0xff] }
 0x181   :  { %1387 = vmatpush.msrb.mxu2 %v995_v29  ;;  %1403 = vmatpush.msrb.mxu3 %v1035_v57  ;;  %v3822_v55 = vpop.f32.mrf.mxu0  ;;  %v436_v47 = vadd.f32 %v3735_v7, %v371_v0  ;;  %v668_v29 = vld [vmem:[%s4972_s4 + $0x38] sm:$0xff]  ;;  %v983_v7 = vld [vmem:[%s4972_s4 + $0xa10] sm:$0xff]  ;;  %v666_v31 = vld [vmem:[%s4972_s4 + $0x28] sm:$0xff] }
 0x182   :  { %1522 = vmatpush.msra.mxu1 %v718_v63  ;;  %1507 = vmatpush.msra.mxu0 %v676_v4  ;;  %v708_v57 = vld [vmem:[%s4972_s4 + $0x178] sm:$0xff]  ;;  %v1017_v58 = vld [vmem:[%s4972_s4 + $0xb20] sm:$0xff]  ;;  %v1135_v0 = vld [vmem:[%s4972_s4 + $0xed0] sm:$0xff] }
 0x183   :  { %1388 = vmatpush.msrb.mxu2 %v993_v62  ;;  %1404 = vmatpush.msrb.mxu3 %v1033_v25  ;;  %v3840_v19 = vpop.f32.mrf.mxu1  ;;  %v706_v25 = vld [vmem:[%s4972_s4 + $0x168] sm:$0xff] }
 0x184   :  { %1523 = vmatpush.msra.mxu1 %v716_v23  ;;  %1508 = vmatpush.msra.mxu0 %v674_v16  ;;  %v981_v23 = vld [vmem:[%s4972_s4 + $0xa00] sm:$0xff]  ;;  %v506_v16 = vpop.f32.mrf.mxu3 }
 0x185   :  { %1389 = vmatpush.msrb.mxu2 %v991_v46  ;;  %1405 = vmatpush.msrb.mxu3 %v1031_v1  ;;  %v501_v46 = vadd.f32 %v3764_v60, %v436_v47  ;;  %v442_v1 = vadd.f32 %v441_v56, %v377_v61  ;;  %v704_v60 = vld [vmem:[%s4972_s4 + $0x158] sm:$0xff]  ;;  %v1133_v47 = vld [vmem:[%s4972_s4 + $0xec0] sm:$0xff] }
 0x186   :  { %1524 = vmatpush.msra.mxu1 %v714_v35  ;;  %1509 = vmatpush.msra.mxu0 %v672_v33  ;;  %v655_v35 = vmax.f32 %v3883_v8, 0.0  ;;  %v702_v33 = vld [vmem:[%s4972_s4 + $0x148] sm:$0xff]  ;;  %v816_v56 = vld [vmem:[%s4972_s4 + $0x4d8] sm:$0xff] }
 0x187   :  { %1390 = vmatpush.msrb.mxu2 %v989_v9  ;;  %1406 = vmatpush.msrb.mxu3 %v1029_v30  ;;  %v566_v38 = vadd.f32 %v3822_v55, %v501_v46  ;;  %v1019_v9 = vld [vmem:[%s4972_s4 + $0xb30] sm:$0xff]  ;;  %v662_v30 = vld [vmem:[%s4972_s4 + $0x8] sm:$0xff]  ;;  %v1137_v55 = vld [vmem:[%s4972_s4 + $0xee0] sm:$0xff] }
 0x188   :  { %1525 = vmatpush.msra.mxu1 %v712_v27  ;;  %1510 = vmatpush.msra.mxu0 %v670_v50  ;;  %v507_v27 = vadd.f32 %v506_v16, %v442_v1  ;;  %v696_v61 = vld [vmem:[%s4972_s4 + $0x118] sm:$0xff]  ;;  %v1127_v1 = vld [vmem:[%s4972_s4 + $0xe90] sm:$0xff] }
 0x189   :  { %1391 = vmatpush.msrb.mxu2 %v987_v41  ;;  %1407 = vmatpush.msrb.mxu3 %v1027_v32  ;;  %v568_v63 = vpop.f32.mrf.mxu0  ;;  %v820_v41 = vld [vmem:[%s4972_s4 + $0x4f8] sm:$0xff]  ;;  %v3943_v20 = vadd.f32 %v3840_v19, %v566_v38  ;;  %v818_v19 = vld [vmem:[%s4972_s4 + $0x4e8] sm:$0xff]  ;;  %v1165_v38 = vld [vmem:[%s4972_s4 + $0xfc0] sm:$0xff] }
 0x18a   :  { %1526 = vmatpush.msra.mxu1 %v710_v39  ;;  %v569_v62 = vadd.f32 %v568_v63, %v504_v6  ;;  %1511 = vmatpush.msra.mxu0 %v668_v29  ;;  %v700_v39 = vld [vmem:[%s4972_s4 + $0x138] sm:$0xff]  ;;  %v698_v6 = vld [vmem:[%s4972_s4 + $0x128] sm:$0xff]  ;;  %v1013_v29 = vld [vmem:[%s4972_s4 + $0xb00] sm:$0xff] }
 0x18b   :  { %1392 = vmatpush.msrb.mxu2 %v985_v59  ;;  %1408 = vmatpush.msrb.mxu3 %v1025_v14  ;;  %v633_v4 = vpop.f32.mrf.mxu1  ;;  %v1015_v59 = vld [vmem:[%s4972_s4 + $0xb10] sm:$0xff]  ;;  %v656_v63 = vmax.f32 %v3943_v20, 0.0  ;;  %v852_v46 = vld [vmem:[%s4972_s4 + $0x5f8] sm:$0xff] }
 0x18c   :  { %1527 = vmatpush.msra.mxu1 %v708_v57  ;;  %v3905_v12 = vadd.f32 %v633_v4, %v569_v62  ;;  %1512 = vmatpush.msra.mxu0 %v666_v31  ;;  %v814_v62 = vld [vmem:[%s4972_s4 + $0x4c8] sm:$0xff]  ;;  %v1129_v31 = vld [vmem:[%s4972_s4 + $0xea0] sm:$0xff]  ;;  %v1136_v8 = vld [vmem:[%s4972_s4 + $0xed8] sm:$0xff] }
 0x18d   :  { %1393 = vmatpush.msrb.mxu2 %v983_v7  ;;  %1409 = vmatpush.msrb.mxu3 %v1023_v42  ;;  %v1131_v7 = vld [vmem:[%s4972_s4 + $0xeb0] sm:$0xff]  ;;  %v1168_v20 = vld [vmem:[%s4972_s4 + $0xfd8] sm:$0xff] }
 0x18e   :  { %1528 = vmatpush.msra.mxu1 %v706_v25  ;;  %v657_v45 = vmax.f32 %v3905_v12, 0.0  ;;  %1513 = vmatpush.msra.mxu0 %v664_v17  ;;  %v1171_v42 = vld [vmem:[%s4972_s4 + $0xff0] sm:$0xff]  ;;  %v1169_v25 = vld [vmem:[%s4972_s4 + $0xfe0] sm:$0xff]  ;;  %v1004_v12 = vld [vmem:[%s4972_s4 + $0xab8] sm:$0xff] }
 0x18f   :  { %1394 = vmatpush.msrb.mxu2 %v981_v23  ;;  %1410 = vmatpush.msrb.mxu3 %v1021_v53  ;;  %v694_v23 = vld [vmem:[%s4972_s4 + $0x108] sm:$0xff]  ;;  %v812_v53 = vld [vmem:[%s4972_s4 + $0x4b8] sm:$0xff]  ;;  %v2205_v17 = vld [vmem:[%s4997_s27] ss:$0 sm:$0xff] }
 0x190   :  { %1395 = vmatmul.f32.vlgmr.msrb.gmra.mxu2 %v655_v35  ;;  %1529 = vmatpush.msra.mxu1 %v704_v60  ;;  %v315_v16 = vadd.f32 %v2205_v17, %v3197_v3  ;;  %v810_v60 = vld [vmem:[%s4972_s4 + $0x4a8] sm:$0xff]  ;;  %v1153_v17 = vld [vmem:[%s4972_s4 + $0xf60] sm:$0xff] }
 0x191   :  { %1459 = vmatpush.msra.mxu2 %v1139_v13  ;;  %1411 = vmatpush.msrb.mxu3 %v1019_v9  ;;  %v571_v32 = vpop.f32.mrf.mxu0  ;;  %v1167_v13 = vld [vmem:[%s4972_s4 + $0xfd0] sm:$0xff]  ;;  %v850_v3 = vld [vmem:[%s4972_s4 + $0x5e8] sm:$0xff]  ;;  %v808_v9 = vld [vmem:[%s4972_s4 + $0x498] sm:$0xff] }
 0x192   :  { %1514 = vmatpush.msra.mxu0 %v662_v30  ;;  %1530 = vmatpush.msra.mxu1 %v702_v33  ;;  %v572_v50 = vadd.f32 %v571_v32, %v507_v27  ;;  %v848_v30 = vld [vmem:[%s4972_s4 + $0x5d8] sm:$0xff]  ;;  %v380_v33 = vadd.f32 %v3212_v10, %v315_v16  ;;  %v1163_v27 = vld [vmem:[%s4972_s4 + $0xfb0] sm:$0xff]  ;;  %v1121_v10 = vld [vmem:[%s4972_s4 + $0xe60] sm:$0xff] }
 0x193   :  { %1460 = vmatpush.msra.mxu2 %v1137_v55  ;;  %1412 = vmatpush.msrb.mxu3 %v1017_v58  ;;  %v636_v14 = vpop.f32.mrf.mxu1  ;;  %v1123_v55 = vld [vmem:[%s4972_s4 + $0xe70] sm:$0xff]  ;;  %v806_v58 = vld [vmem:[%s4972_s4 + $0x488] sm:$0xff] }
 0x194   :  { %1435 = vmatmul.f32.vlgmr.msrb.gmra.mxu0 %v657_v45  ;;  %1531 = vmatpush.msra.mxu1 %v700_v39  ;;  %v3965_v57 = vadd.f32 %v636_v14, %v572_v50  ;;  %v1161_v50 = vld [vmem:[%s4972_s4 + $0xfa0] sm:$0xff]  ;;  %v804_v39 = vld [vmem:[%s4972_s4 + $0x478] sm:$0xff]  ;;  %v1119_v14 = vld [vmem:[%s4972_s4 + $0xe50] sm:$0xff] }
 0x195   :  { %1579 = vmatpush.msrb.mxu0 %v820_v41  ;;  %1461 = vmatpush.msra.mxu2 %v1135_v0  ;;  %v846_v41 = vld [vmem:[%s4972_s4 + $0x5c8] sm:$0xff]  ;;  %v509_v0 = vpop.f32.mrf.mxu3 }
 0x196   :  { %1413 = vmatpush.msrb.mxu3 %v1015_v59  ;;  %1532 = vmatpush.msra.mxu1 %v698_v6  ;;  %v658_v4 = vmax.f32 %v3965_v57, 0.0  ;;  %v844_v59 = vld [vmem:[%s4972_s4 + $0x5b8] sm:$0xff]  ;;  %v802_v6 = vld [vmem:[%s4972_s4 + $0x468] sm:$0xff] }
 0x197   :  { %1580 = vmatpush.msrb.mxu0 %v818_v19  ;;  %1462 = vmatpush.msra.mxu2 %v1133_v47  ;;  %v1159_v47 = vld [vmem:[%s4972_s4 + $0xf90] sm:$0xff]  ;;  %v994_v57 = vld [vmem:[%s4972_s4 + $0xa68] sm:$0xff] }
 0x198   :  { %1414 = vmatpush.msrb.mxu3 %v1013_v29  ;;  %1533 = vmatpush.msra.mxu1 %v696_v61  ;;  %v842_v29 = vld [vmem:[%s4972_s4 + $0x5a8] sm:$0xff] }
 0x199   :  { %1581 = vmatpush.msrb.mxu0 %v816_v56  ;;  %1415 = vmatmul.f32.vlgmr.msrb.gmra.mxu3 %v656_v63  ;;  %v574_v19 = vpop.f32.mrf.mxu0 }
 0x19a   :  { %1463 = vmatpush.msra.mxu2 %v1131_v7  ;;  %1479 = vmatpush.msra.mxu3 %v1171_v42  ;;  %v1117_v7 = vld [vmem:[%s4972_s4 + $0xe40] sm:$0xff]  ;;  %v840_v42 = vld [vmem:[%s4972_s4 + $0x598] sm:$0xff] }
 0x19b   :  { %1582 = vmatpush.msrb.mxu0 %v814_v62  ;;  %1534 = vmatpush.msra.mxu1 %v694_v23  ;;  %v1155_v23 = vld [vmem:[%s4972_s4 + $0xf70] sm:$0xff] }
 0x19c   :  { %1464 = vmatpush.msra.mxu2 %v1129_v31  ;;  %1480 = vmatpush.msra.mxu3 %v1169_v25  ;;  %v639_v31 = vpop.f32.mrf.mxu1  ;;  %v1115_v25 = vld [vmem:[%s4972_s4 + $0xe30] sm:$0xff] }
 0x19d   :  { %1515 = vmatmul.f32.vlgmr.msra.gmra.mxu0 %v645_v26  ;;  %1455 = vmatmul.f32.vlgmr.msrb.gmra.mxu1 %v658_v4  ;;  %v444_v26 = vpop.f32.mrf.mxu2 }
 0x19e   :  { %1583 = vmatpush.msrb.mxu0 %v812_v53  ;;  %1599 = vmatpush.msrb.mxu1 %v852_v46  ;;  %v445_v32 = vadd.f32 %v444_v26, %v380_v33  ;;  %v798_v53 = vld [vmem:[%s4972_s4 + $0x448] sm:$0xff]  ;;  %v1111_v26 = vld [vmem:[%s4972_s4 + $0xe10] sm:$0xff]  ;;  %v1149_v33 = vld [vmem:[%s4972_s4 + $0xf40] sm:$0xff] }
 0x19f   :  { %1465 = vmatpush.msra.mxu2 %v1127_v1  ;;  %1481 = vmatpush.msra.mxu3 %v1167_v13  ;;  %v838_v46 = vld [vmem:[%s4972_s4 + $0x588] sm:$0xff]  ;;  %v1113_v1 = vld [vmem:[%s4972_s4 + $0xe20] sm:$0xff]  ;;  %v796_v13 = vld [vmem:[%s4972_s4 + $0x438] sm:$0xff] }
 0x1a0   :  { %1584 = vmatpush.msrb.mxu0 %v810_v60  ;;  %1600 = vmatpush.msrb.mxu1 %v850_v3  ;;  %v510_v56 = vadd.f32 %v509_v0, %v445_v32  ;;  %v836_v60 = vld [vmem:[%s4972_s4 + $0x578] sm:$0xff]  ;;  %v512_v3 = vpop.f32.mrf.mxu3 }
 0x1a1   :  { %1466 = vmatpush.msra.mxu2 %v1125_v18  ;;  %1482 = vmatpush.msra.mxu3 %v1165_v38  ;;  %v794_v38 = vld [vmem:[%s4972_s4 + $0x428] sm:$0xff]  ;;  %v832_v32 = vld [vmem:[%s4972_s4 + $0x558] sm:$0xff] }
 0x1a2   :  { %1585 = vmatpush.msrb.mxu0 %v808_v9  ;;  %1601 = vmatpush.msrb.mxu1 %v848_v30  ;;  %v575_v62 = vadd.f32 %v574_v19, %v510_v56  ;;  %v834_v9 = vld [vmem:[%s4972_s4 + $0x568] sm:$0xff]  ;;  %v577_v30 = vpop.f32.mrf.mxu0 }
 0x1a3   :  { %1467 = vmatpush.msra.mxu2 %v1123_v55  ;;  %1483 = vmatpush.msra.mxu3 %v1163_v27  ;;  %v1109_v55 = vld [vmem:[%s4972_s4 + $0xe00] sm:$0xff]  ;;  %v754_v19 = vld [vmem:[%s4972_s4 + $0x2e8] sm:$0xff] }
 0x1a4   :  { %1586 = vmatpush.msrb.mxu0 %v806_v58  ;;  %1602 = vmatpush.msrb.mxu1 %v846_v41  ;;  %v4109_v18 = vadd.f32 %v639_v31, %v575_v62  ;;  %v792_v58 = vld [vmem:[%s4972_s4 + $0x418] sm:$0xff]  ;;  %v1141_v62 = vld [vmem:[%s4972_s4 + $0xf00] sm:$0xff] }
 0x1a5   :  { %1468 = vmatpush.msra.mxu2 %v1121_v10  ;;  %1484 = vmatpush.msra.mxu3 %v1161_v50  ;;  %v447_v61 = vpop.f32.mrf.mxu2  ;;  %v756_v10 = vld [vmem:[%s4972_s4 + $0x2f8] sm:$0xff]  ;;  %v1147_v50 = vld [vmem:[%s4972_s4 + $0xf30] sm:$0xff] }
 0x1a6   :  { %1535 = vmatmul.f32.vlgmr.msra.gmra.mxu1 %v646_v36  ;;  %1587 = vmatpush.msrb.mxu0 %v804_v39  ;;  %v800_v36 = vld [vmem:[%s4972_s4 + $0x458] sm:$0xff]  ;;  %v448_v16 = vadd.f32 %v447_v61, %v3260_v34  ;;  %v1151_v34 = vld [vmem:[%s4972_s4 + $0xf50] sm:$0xff]  ;;  %v659_v41 = vmax.f32 %v4109_v18, 0.0  ;;  %v790_v39 = vld [vmem:[%s4972_s4 + $0x408] sm:$0xff] }
 0x1a7   :  { %1603 = vmatpush.msrb.mxu1 %v844_v59  ;;  %1469 = vmatpush.msra.mxu2 %v1119_v14  ;;  %v642_v59 = vpop.f32.mrf.mxu1  ;;  %v830_v14 = vld [vmem:[%s4972_s4 + $0x548] sm:$0xff]  ;;  %v748_v31 = vld [vmem:[%s4972_s4 + $0x2b8] sm:$0xff] }
 0x1a8   :  { %1485 = vmatpush.msra.mxu3 %v1159_v47  ;;  %1588 = vmatpush.msrb.mxu0 %v802_v6  ;;  %v513_v27 = vadd.f32 %v512_v3, %v448_v16  ;;  %v1145_v47 = vld [vmem:[%s4972_s4 + $0xf20] sm:$0xff]  ;;  %v948_v6 = vld [vmem:[%s4972_s4 + $0x8f8] sm:$0xff]  ;;  %v826_v61 = vld [vmem:[%s4972_s4 + $0x528] sm:$0xff] }
 0x1a9   :  { %1604 = vmatpush.msrb.mxu1 %v842_v29  ;;  %1470 = vmatpush.msra.mxu2 %v1117_v7  ;;  %v752_v29 = vld [vmem:[%s4972_s4 + $0x2d8] sm:$0xff] }
 0x1aa   :  { %1486 = vmatpush.msra.mxu3 %v1157_v21  ;;  %1589 = vmatpush.msrb.mxu0 %v800_v36  ;;  %v578_v0 = vadd.f32 %v577_v30, %v513_v27  ;;  %v828_v7 = vld [vmem:[%s4972_s4 + $0x538] sm:$0xff]  ;;  %v1143_v21 = vld [vmem:[%s4972_s4 + $0xf10] sm:$0xff]  ;;  %v946_v36 = vld [vmem:[%s4972_s4 + $0x8e8] sm:$0xff] }
 0x1ab   :  { %1605 = vmatpush.msrb.mxu1 %v840_v42  ;;  %1471 = vmatpush.msra.mxu2 %v1115_v25  ;;  %v750_v42 = vld [vmem:[%s4972_s4 + $0x2c8] sm:$0xff]  ;;  %v788_v25 = vld [vmem:[%s4972_s4 + $0x3f8] sm:$0xff] }
 0x1ac   :  { %1487 = vmatpush.msra.mxu3 %v1155_v23  ;;  %1590 = vmatpush.msrb.mxu0 %v798_v53  ;;  %v4162_v56 = vadd.f32 %v642_v59, %v578_v0  ;;  %v824_v23 = vld [vmem:[%s4972_s4 + $0x518] sm:$0xff]  ;;  %v942_v53 = vld [vmem:[%s4972_s4 + $0x8c8] sm:$0xff] }
 0x1ad   :  { %1606 = vmatpush.msrb.mxu1 %v838_v46  ;;  %1472 = vmatpush.msra.mxu2 %v1113_v1  ;;  %v746_v46 = vld [vmem:[%s4972_s4 + $0x2a8] sm:$0xff]  ;;  %v940_v16 = vld [vmem:[%s4972_s4 + $0x8b8] sm:$0xff] }
 0x1ae   :  { %1488 = vmatpush.msra.mxu3 %v1153_v17  ;;  %1591 = vmatpush.msrb.mxu0 %v796_v13  ;;  %v786_v1 = vld [vmem:[%s4972_s4 + $0x3e8] sm:$0xff]  ;;  %v744_v13 = vld [vmem:[%s4972_s4 + $0x298] sm:$0xff] }
 0x1af   :  { %1607 = vmatpush.msrb.mxu1 %v836_v60  ;;  %1473 = vmatpush.msra.mxu2 %v1111_v26  ;;  %v822_v17 = vld [vmem:[%s4972_s4 + $0x508] sm:$0xff]  ;;  %v980_v60 = vld [vmem:[%s4972_s4 + $0x9f8] sm:$0xff] }
 0x1b0   :  { %1489 = vmatpush.msra.mxu3 %v1151_v34  ;;  %1592 = vmatpush.msrb.mxu0 %v794_v38  ;;  %v784_v3 = vld [vmem:[%s4972_s4 + $0x3d8] sm:$0xff]  ;;  %v938_v26 = vld [vmem:[%s4972_s4 + $0x8a8] sm:$0xff] }
 0x1b1   :  { %1608 = vmatpush.msrb.mxu1 %v834_v9  ;;  %1474 = vmatpush.msra.mxu2 %v1109_v55  ;;  %v742_v34 = vld [vmem:[%s4972_s4 + $0x288] sm:$0xff]  ;;  %v936_v30 = vld [vmem:[%s4972_s4 + $0x898] sm:$0xff] }
 0x1b2   :  { %1490 = vmatpush.msra.mxu3 %v1149_v33  ;;  %1475 = vmatmul.f32.vlgmr.msra.gmra.mxu2 %v659_v41  ;;  %v978_v38 = vld [vmem:[%s4972_s4 + $0x9e8] sm:$0xff]  ;;  %v780_v55 = vld [vmem:[%s4972_s4 + $0x3b8] sm:$0xff] }
 0x1b3   :  { %1593 = vmatpush.msrb.mxu0 %v792_v58  ;;  %1539 = vmatpush.msrb.mxu2 %v756_v10  ;;  %v782_v9 = vld [vmem:[%s4972_s4 + $0x3c8] sm:$0xff]  ;;  %v736_v0 = vld [vmem:[%s4972_s4 + $0x258] sm:$0xff] }
 0x1b4   :  { %1609 = vmatpush.msrb.mxu1 %v832_v32  ;;  %1491 = vmatpush.msra.mxu3 %v1147_v50  ;;  %v934_v33 = vld [vmem:[%s4972_s4 + $0x888] sm:$0xff]  ;;  %v932_v32 = vld [vmem:[%s4972_s4 + $0x878] sm:$0xff] }
 0x1b5   :  { %1594 = vmatpush.msrb.mxu0 %v790_v39  ;;  %1540 = vmatpush.msrb.mxu2 %v754_v19  ;;  %v738_v27 = vld [vmem:[%s4972_s4 + $0x268] sm:$0xff]  ;;  %v972_v50 = vld [vmem:[%s4972_s4 + $0x9b8] sm:$0xff] }
 0x1b6   :  { %1610 = vmatpush.msrb.mxu1 %v830_v14  ;;  %1492 = vmatpush.msra.mxu3 %v1145_v47  ;;  %v974_v58 = vld [vmem:[%s4972_s4 + $0x9c8] sm:$0xff]  ;;  %v776_v39 = vld [vmem:[%s4972_s4 + $0x398] sm:$0xff] }
 0x1b7   :  { %1595 = vmatmul.f32.vlgmr.msrb.gmra.mxu0 %v649_v15  ;;  %1541 = vmatpush.msrb.mxu2 %v752_v29  ;;  %v660_v15 = vmax.f32 %v4162_v56, 0.0  ;;  %v778_v10 = vld [vmem:[%s4972_s4 + $0x3a8] sm:$0xff]  ;;  %v732_v29 = vld [vmem:[%s4972_s4 + $0x238] sm:$0xff]  ;;  %v1849_v56 = vld [vmem:[%s4974_s6 + $0xe0] sm:$0xff] }
 0x1b8   :  { %1659 = vmatpush.msra.mxu0 %v948_v6  ;;  %1611 = vmatpush.msrb.mxu1 %v828_v7  ;;  %v930_v59 = vld [vmem:[%s4972_s4 + $0x868] sm:$0xff]  ;;  %v928_v6 = vld [vmem:[%s4972_s4 + $0x858] sm:$0xff] }
 0x1b9   :  { %1493 = vmatpush.msra.mxu3 %v1143_v21  ;;  %1542 = vmatpush.msrb.mxu2 %v750_v42  ;;  %v734_v19 = vld [vmem:[%s4972_s4 + $0x248] sm:$0xff]  ;;  %v968_v7 = vld [vmem:[%s4972_s4 + $0x998] sm:$0xff] }
 0x1ba   :  { %1660 = vmatpush.msra.mxu0 %v946_v36  ;;  %1612 = vmatpush.msrb.mxu1 %v826_v61  ;;  %v970_v14 = vld [vmem:[%s4972_s4 + $0x9a8] sm:$0xff]  ;;  %v772_v21 = vld [vmem:[%s4972_s4 + $0x378] sm:$0xff] }
 0x1bb   :  { %1494 = vmatpush.msra.mxu3 %v1141_v62  ;;  %1543 = vmatpush.msrb.mxu2 %v748_v31  ;;  %v774_v47 = vld [vmem:[%s4972_s4 + $0x388] sm:$0xff]  ;;  %v728_v31 = vld [vmem:[%s4972_s4 + $0x218] sm:$0xff] }
 0x1bc   :  { %1661 = vmatpush.msra.mxu0 %v944_v5  ;;  %1495 = vmatmul.f32.vlgmr.msra.gmra.mxu3 %v660_v15  ;;  %v926_v36 = vld [vmem:[%s4972_s4 + $0x848] sm:$0xff]  ;;  %v924_v5 = vld [vmem:[%s4972_s4 + $0x838] sm:$0xff] }
 0x1bd   :  { %1559 = vmatpush.msrb.mxu3 %v788_v25  ;;  %1613 = vmatpush.msrb.mxu1 %v824_v23  ;;  %v730_v42 = vld [vmem:[%s4972_s4 + $0x228] sm:$0xff]  ;;  %v964_v25 = vld [vmem:[%s4972_s4 + $0x978] sm:$0xff] }
 0x1be   :  { %1662 = vmatpush.msra.mxu0 %v942_v53  ;;  %1544 = vmatpush.msrb.mxu2 %v746_v46  ;;  %v966_v61 = vld [vmem:[%s4972_s4 + $0x988] sm:$0xff]  ;;  %v768_v23 = vld [vmem:[%s4972_s4 + $0x358] sm:$0xff] }
 0x1bf   :  { %1560 = vmatpush.msrb.mxu3 %v786_v1  ;;  %1614 = vmatpush.msrb.mxu1 %v822_v17  ;;  %v770_v62 = vld [vmem:[%s4972_s4 + $0x368] sm:$0xff] }
 0x1c0   :  { %1663 = vmatpush.msra.mxu0 %v940_v16  ;;  %1615 = vmatmul.f32.vlgmr.msrb.gmra.mxu1 %v650_v48  ;;  %v976_v48 = vld [vmem:[%s4972_s4 + $0x9d8] sm:$0xff]  ;;  %v922_v53 = vld [vmem:[%s4972_s4 + $0x828] sm:$0xff] }
 0x1c1   :  { %1545 = vmatpush.msrb.mxu2 %v744_v13  ;;  %1679 = vmatpush.msra.mxu1 %v980_v60  ;;  %v726_v46 = vld [vmem:[%s4972_s4 + $0x208] sm:$0xff]  ;;  %v920_v16 = vld [vmem:[%s4972_s4 + $0x818] sm:$0xff] }
 0x1c2   :  { %1561 = vmatpush.msrb.mxu3 %v784_v3  ;;  %1664 = vmatpush.msra.mxu0 %v938_v26  ;;  %v962_v1 = vld [vmem:[%s4972_s4 + $0x968] sm:$0xff]  ;;  %v884_v13 = vld [vmem:[%s4972_s4 + $0x6f8] sm:$0xff] }
 0x1c3   :  { %1546 = vmatpush.msrb.mxu2 %v742_v34  ;;  %1680 = vmatpush.msra.mxu1 %v978_v38  ;;  %v766_v17 = vld [vmem:[%s4972_s4 + $0x348] sm:$0xff]  ;;  %v960_v60 = vld [vmem:[%s4972_s4 + $0x958] sm:$0xff] }
 0x1c4   :  { %1562 = vmatpush.msrb.mxu3 %v782_v9  ;;  %1665 = vmatpush.msra.mxu0 %v936_v30  ;;  %v764_v3 = vld [vmem:[%s4972_s4 + $0x338] sm:$0xff]  ;;  %v918_v26 = vld [vmem:[%s4972_s4 + $0x808] sm:$0xff] }
 0x1c5   :  { %1547 = vmatpush.msrb.mxu2 %v740_v49  ;;  %1681 = vmatpush.msra.mxu1 %v976_v48  ;;  %v882_v34 = vld [vmem:[%s4972_s4 + $0x6e8] sm:$0xff]  ;;  %v956_v30 = vld [vmem:[%s4972_s4 + $0x938] sm:$0xff] }
 0x1c6   :  { %1563 = vmatpush.msrb.mxu3 %v780_v55  ;;  %1666 = vmatpush.msra.mxu0 %v934_v33  ;;  %v958_v38 = vld [vmem:[%s4972_s4 + $0x948] sm:$0xff]  ;;  %v760_v49 = vld [vmem:[%s4972_s4 + $0x318] sm:$0xff] }
 0x1c7   :  { %1548 = vmatpush.msrb.mxu2 %v738_v27  ;;  %1682 = vmatpush.msra.mxu1 %v974_v58  ;;  %v762_v9 = vld [vmem:[%s4972_s4 + $0x328] sm:$0xff]  ;;  %v916_v58 = vld [vmem:[%s4972_s4 + $0x7f8] sm:$0xff] }
 0x1c8   :  { %1564 = vmatpush.msrb.mxu3 %v778_v10  ;;  %1667 = vmatpush.msra.mxu0 %v932_v32  ;;  %v1074_v48 = vld [vmem:[%s4972_s4 + $0xce8] sm:$0xff]  ;;  %v952_v10 = vld [vmem:[%s4972_s4 + $0x918] sm:$0xff] }
 0x1c9   :  { %1549 = vmatpush.msrb.mxu2 %v736_v0  ;;  %1683 = vmatpush.msra.mxu1 %v972_v50  ;;  %v878_v55 = vld [vmem:[%s4972_s4 + $0x6c8] sm:$0xff] }
 0x1ca   :  { %1565 = vmatpush.msrb.mxu3 %v776_v39  ;;  %1668 = vmatpush.msra.mxu0 %v930_v59  ;;  %v954_v33 = vld [vmem:[%s4972_s4 + $0x928] sm:$0xff]  ;;  %v1068_v59 = vld [vmem:[%s4972_s4 + $0xcb8] sm:$0xff] }
 0x1cb   :  { %1550 = vmatpush.msrb.mxu2 %v734_v19  ;;  %1684 = vmatpush.msra.mxu1 %v970_v14  ;;  %v758_v27 = vld [vmem:[%s4972_s4 + $0x308] sm:$0xff]  ;;  %v912_v19 = vld [vmem:[%s4972_s4 + $0x7d8] sm:$0xff] }
 0x1cc   :  { %1566 = vmatpush.msrb.mxu3 %v774_v47  ;;  %1669 = vmatpush.msra.mxu0 %v928_v6  ;;  %v1070_v32 = vld [vmem:[%s4972_s4 + $0xcc8] sm:$0xff] }
 0x1cd   :  { %1551 = vmatpush.msrb.mxu2 %v732_v29  ;;  %1685 = vmatpush.msra.mxu1 %v968_v7  ;;  %v874_v0 = vld [vmem:[%s4972_s4 + $0x6a8] sm:$0xff]  ;;  %v1064_v7 = vld [vmem:[%s4972_s4 + $0xc98] sm:$0xff] }
 0x1ce   :  { %1567 = vmatpush.msrb.mxu3 %v772_v21  ;;  %1670 = vmatpush.msra.mxu0 %v926_v36  ;;  %v914_v50 = vld [vmem:[%s4972_s4 + $0x7e8] sm:$0xff]  ;;  %v908_v21 = vld [vmem:[%s4972_s4 + $0x7b8] sm:$0xff] }
 0x1cf   :  { %1552 = vmatpush.msrb.mxu2 %v730_v42  ;;  %1686 = vmatpush.msra.mxu1 %v966_v61  ;;  %v950_v39 = vld [vmem:[%s4972_s4 + $0x908] sm:$0xff] }
 0x1d0   :  { %1568 = vmatpush.msrb.mxu3 %v770_v62  ;;  %1671 = vmatpush.msra.mxu0 %v924_v5  ;;  %v1066_v14 = vld [vmem:[%s4972_s4 + $0xca8] sm:$0xff]  ;;  %v1060_v5 = vld [vmem:[%s4972_s4 + $0xc78] sm:$0xff] }
 0x1d1   :  { %1553 = vmatpush.msrb.mxu2 %v728_v31  ;;  %1687 = vmatpush.msra.mxu1 %v964_v25  ;;  %v870_v47 = vld [vmem:[%s4972_s4 + $0x688] sm:$0xff]  ;;  %v864_v31 = vld [vmem:[%s4972_s4 + $0x658] sm:$0xff] }
 0x1d2   :  { %1569 = vmatpush.msrb.mxu3 %v768_v23  ;;  %1672 = vmatpush.msra.mxu0 %v922_v53  ;;  %v1106_v6 = vld [vmem:[%s4972_s4 + $0xde8] sm:$0xff]  ;;  %v1100_v25 = vld [vmem:[%s4972_s4 + $0xdb8] sm:$0xff] }
 0x1d3   :  { %1554 = vmatpush.msrb.mxu2 %v726_v46  ;;  %1688 = vmatpush.msra.mxu1 %v962_v1  ;;  %v910_v29 = vld [vmem:[%s4972_s4 + $0x7c8] sm:$0xff]  ;;  %v904_v23 = vld [vmem:[%s4972_s4 + $0x798] sm:$0xff] }
 0x1d4   :  { %1570 = vmatpush.msrb.mxu3 %v766_v17  ;;  %1555 = vmatmul.f32.vlgmr.msrb.gmra.mxu2 %v647_v51  ;;  %v880_v51 = vld [vmem:[%s4972_s4 + $0x6d8] sm:$0xff]  ;;  %v1062_v36 = vld [vmem:[%s4972_s4 + $0xc88] sm:$0xff] }
 0x1d5   :  { %1673 = vmatpush.msra.mxu0 %v920_v16  ;;  %1619 = vmatpush.msra.mxu2 %v884_v13  ;;  %v866_v42 = vld [vmem:[%s4972_s4 + $0x668] sm:$0xff]  ;;  %v1056_v16 = vld [vmem:[%s4972_s4 + $0xc58] sm:$0xff] }
 0x1d6   :  { %1689 = vmatpush.msra.mxu1 %v960_v60  ;;  %1571 = vmatpush.msrb.mxu3 %v764_v3  ;;  %v1102_v61 = vld [vmem:[%s4972_s4 + $0xdc8] sm:$0xff]  ;;  %v860_v13 = vld [vmem:[%s4972_s4 + $0x638] sm:$0xff] }
 0x1d7   :  { %1674 = vmatpush.msra.mxu0 %v918_v26  ;;  %1620 = vmatpush.msra.mxu2 %v882_v34  ;;  %v906_v62 = vld [vmem:[%s4972_s4 + $0x7a8] sm:$0xff]  ;;  %v1096_v60 = vld [vmem:[%s4972_s4 + $0xd98] sm:$0xff] }
 0x1d8   :  { %1690 = vmatpush.msra.mxu1 %v958_v38  ;;  %1572 = vmatpush.msrb.mxu3 %v762_v9  ;;  %v1058_v53 = vld [vmem:[%s4972_s4 + $0xc68] sm:$0xff]  ;;  %v900_v3 = vld [vmem:[%s4972_s4 + $0x778] sm:$0xff] }
 0x1d9   :  { %1675 = vmatmul.f32.vlgmr.msra.gmra.mxu0 %v653_v52  ;;  %1621 = vmatpush.msra.mxu2 %v880_v51  ;;  %v876_v52 = vld [vmem:[%s4972_s4 + $0x6b8] sm:$0xff]  ;;  %v862_v46 = vld [vmem:[%s4972_s4 + $0x648] sm:$0xff] }
 0x1da   :  { %1739 = vmatpush.msrb.mxu0 %v1076_v37  ;;  %1691 = vmatpush.msra.mxu1 %v956_v30  ;;  %v1098_v1 = vld [vmem:[%s4972_s4 + $0xda8] sm:$0xff]  ;;  %v1052_v37 = vld [vmem:[%s4972_s4 + $0xc38] sm:$0xff] }
 0x1db   :  { %1573 = vmatpush.msrb.mxu3 %v760_v49  ;;  %1622 = vmatpush.msra.mxu2 %v878_v55  ;;  %v902_v17 = vld [vmem:[%s4972_s4 + $0x788] sm:$0xff]  ;;  %v856_v51 = vld [vmem:[%s4972_s4 + $0x618] sm:$0xff] }
 0x1dc   :  { %1740 = vmatpush.msrb.mxu0 %v1074_v48  ;;  %1692 = vmatpush.msra.mxu1 %v954_v33  ;;  %v1054_v26 = vld [vmem:[%s4972_s4 + $0xc48] sm:$0xff]  ;;  %v1092_v30 = vld [vmem:[%s4972_s4 + $0xd78] sm:$0xff] }
 0x1dd   :  { %1574 = vmatpush.msrb.mxu3 %v758_v27  ;;  %1623 = vmatpush.msra.mxu2 %v876_v52  ;;  %v858_v34 = vld [vmem:[%s4972_s4 + $0x628] sm:$0xff]  ;;  %v896_v49 = vld [vmem:[%s4972_s4 + $0x758] sm:$0xff] }
 0x1de   :  { %1741 = vmatpush.msrb.mxu0 %v1072_v40  ;;  %1575 = vmatmul.f32.vlgmr.msrb.gmra.mxu3 %v648_v28  ;;  %v1108_v28 = vld [vmem:[%s4972_s4 + $0xdf8] sm:$0xff]  ;;  %v1094_v38 = vld [vmem:[%s4972_s4 + $0xd88] sm:$0xff] }
 0x1df   :  { %1639 = vmatpush.msra.mxu3 %v916_v58  ;;  %1693 = vmatpush.msra.mxu1 %v952_v10  ;;  %v898_v9 = vld [vmem:[%s4972_s4 + $0x768] sm:$0xff]  ;;  %v1048_v40 = vld [vmem:[%s4972_s4 + $0xc18] sm:$0xff] }
 0x1e0   :  { %1742 = vmatpush.msrb.mxu0 %v1070_v32  ;;  %1624 = vmatpush.msra.mxu2 %v874_v0  ;;  %v1050_v48 = vld [vmem:[%s4972_s4 + $0xc28] sm:$0xff]  ;;  %v1012_v52 = vld [vmem:[%s4972_s4 + $0xaf8] sm:$0xff] }
 0x1e1   :  { %1640 = vmatpush.msra.mxu3 %v914_v50  ;;  %1694 = vmatpush.msra.mxu1 %v950_v39  ;;  %v854_v55 = vld [vmem:[%s4972_s4 + $0x608] sm:$0xff]  ;;  %v1088_v58 = vld [vmem:[%s4972_s4 + $0xd58] sm:$0xff] }
 0x1e2   :  { %1743 = vmatpush.msrb.mxu0 %v1068_v59  ;;  %1695 = vmatmul.f32.vlgmr.msra.gmra.mxu1 %v654_v11  ;;  %v1104_v11 = vld [vmem:[%s4972_s4 + $0xdd8] sm:$0xff]  ;;  %v1090_v33 = vld [vmem:[%s4972_s4 + $0xd68] sm:$0xff] }
 0x1e3   :  { %1625 = vmatpush.msra.mxu2 %v872_v22  ;;  %1759 = vmatpush.msrb.mxu1 %v1108_v28  ;;  %v894_v27 = vld [vmem:[%s4972_s4 + $0x748] sm:$0xff]  ;;  %v892_v10 = vld [vmem:[%s4972_s4 + $0x738] sm:$0xff] }
 0x1e4   :  { %1641 = vmatpush.msra.mxu3 %v912_v19  ;;  %1744 = vmatpush.msrb.mxu0 %v1066_v14  ;;  %v1046_v32 = vld [vmem:[%s4972_s4 + $0xc08] sm:$0xff]  ;;  %v888_v59 = vld [vmem:[%s4972_s4 + $0x718] sm:$0xff] }
 0x1e5   :  { %1626 = vmatpush.msra.mxu2 %v870_v47  ;;  %1760 = vmatpush.msrb.mxu1 %v1106_v6  ;;  %v1010_v0 = vld [vmem:[%s4972_s4 + $0xae8] sm:$0xff]  ;;  %v1080_v14 = vld [vmem:[%s4972_s4 + $0xd18] sm:$0xff] }
 0x1e6   :  { %1642 = vmatpush.msra.mxu3 %v910_v29  ;;  %1745 = vmatpush.msrb.mxu0 %v1064_v7  ;;  %v1086_v50 = vld [vmem:[%s4972_s4 + $0xd48] sm:$0xff]  ;;  %v1000_v7 = vld [vmem:[%s4972_s4 + $0xa98] sm:$0xff] }
 0x1e7   :  { %1627 = vmatpush.msra.mxu2 %v868_v24  ;;  %1761 = vmatpush.msrb.mxu1 %v1104_v11  ;;  %v890_v39 = vld [vmem:[%s4972_s4 + $0x728] sm:$0xff]  ;;  %v996_v11 = vld [vmem:[%s4972_s4 + $0xa78] sm:$0xff] }
 0x1e8   :  { %1643 = vmatpush.msra.mxu3 %v908_v21  ;;  %1746 = vmatpush.msrb.mxu0 %v1062_v36  ;;  %v1006_v22 = vld [vmem:[%s4972_s4 + $0xac8] sm:$0xff]  ;;  %v1036_v21 = vld [vmem:[%s4972_s4 + $0xbb8] sm:$0xff] }
 0x1e9   :  { %1628 = vmatpush.msra.mxu2 %v866_v42  ;;  %1762 = vmatpush.msrb.mxu1 %v1102_v61  ;;  %v1082_v28 = vld [vmem:[%s4972_s4 + $0xd28] sm:$0xff]  ;;  %v992_v36 = vld [vmem:[%s4972_s4 + $0xa58] sm:$0xff]  ;;  %v1196_v61 = vpop.f32.mrf.mxu2 }
 0x1ea   :  { %1644 = vmatpush.msra.mxu3 %v906_v62  ;;  %1747 = vmatpush.msrb.mxu0 %v1060_v5  ;;  %v886_v19 = vld [vmem:[%s4972_s4 + $0x708] sm:$0xff]  ;;  %v1032_v42 = vld [vmem:[%s4972_s4 + $0xb98] sm:$0xff] }
 0x1eb   :  { %1629 = vmatpush.msra.mxu2 %v864_v31  ;;  %1763 = vmatpush.msrb.mxu1 %v1100_v25  ;;  %v1002_v47 = vld [vmem:[%s4972_s4 + $0xaa8] sm:$0xff]  ;;  %v1836_v31 = vld [vmem:[%s4974_s6 + $0x78] sm:$0xff]  ;;  %v1216_v25 = vpop.f32.mrf.mxu3 }
 0x1ec   :  { %1645 = vmatpush.msra.mxu3 %v904_v23  ;;  %1748 = vmatpush.msrb.mxu0 %v1058_v53  ;;  %v1042_v6 = vld [vmem:[%s4972_s4 + $0xbe8] sm:$0xff]  ;;  %v988_v23 = vld [vmem:[%s4972_s4 + $0xa38] sm:$0xff] }
 0x1ed   :  { %1630 = vmatpush.msra.mxu2 %v862_v46  ;;  %1764 = vmatpush.msrb.mxu1 %v1098_v1  ;;  %v1078_v29 = vld [vmem:[%s4972_s4 + $0xd08] sm:$0xff]  ;;  %v1028_v53 = vld [vmem:[%s4972_s4 + $0xb78] sm:$0xff]  ;;  %v1835_v46 = vld [vmem:[%s4974_s6 + $0x70] sm:$0xff] }
 0x1ee   :  { %1646 = vmatpush.msra.mxu3 %v902_v17  ;;  %1749 = vmatpush.msrb.mxu0 %v1056_v16  ;;  %v1038_v24 = vld [vmem:[%s4972_s4 + $0xbc8] sm:$0xff] }
 0x1ef   :  { %1631 = vmatpush.msra.mxu2 %v860_v13  ;;  %1765 = vmatpush.msrb.mxu1 %v1096_v60  ;;  %v990_v62 = vld [vmem:[%s4972_s4 + $0xa48] sm:$0xff]  ;;  %v984_v13 = vld [vmem:[%s4972_s4 + $0xa18] sm:$0xff] }
 0x1f0   :  { %1647 = vmatpush.msra.mxu3 %v900_v3  ;;  %1750 = vmatpush.msrb.mxu0 %v1054_v26  ;;  %v1030_v5 = vld [vmem:[%s4972_s4 + $0xb88] sm:$0xff]  ;;  %v1024_v60 = vld [vmem:[%s4972_s4 + $0xb58] sm:$0xff]  ;;  %v1833_v3 = vld [vmem:[%s4974_s6 + $0x60] sm:$0xff] }
 0x1f1   :  { %1632 = vmatpush.msra.mxu2 %v858_v34  ;;  %1766 = vmatpush.msrb.mxu1 %v1094_v38  ;;  %v986_v1 = vld [vmem:[%s4972_s4 + $0xa28] sm:$0xff]  ;;  %v4670_v26 = vld [vmem:[%s4973_s5] sm:$0x3]  ;;  %v1236_v34 = vpop.f32.mrf.mxu2 }
 0x1f2   :  { %1648 = vmatpush.msra.mxu3 %v898_v9  ;;  %1751 = vmatpush.msrb.mxu0 %v1052_v37  ;;  %v1026_v17 = vld [vmem:[%s4972_s4 + $0xb68] sm:$0xff]  ;;  %v1832_v37 = vld [vmem:[%s4974_s6 + $0x58] sm:$0xff] }
 0x1f3   :  { %1633 = vmatpush.msra.mxu2 %v856_v51  ;;  %1767 = vmatpush.msrb.mxu1 %v1092_v30  ;;  %v1834_v16 = vld [vmem:[%s4974_s6 + $0x68] sm:$0xff]  ;;  %v1256_v51 = vpop.f32.mrf.mxu3  ;;  %v1140_v30 = vld [vmem:[%s4972_s4 + $0xef8] sm:$0xff] }
 0x1f4   :  { %1649 = vmatpush.msra.mxu3 %v896_v49  ;;  %1752 = vmatpush.msrb.mxu0 %v1050_v48  ;;  %v982_v38 = vld [vmem:[%s4972_s4 + $0xa08] sm:$0xff]  ;;  %v1175_v49 = vperm.slane %v4670_v26, 0  ;;  %v1020_v48 = vld [vmem:[%s4972_s4 + $0xb38] sm:$0xff] }
 0x1f5   :  { %1634 = vmatpush.msra.mxu2 %v854_v55  ;;  %1768 = vmatpush.msrb.mxu1 %v1090_v33  ;;  %v1022_v9 = vld [vmem:[%s4972_s4 + $0xb48] sm:$0xff]  ;;  %v1831_v55 = vld [vmem:[%s4974_s6 + $0x50] sm:$0xff] }
 0x1f6   :  { %1650 = vmatpush.msra.mxu3 %v894_v27  ;;  %1635 = vmatmul.f32.vlgmr.msra.gmra.mxu2 %v651_v43  ;;  %v1084_v43 = vld [vmem:[%s4972_s4 + $0xd38] sm:$0xff]  ;;  %v1138_v33 = vld [vmem:[%s4972_s4 + $0xee8] sm:$0xff] }
 0x1f7   :  { %1753 = vmatpush.msrb.mxu0 %v1048_v40  ;;  %1699 = vmatpush.msrb.mxu2 %v1012_v52  ;;  %v1018_v27 = vld [vmem:[%s4972_s4 + $0xb28] sm:$0xff]  ;;  %v1016_v52 = vld [vmem:[%s4972_s4 + $0xb18] sm:$0xff] }
 0x1f8   :  { %1769 = vmatpush.msrb.mxu1 %v1088_v58  ;;  %1651 = vmatpush.msra.mxu3 %v892_v10  ;;  %v1830_v40 = vld [vmem:[%s4974_s6 + $0x48] sm:$0xff]  ;;  %v1829_v58 = vld [vmem:[%s4974_s6 + $0x40] sm:$0xff] }
 0x1f9   :  { %1754 = vmatpush.msrb.mxu0 %v1046_v32  ;;  %1700 = vmatpush.msrb.mxu2 %v1010_v0  ;;  %v1276_v10 = vpop.f32.mrf.mxu2  ;;  %v1134_v32 = vld [vmem:[%s4972_s4 + $0xec8] sm:$0xff] }
 0x1fa   :  { %1770 = vmatpush.msrb.mxu1 %v1086_v50  ;;  %1652 = vmatpush.msra.mxu3 %v890_v39  ;;  %v1014_v50 = vld [vmem:[%s4972_s4 + $0xb08] sm:$0xff]  ;;  %v1828_v39 = vld [vmem:[%s4974_s6 + $0x38] sm:$0xff] }
 0x1fb   :  { %1755 = vmatmul.f32.vlgmr.msrb.gmra.mxu0 %v657_v45  ;;  %1701 = vmatpush.msrb.mxu2 %v1008_v44  ;;  %v1044_v45 = vld [vmem:[%s4972_s4 + $0xbf8] sm:$0xff]  ;;  %v1296_v44 = vpop.f32.mrf.mxu3 }
 0x1fc   :  { %1771 = vmatpush.msrb.mxu1 %v1084_v43  ;;  %1653 = vmatpush.msra.mxu3 %v888_v59  ;;  %v1132_v43 = vld [vmem:[%s4972_s4 + $0xeb8] sm:$0xff] }
 0x1fd   :  { %1702 = vmatpush.msrb.mxu2 %v1006_v22  ;;  %1857 = vmatpush.msra.mxu0 %v1836_v31  ;;  %v1172_v22 = vld [vmem:[%s4972_s4 + $0xff8] sm:$0xff] }
 0x1fe   :  { %1772 = vmatpush.msrb.mxu1 %v1082_v28  ;;  %1654 = vmatpush.msra.mxu3 %v886_v19  ;;  %v1827_v28 = vld [vmem:[%s4974_s6 + $0x30] sm:$0xff]  ;;  %v1130_v19 = vld [vmem:[%s4972_s4 + $0xea8] sm:$0xff]  ;;  %v1120_v31 = vld [vmem:[%s4972_s4 + $0xe58] sm:$0xff] }
 0x1ff   :  { %1655 = vmatmul.f32.vlgmr.msra.gmra.mxu3 %v652_v2  ;;  %1703 = vmatpush.msrb.mxu2 %v1004_v12  ;;  %v998_v2 = vld [vmem:[%s4972_s4 + $0xa88] sm:$0xff] }
 0x200   :  { %1719 = vmatpush.msrb.mxu3 %v1044_v45  ;;  %1773 = vmatpush.msrb.mxu1 %v1080_v14  ;;  %v1170_v45 = vld [vmem:[%s4972_s4 + $0xfe8] sm:$0xff] }
 0x201   :  { %1704 = vmatpush.msrb.mxu2 %v1002_v47  ;;  %1858 = vmatpush.msra.mxu0 %v1835_v46  ;;  %v1826_v14 = vld [vmem:[%s4974_s6 + $0x28] sm:$0xff]  ;;  %v1128_v47 = vld [vmem:[%s4972_s4 + $0xe98] sm:$0xff] }
 0x202   :  { %1720 = vmatpush.msrb.mxu3 %v1042_v6  ;;  %1774 = vmatpush.msrb.mxu1 %v1078_v29  ;;  %v1316_v29 = vpop.f32.mrf.mxu2  ;;  %v1118_v46 = vld [vmem:[%s4972_s4 + $0xe48] sm:$0xff] }
 0x203   :  { %1775 = vmatmul.f32.vlgmr.msrb.gmra.mxu1 %v658_v4  ;;  %1705 = vmatpush.msrb.mxu2 %v1000_v7  ;;  %v1034_v4 = vld [vmem:[%s4972_s4 + $0xba8] sm:$0xff] }
 0x204   :  { %1721 = vmatpush.msrb.mxu3 %v1040_v54  ;;  %1859 = vmatpush.msra.mxu0 %v1834_v16  ;;  %v1126_v7 = vld [vmem:[%s4972_s4 + $0xe88] sm:$0xff]  ;;  %v1116_v16 = vld [vmem:[%s4972_s4 + $0xe38] sm:$0xff] }
 0x205   :  { %1706 = vmatpush.msrb.mxu2 %v998_v2  ;;  %v1166_v2 = vld [vmem:[%s4972_s4 + $0xfc8] sm:$0xff] }
 0x206   :  { %1722 = vmatpush.msrb.mxu3 %v1038_v24  ;;  %1860 = vmatpush.msra.mxu0 %v1833_v3  ;;  %v1824_v24 = vld [vmem:[%s4974_s6 + $0x18] sm:$0xff] }
 0x207   :  { %1707 = vmatpush.msrb.mxu2 %v996_v11  ;;  %v1336_v11 = vpop.f32.mrf.mxu3 }
 0x208   :  { %1723 = vmatpush.msrb.mxu3 %v1036_v21  ;;  %1861 = vmatpush.msra.mxu0 %v1832_v37  ;;  %v1124_v21 = vld [vmem:[%s4972_s4 + $0xe78] sm:$0xff] }
 0x209   :  { %1708 = vmatpush.msrb.mxu2 %v994_v57 }
 0x20a   :  { %1724 = vmatpush.msrb.mxu3 %v1034_v4  ;;  %1862 = vmatpush.msra.mxu0 %v1831_v55  ;;  %v1164_v4 = vld [vmem:[%s4972_s4 + $0xfb8] sm:$0xff] }
 0x20b   :  { %1709 = vmatpush.msrb.mxu2 %v992_v36  ;;  %v1823_v36 = vld [vmem:[%s4974_s6 + $0x10] sm:$0xff] }
 0x20c   :  { %1725 = vmatpush.msrb.mxu3 %v1032_v42  ;;  %1863 = vmatpush.msra.mxu0 %v1830_v40  ;;  %v1122_v42 = vld [vmem:[%s4972_s4 + $0xe68] sm:$0xff] }
 0x20d   :  { %1710 = vmatpush.msrb.mxu2 %v990_v62  ;;  %v1162_v62 = vld [vmem:[%s4972_s4 + $0xfa8] sm:$0xff] }
 0x20e   :  { %1726 = vmatpush.msrb.mxu3 %v1030_v5  ;;  %1864 = vmatpush.msra.mxu0 %v1829_v58  ;;  %v1822_v5 = vld [vmem:[%s4974_s6 + $0x8] sm:$0xff] }
 0x20f   :  { %1711 = vmatpush.msrb.mxu2 %v988_v23  ;;  %v1821_v23 = vld [vmem:[%s4974_s6] sm:$0xff] }
 0x210   :  { %1727 = vmatpush.msrb.mxu3 %v1028_v53  ;;  %1865 = vmatpush.msra.mxu0 %v1828_v39  ;;  %v1356_v53 = vpop.f32.mrf.mxu0 }
 0x211   :  { %1712 = vmatpush.msrb.mxu2 %v986_v1 }
 0x212   :  { %1728 = vmatpush.msrb.mxu3 %v1026_v17  ;;  %1866 = vmatpush.msra.mxu0 %v1827_v28  ;;  %v1158_v17 = vld [vmem:[%s4972_s4 + $0xf88] sm:$0xff] }
 0x213   :  { %1713 = vmatpush.msrb.mxu2 %v984_v13  ;;  %v1156_v13 = vld [vmem:[%s4972_s4 + $0xf78] sm:$0xff]  ;;  %v1396_v3 = vpop.f32.mrf.mxu2  ;;  %v1846_v28 = vld [vmem:[%s4974_s6 + $0xc8] sm:$0xff] }
 0x214   :  { %1729 = vmatpush.msrb.mxu3 %v1024_v60  ;;  %1867 = vmatpush.msra.mxu0 %v1826_v14  ;;  %v1376_v60 = vpop.f32.mrf.mxu1 }
 0x215   :  { %1714 = vmatpush.msrb.mxu2 %v982_v38 }
 0x216   :  { %1730 = vmatpush.msrb.mxu3 %v1022_v9  ;;  %1715 = vmatmul.f32.vlgmr.msrb.gmra.mxu2 %v655_v35  ;;  %v1197_v35 = vadd.f32 %v1196_v61, %v1175_v49  ;;  %v1154_v9 = vld [vmem:[%s4972_s4 + $0xf68] sm:$0xff]  ;;  %v1152_v49 = vld [vmem:[%s4972_s4 + $0xf58] sm:$0xff] }
 0x217   :  { %1779 = vmatpush.msra.mxu2 %v1140_v30 }
 0x218   :  { %1731 = vmatpush.msrb.mxu3 %v1020_v48  ;;  %v1217_v0 = vadd.f32 %v1216_v25, %v1197_v35  ;;  %v1160_v25 = vld [vmem:[%s4972_s4 + $0xf98] sm:$0xff]  ;;  %v1110_v48 = vld [vmem:[%s4972_s4 + $0xe08] sm:$0xff]  ;;  %v1436_v40 = vpop.f32.mrf.mxu0 }
 0x219   :  { %1780 = vmatpush.msra.mxu2 %v1138_v33  ;;  %v1150_v33 = vld [vmem:[%s4972_s4 + $0xf48] sm:$0xff] }
 0x21a   :  { %1732 = vmatpush.msrb.mxu3 %v1018_v27  ;;  %v1237_v59 = vadd.f32 %v1236_v34, %v1217_v0  ;;  %v1114_v34 = vld [vmem:[%s4972_s4 + $0xe28] sm:$0xff]  ;;  %v1148_v27 = vld [vmem:[%s4972_s4 + $0xf38] sm:$0xff] }
 0x21b   :  { %1781 = vmatpush.msra.mxu2 %v1136_v8  ;;  %v1146_v35 = vld [vmem:[%s4972_s4 + $0xf28] sm:$0xff] }
 0x21c   :  { %1733 = vmatpush.msrb.mxu3 %v1016_v52  ;;  %v1257_v12 = vadd.f32 %v1256_v51, %v1237_v59  ;;  %v1416_v37 = vpop.f32.mrf.mxu3  ;;  %v1112_v51 = vld [vmem:[%s4972_s4 + $0xe18] sm:$0xff]  ;;  %v1456_v58 = vpop.f32.mrf.mxu1  ;;  %v1142_v0 = vld [vmem:[%s4972_s4 + $0xf08] sm:$0xff] }
 0x21d   :  { %1782 = vmatpush.msra.mxu2 %v1134_v32  ;;  %v1144_v52 = vld [vmem:[%s4972_s4 + $0xf18] sm:$0xff]  ;;  %v1850_v59 = vld [vmem:[%s4974_s6 + $0xe8] sm:$0xff]  ;;  %s2155_s4 = sshll.u32 %s4985_s17, 4  ;;  %s2156_s4 = int_to_ptr.hbm [resolvable:$true] %s2155_s4 }
 0x21e   :  { %1734 = vmatpush.msrb.mxu3 %v1014_v50  ;;  %v1277_v6 = vadd.f32 %v1276_v10, %v1257_v12  ;;  %v1844_v12 = vld [vmem:[%s4974_s6 + $0xb8] sm:$0xff] }
 0x21f   :  { %1735 = vmatmul.f32.vlgmr.msrb.gmra.mxu3 %v656_v63  ;;  %1783 = vmatpush.msra.mxu2 %v1132_v43  ;;  %v1825_v63 = vld [vmem:[%s4974_s6 + $0x20] sm:$0xff]  ;;  %v1851_v43 = vld [vmem:[%s4974_s6 + $0xf0] sm:$0xff] }
 0x220   :  { %1799 = vmatpush.msra.mxu3 %v1172_v22  ;;  %v1297_v54 = vadd.f32 %v1296_v44, %v1277_v6  ;;  %1868 = vmatpush.msra.mxu0 %v1825_v63  ;;  %v1852_v44 = vld [vmem:[%s4974_s6 + $0xf8] sm:$0xff]  ;;  %v1847_v22 = vld [vmem:[%s4974_s6 + $0xd0] sm:$0xff]  ;;  %v1516_v14 = vpop.f32.mrf.mxu0 }
 0x221   :  { %1784 = vmatpush.msra.mxu2 %v1130_v19  ;;  %1877 = vmatpush.msra.mxu1 %v1852_v44  ;;  %v1845_v19 = vld [vmem:[%s4974_s6 + $0xc0] sm:$0xff]  ;;  %v1938_v44 = vld [vmem:[%s4978_s10 + $0x8] sm:$0xff] }
 0x222   :  { %1800 = vmatpush.msra.mxu3 %v1170_v45  ;;  %v1317_v57 = vadd.f32 %v1316_v29, %v1297_v54  ;;  %1869 = vmatpush.msra.mxu0 %v1824_v24  ;;  %v1176_v45 = vperm.slane %v4670_v26, 1  ;;  %v1842_v29 = vld [vmem:[%s4974_s6 + $0xa8] sm:$0xff]  ;;  %v1841_v54 = vld [vmem:[%s4974_s6 + $0xa0] sm:$0xff]  ;;  %v1840_v24 = vld [vmem:[%s4974_s6 + $0x98] sm:$0xff] }
 0x223   :  { %1785 = vmatpush.msra.mxu2 %v1128_v47  ;;  %1878 = vmatpush.msra.mxu1 %v1851_v43  ;;  %v2003_v43 = vld [vmem:[%s4980_s12 + $0x8] sm:$0xff] }
 0x224   :  { %1801 = vmatpush.msra.mxu3 %v1168_v20  ;;  %v1337_v61 = vadd.f32 %v1336_v11, %v1317_v57  ;;  %1870 = vmatpush.msra.mxu0 %v1823_v36  ;;  %v1536_v47 = vpop.f32.mrf.mxu1  ;;  %v1517_v6 = vadd.f32 %v1516_v14, %v1176_v45  ;;  %v1843_v20 = vld [vmem:[%s4974_s6 + $0xb0] sm:$0xff]  ;;  %v1838_v36 = vld [vmem:[%s4974_s6 + $0x88] sm:$0xff] }
 0x225   :  { %1786 = vmatpush.msra.mxu2 %v1126_v7  ;;  %1879 = vmatpush.msra.mxu1 %v1850_v59  ;;  %v1937_v59 = vld [vmem:[%s4978_s10] sm:$0xff] }
 0x226   :  { %1802 = vmatpush.msra.mxu3 %v1166_v2  ;;  %1871 = vmatpush.msra.mxu0 %v1822_v5  ;;  %v1357_v1 = vadd.f32 %v1356_v53, %v1337_v61  ;;  %v1537_v7 = vadd.f32 %v1536_v47, %v1517_v6 }
 0x227   :  { %1787 = vmatpush.msra.mxu2 %v1124_v21  ;;  %1880 = vmatpush.msra.mxu1 %v1849_v56  ;;  %v1839_v21 = vld [vmem:[%s4974_s6 + $0x90] sm:$0xff]  ;;  %v2002_v56 = vld [vmem:[%s4980_s12] sm:$0xff] }
 0x228   :  { %1803 = vmatpush.msra.mxu3 %v1164_v4  ;;  %1872 = vmatpush.msra.mxu0 %v1821_v23  ;;  %v1377_v38 = vadd.f32 %v1376_v60, %v1357_v1 }
 0x229   :  { %1788 = vmatpush.msra.mxu2 %v1122_v42  ;;  %v1837_v42 = vld [vmem:[%s4974_s6 + $0x80] sm:$0xff] }
 0x22a   :  { %1804 = vmatpush.msra.mxu3 %v1162_v62  ;;  %v1397_v30 = vadd.f32 %v1396_v3, %v1377_v38 }
 0x22b   :  { %1789 = vmatpush.msra.mxu2 %v1120_v31  ;;  %v1901_v31 = vld [vmem:[%s4976_s8 + $0x18] sm:$0xff] }
 0x22c   :  { %1805 = vmatpush.msra.mxu3 %v1160_v25  ;;  %v1417_v55 = vadd.f32 %v1416_v37, %v1397_v30  ;;  %v1900_v25 = vld [vmem:[%s4976_s8 + $0x10] sm:$0xff] }
 0x22d   :  { %1790 = vmatpush.msra.mxu2 %v1118_v46 }
 0x22e   :  { %1806 = vmatpush.msra.mxu3 %v1158_v17  ;;  %v1437_v8 = vadd.f32 %v1436_v40, %v1417_v55  ;;  %v1899_v40 = vld [vmem:[%s4976_s8 + $0x8] sm:$0xff] }
 0x22f   :  { %1791 = vmatpush.msra.mxu2 %v1116_v16 }
 0x230   :  { %1807 = vmatpush.msra.mxu3 %v1156_v13  ;;  %v1457_v32 = vadd.f32 %v1456_v58, %v1437_v8  ;;  %v1898_v8 = vld [vmem:[%s4976_s8] sm:$0xff] }
 0x231   :  { %1792 = vmatpush.msra.mxu2 %v1114_v34 }
 0x232   :  { %1808 = vmatpush.msra.mxu3 %v1154_v9 }
 0x233   :  { %1793 = vmatpush.msra.mxu2 %v1112_v51 }
 0x234   :  { %1809 = vmatpush.msra.mxu3 %v1152_v49  ;;  %v1596_v57 = vpop.f32.mrf.mxu0 }
 0x235   :  { %1794 = vmatpush.msra.mxu2 %v1110_v48  ;;  %v1476_v10 = vpop.f32.mrf.mxu2 }
 0x236   :  { %1810 = vmatpush.msra.mxu3 %v1150_v33  ;;  %1795 = vmatmul.f32.vlgmr.msra.gmra.mxu2 %v659_v41  ;;  %v1477_v18 = vadd.f32 %v1476_v10, %v1457_v32 }
 0x237   :  { %1922 = vmatpush.msrb.mxu2 %v1901_v31 }
 0x238   :  { %1811 = vmatpush.msra.mxu3 %v1148_v27 }
 0x239   :  { %1923 = vmatpush.msrb.mxu2 %v1900_v25 }
 0x23a   :  { %1812 = vmatpush.msra.mxu3 %v1146_v35  ;;  %v2198_v35 = vld [vmem:[%s4975_s7] ss:$0 sm:$0xff] }
 0x23b   :  { %1924 = vmatpush.msrb.mxu2 %v1899_v40 }
 0x23c   :  { %1813 = vmatpush.msra.mxu3 %v1144_v52 }
 0x23d   :  { %v1616_v61 = vpop.f32.mrf.mxu1  ;;  %1925 = vmatpush.msrb.mxu2 %v1898_v8 }
 0x23e   :  { %1814 = vmatpush.msra.mxu3 %v1142_v0 }
 0x23f   :  { %v1496_v41 = vpop.f32.mrf.mxu3  ;;  %1815 = vmatmul.f32.vlgmr.msra.gmra.mxu3 %v660_v15  ;;  %v1848_v15 = vld [vmem:[%s4974_s6 + $0xd8] sm:$0xff] }
 0x240   :  { %v1497_v50 = vadd.f32 %v1496_v41, %v1477_v18  ;;  %1881 = vmatpush.msra.mxu1 %v1848_v15  ;;  %v1940_v18 = vld [vmem:[%s4978_s10 + $0x18] sm:$0xff] }
 0x241   :  { %v2005_v41 = vld [vmem:[%s4980_s12 + $0x18] sm:$0xff]  ;;  %1960 = vmatpush.msrb.mxu3 %v1940_v18 }
 0x242   :  { %v1819_v39 = vmax.f32 %v1497_v50, 0.0  ;;  %1882 = vmatpush.msra.mxu1 %v1847_v22  ;;  %2022 = vmatpush.msra.mxu2 %v2005_v41  ;;  %v1939_v50 = vld [vmem:[%s4978_s10 + $0x10] sm:$0xff]  ;;  %v2033_v15 = vld [vmem:[%s4982_s14 + $0x18] sm:$0xff] }
 0x243   :  { %1961 = vmatpush.msrb.mxu3 %v1939_v50  ;;  %v2032_v22 = vld [vmem:[%s4982_s14 + $0x10] sm:$0xff] }
 0x244   :  { %1873 = vmatmul.f32.vlgmr.msra.gmra.mxu0 %v1819_v39  ;;  %1883 = vmatpush.msra.mxu1 %v1846_v28  ;;  %v2004_v39 = vld [vmem:[%s4980_s12 + $0x10] sm:$0xff]  ;;  %v2031_v28 = vld [vmem:[%s4982_s14 + $0x8] sm:$0xff] }
 0x245   :  { %2023 = vmatpush.msra.mxu2 %v2004_v39  ;;  %1962 = vmatpush.msrb.mxu3 %v1938_v44 }
 0x246   :  { %1884 = vmatpush.msra.mxu1 %v1845_v19  ;;  %v2030_v19 = vld [vmem:[%s4982_s14] sm:$0xff] }
 0x247   :  { %2024 = vmatpush.msra.mxu2 %v2003_v43  ;;  %1963 = vmatpush.msrb.mxu3 %v1937_v59 }
 0x248   :  { %1885 = vmatpush.msra.mxu1 %v1844_v12  ;;  %v2199_v12 = vld [vmem:[%s4977_s9] ss:$0 sm:$0xff] }
 0x249   :  { %2025 = vmatpush.msra.mxu2 %v2002_v56  ;;  %2050 = vmatpush.msra.mxu3 %v2033_v15 }
 0x24a   :  { %1886 = vmatpush.msra.mxu1 %v1843_v20 }
 0x24b   :  { %2051 = vmatpush.msra.mxu3 %v2032_v22 }
 0x24c   :  { %1887 = vmatpush.msra.mxu1 %v1842_v29  ;;  %v2200_v29 = vld [vmem:[%s4979_s11] ss:$0 sm:$0xff] }
 0x24d   :  { %2052 = vmatpush.msra.mxu3 %v2031_v28 }
 0x24e   :  { %1888 = vmatpush.msra.mxu1 %v1841_v54 }
 0x24f   :  { %2053 = vmatpush.msra.mxu3 %v2030_v19 }
 0x250   :  { %1889 = vmatpush.msra.mxu1 %v1840_v24  ;;  %v1974_v24 = vld [vmem:[%s4998_s21] sm:$0xff] }
 0x252   :  { %1890 = vmatpush.msra.mxu1 %v1839_v21 }
 0x254   :  { %1891 = vmatpush.msra.mxu1 %v1838_v36 }
 0x256   :  { %1892 = vmatpush.msra.mxu1 %v1837_v42  ;;  %v1676_v1 = vpop.f32.mrf.mxu0 }
 0x257   :  { %v1556_v63 = vpop.f32.mrf.mxu2 }
 0x258   :  { %v1557_v2 = vadd.f32 %v1556_v63, %v1537_v7 }
 0x25f   :  { %v1696_v16 = vpop.f32.mrf.mxu1 }
 0x261   :  { %v1576_v26 = vpop.f32.mrf.mxu3 }
 0x262   :  { %v1577_v11 = vadd.f32 %v1576_v26, %v1557_v2 }
 0x264   :  { %v1597_v4 = vadd.f32 %v1596_v57, %v1577_v11 }
 0x266   :  { %v1617_v5 = vadd.f32 %v1616_v61, %v1597_v4  ;;  %v1976_v4 = vlaneseq }
 0x268   :  { %v1977_v36 = vand.u32 127, %v1976_v4 }
 0x278   :  { %v1756_v9 = vpop.f32.mrf.mxu0 }
 0x279   :  { %v1636_v62 = vpop.f32.mrf.mxu2 }
 0x27a   :  { %v1637_v53 = vadd.f32 %v1636_v62, %v1617_v5 }
 0x280   :  { %v1776_v51 = vpop.f32.mrf.mxu1 }
 0x282   :  { %v1656_v23 = vpop.f32.mrf.mxu3 }
 0x283   :  { %v1657_v46 = vadd.f32 %v1656_v23, %v1637_v53 }
 0x285   :  { %v1677_v17 = vadd.f32 %v1676_v1, %v1657_v46  ;;  %v2258_v1 = vmov 2  }
 0x286   :  { %2193 = vset.pattern.permute.xlu2 %v2258_v1 }
 0x287   :  { %v1697_v60 = vadd.f32 %v1696_v16, %v1677_v17  ;;  %v2259_v17 = vmov 1   ;;  %v2260_v16 = vmov 0  }
 0x288   :  { %2192 = vset.pattern.permute.xlu1 %v2259_v17  ;;  %2195 = vset.pattern.permute.xlu0 %v2260_v16 }
 0x299   :  { %v1716_v13 = vpop.f32.mrf.mxu2 }
 0x29a   :  { %v1717_v34 = vadd.f32 %v1716_v13, %v1697_v60 }
 0x2a2   :  { %v1736_v3 = vpop.f32.mrf.mxu3 }
 0x2a3   :  { %v1737_v38 = vadd.f32 %v1736_v3, %v1717_v34 }
 0x2a5   :  { %v1757_v37 = vadd.f32 %v1756_v9, %v1737_v38  ;;  %v2261_v9 = vmov 0.0  }
 0x2a7   :  { %v1777_v49 = vadd.f32 %v1776_v51, %v1757_v37  ;;  %v2262_v51 = vmov 3  }
 0x2b9   :  { %v1796_v30 = vpop.f32.mrf.mxu2 }
 0x2ba   :  { %v1797_v48 = vadd.f32 %v1796_v30, %v1777_v49  ;;  %v2202_v30 = vld [vmem:[%s4983_s15] ss:$0 sm:$0xff]  ;;  %s2265_s15 = smov 112  }
 0x2c1   :  { %v1874_v52 = vpop.f32.mrf.mxu0 }
 0x2c2   :  { %v1816_v55 = vpop.f32.mrf.mxu3  ;;  %v1875_v58 = vadd.f32 %v2198_v35, %v1874_v52 }
 0x2c3   :  { %v1817_v33 = vadd.f32 %v1816_v55, %v1797_v48 }
 0x2c5   :  { %v1820_v27 = vmax.f32 %v1817_v33, 0.0 }
 0x2c7   :  { %1893 = vmatmul.f32.vlgmr.msra.gmra.mxu1 %v1820_v27 }
 0x344   :  { %v1894_v10 = vpop.f32.mrf.mxu1 }
 0x345   :  { %v1895_v32 = vadd.f32 %v1894_v10, %v1875_v58 }
 0x347   :  { %v1897_v0 = vmax.f32 %v1895_v32, 0.0  ;;  %v2201_v32 = vld [vmem:[%s4981_s13] ss:$0 sm:$0xff]  ;;  %s2266_s13 = smov [#allocation4]  }
 0x348   :  { %s2153_s6 = sshll.u32 %s2266_s13, 4  ;;  %s2154_s6 = int_to_ptr.vmem [resolvable:$true] %s2153_s6 }
 0x349   :  { %2177 = vmatmul.msk.f32.vlgmr.msrb.gmra.mxu2 %vm1906_vm0, %v1897_v0 }
 0x3cc   :  { %v1927_v45 = vpop.f32.mrf.mxu2 }
 0x3cd   :  { %v1928_v14 = vadd.f32 %v2199_v12, %v1927_v45 }
 0x3cf   :  { %v1930_v47 = vmax.f32 %v1928_v14, 0.0 }
 0x3d1   :  { %vm1931_vm1 = vcmp.ne.f32.partialorder %v1930_v47, %v1930_v47 }
 0x3d2   :  { %v1932_v6 = vsel %vm1931_vm1, 0.0, %v1930_v47 }
 0x3d3   :  { %vm1933_vm2 = vcmp.eq.f32.partialorder %v1932_v6, inf }
 0x3d4   :  { %v1934_v20 = vsel %vm1933_vm2, 1.0, %v1932_v6 }
 0x3d5   :  { %vm1935_vm3 = vcmp.eq.f32.partialorder %v1934_v20, -inf }
 0x3d6   :  { %v1936_v63 = vsel %vm1935_vm3, -1.0, %v1934_v20 }
 0x3d7   :  { %2178 = vmatmul.msk.f32.vlgmr.msrb.gmra.mxu3 %vm1906_vm0, %v1936_v63  ;;  %2180 = vmatmul.msk.f32.vlgmr.msra.gmra.mxu2 %vm1906_vm0, %v1936_v63 }
 0x3df   :  { %2181 = vmatmul.msk.f32.vlgmr.msra.gmra.mxu3 %vm1906_vm0, %v1936_v63 }
 0x45a   :  { %v1965_v7 = vpop.f32.mrf.mxu3  ;;  %v2027_v0 = vpop.f32.mrf.mxu2 }
 0x45b   :  { %v1966_v54 = vadd.f32 %v2200_v29, %v1965_v7  ;;  %v2028_v18 = vadd.f32 %v2201_v32, %v2027_v0 }
 0x45d   :  { %vm1968_vm4 = vcmp.ne.f32.partialorder %v1966_v54, %v1966_v54 }
 0x45e   :  { %v1969_v26 = vsel %vm1968_vm4, 0.0, %v1966_v54 }
 0x45f   :  { %vm1970_vm5 = vcmp.eq.f32.partialorder %v1969_v26, inf }
 0x460   :  { %v1971_v2 = vsel %vm1970_vm5, 1.0, %v1969_v26 }
 0x461   :  { %vm1972_vm7 = vcmp.eq.f32.partialorder %v1971_v2, -inf }
 0x462   :  { %v1973_v11 = vsel %vm1972_vm7, -1.0, %v1971_v2  ;;  %v2055_v49 = vpop.f32.mrf.mxu3 }
 0x463   :  { %v1975_v21 = vadd.f32 %v1974_v24, %v1973_v11  ;;  %2135 = vst.msk [vmem:[%s4986_s18] sm:$0xff] %vm1978_vm6, %v1973_v11  ;;  %v2056_v48 = vadd.f32 %v2202_v30, %v2055_v49 }
 0x465   :  { %v1979_v57 = vsel %vm1978_vm6, %v1975_v21, -inf  ;;  %v2058_v55 = vmax.f32 %v2056_v48, -10.0 }
 0x466   :  { %1980 = vmax.xlane.f32.xlu0 %v1979_v57 }
 0x467   :  { %v2059_v33 = vmin.f32 %v2058_v55, 2.0 }
 0x469   :  { %v2060_v27 = vmul.f32 1.442695, %v2059_v33 }
 0x46b   :  { %2203 = vpow2.f32 %v2060_v27 }
 0x471   :  { %v2204_v40 = vpop.eup %2203 }
 0x472   :  { %v2062_v8 = vmax.f32 %v2204_v40, 0.001 }
 0x4d9   :  { %v1981_v42 = vpop.xlane.xlu0 %1980 }
 0x4da   :  { %vm1982_vm8 = vcmp.ge.f32.partialorder %v1975_v21, %v1981_v42 }
 0x4db   :  { %v1983_v61 = vsel %vm1982_vm8, %v1977_v36, 4 }
 0x4dc   :  { %v1984_v62 = vsel %vm1978_vm6, %v1983_v61, 2147483647 }
 0x4dd   :  { %v1986_v5 = vshra.s32 %v1984_v62, 16  ;;  %v1985_v25 = vand.u32 65535, %v1984_v62 }
 0x4df   :  { %v1988_v31 = vcvt.s32.f32 %v1986_v5  ;;  %v1987_v53 = vcvt.s32.f32 %v1985_v25 }
 0x4e1   :  { %1989 = vmin.xlane.f32.xlu0 %v1988_v31 }
 0x554   :  { %v1990_v23 = vpop.xlane.xlu0 %1989 }
 0x555   :  { %vm1991_vm9 = vcmp.eq.f32.partialorder %v1988_v31, %v1990_v23  ;;  %v1996_v13 = vcvt.f32.s32 %v1990_v23 }
 0x556   :  { %v1992_v46 = vsel %vm1991_vm9, %v1987_v53, inf }
 0x557   :  { %1993 = vmin.xlane.f32.xlu1 %v1992_v46  ;;  %v1997_v3 = vshll.u32 %v1996_v13, 16 }
 0x5ca   :  { %v1994_v60 = vpop.xlane.xlu1 %1993 }
 0x5cb   :  { %v1995_v34 = vcvt.f32.s32 %v1994_v60 }
 0x5cd   :  { %v1998_v38 = vadd.s32 %v1997_v3, %v1995_v34 }
 0x5cf   :  { %vm1999_vm10 = vcmp.eq.s32.totalorder %v1977_v36, %v1998_v38 }
 0x5d0   :  { %v2179_v37 = vsel %vm1999_vm10, 1.0, %v2261_v9 }
 0x5d1   :  { %2136 = vst.msk [vmem:[%s4987_s19] sm:$0xff] %vm1978_vm6, %v2179_v37  ;;  %2065 = vperm.xlu0 %2195, %v2179_v37   ;;  %2089 = vperm.xlu2 %2193, %v2179_v37   ;;  %s2263_s19 = smov 96  }
 0x5d2   :  { %2073 = vperm.xlu1 %2192, %v2179_v37  }
 0x5d9   :  { %2194 = vset.pattern.permute.xlu2 %v2262_v51  ;;  %2196 = vset.pattern.permute.xlu0 %v2262_v51 }
 0x5da   :  { %2105 = vperm.xlu2 %2194, %v2179_v37  }
 0x62b   :  { %v2090_v35 = vpop.permute.xlu2 %2089 }
 0x62c   :  { %v2098_v52 = vmul.f32 %v2090_v35, %v2062_v8  ;;  %v2092_v44 = vmul.f32 %v2090_v35, %v2028_v18 }
 0x62e   :  { %2100 = vrot.lane.b32.xlu1 %v2098_v52, %s2263_s19 }
 0x634   :  { %v2106_v58 = vpop.permute.xlu2 %2105 }
 0x635   :  { %v2114_v10 = vmul.f32 %v2106_v58, %v2062_v8  ;;  %v2108_v43 = vmul.f32 %v2106_v58, %v2028_v18 }
 0x637   :  { %2116 = vrot.lane.b32.xlu1 %v2114_v10, %s2264_s24 }
 0x643   :  { %v2066_v15 = vpop.permute.xlu0 %2065 }
 0x644   :  { %v2074_v41 = vpop.permute.xlu1 %2073  ;;  %v2070_v22 = vmul.f32 %v2066_v15, %v2062_v8  ;;  %v2068_v63 = vmul.f32 %v2066_v15, %v2028_v18 }
 0x645   :  { %v2076_v50 = vmul.f32 %v2074_v41, %v2028_v18  ;;  %v2082_v39 = vmul.f32 %v2074_v41, %v2062_v8 }
 0x647   :  { %2078 = vrot.lane.b32.xlu2 %v2076_v50, %s2265_s15 }
 0x64f   :  { %2084 = vrot.lane.b32.xlu2 %v2082_v39, %s2265_s15 }
 0x657   :  { %2094 = vrot.lane.b32.xlu2 %v2092_v44, %s2263_s19 }
 0x65f   :  { %2110 = vrot.lane.b32.xlu2 %v2108_v43, %s2264_s24 }
 0x6a0   :  { %v2101_v56 = vpop.permute.xlu1 %2100 }
 0x6a1   :  { %v2079_v59 = vpop.permute.xlu2 %2078 }
 0x6a2   :  { %v2081_v7 = vadd.f32 %v2079_v59, %v2068_v63 }
 0x6a9   :  { %v2085_v28 = vpop.permute.xlu2 %2084  ;;  %v2117_v45 = vpop.permute.xlu1 %2116 }
 0x6aa   :  { %v2087_v19 = vadd.f32 %v2085_v28, %v2070_v22 }
 0x6ac   :  { %v2103_v12 = vadd.f32 %v2101_v56, %v2087_v19 }
 0x6ae   :  { %v2119_v14 = vadd.f32 %v2117_v45, %v2103_v12 }
 0x6b0   :  { %vm2128_vm11 = vcmp.ne.f32.partialorder %v2119_v14, %v2119_v14 }
 0x6b1   :  { %v2129_v47 = vsel %vm2128_vm11, 0.0, %v2119_v14  ;;  %v2095_v6 = vpop.permute.xlu2 %2094 }
 0x6b2   :  { %vm2130_vm12 = vcmp.eq.f32.partialorder %v2129_v47, inf  ;;  %v2097_v54 = vadd.f32 %v2095_v6, %v2081_v7 }
 0x6b3   :  { %v2131_v20 = vsel %vm2130_vm12, 1.0, %v2129_v47 }
 0x6b4   :  { %vm2132_vm14 = vcmp.eq.f32.partialorder %v2131_v20, -inf }
 0x6b5   :  { %v2133_v29 = vsel %vm2132_vm14, -1.0, %v2131_v20 }
 0x6b6   :  { %2134 = vst.msk [vmem:[#allocation4] sm:$0xff] %vm2126_vm13, %v2133_v29 }
 0x6b7   :  { %2158 = dma.vmem_to_hbm [thread:$0]  %s2154_s6, 128, %s2156_s4, [#allocation5]  }
 0x6b9   :  { %v2111_v26 = vpop.permute.xlu2 %2110 }
 0x6ba   :  { %v2113_v2 = vadd.f32 %v2111_v26, %v2097_v54 }
 0x6bc   :  { %vm2120_vm15 = vcmp.ne.f32.partialorder %v2113_v2, %v2113_v2 }
 0x6bd   :  { %v2121_v24 = vsel %vm2120_vm15, 0.0, %v2113_v2 }
 0x6be   :  { %vm2122_vm0 = vcmp.eq.f32.partialorder %v2121_v24, inf }
 0x6bf   :  { %v2123_v11 = vsel %vm2122_vm0, 1.0, %v2121_v24 }
 0x6c0   :  { %vm2124_vm1 = vcmp.eq.f32.partialorder %v2123_v11, -inf }
 0x6c1   :  { %v2125_v21 = vsel %vm2124_vm1, -1.0, %v2123_v11 }
 0x6c2   :  { %2127 = vst.msk [vmem:[#allocation2] sm:$0xff] %vm2126_vm13, %v2125_v21 }
 0x6c3   :  { %2147 = dma.vmem_to_hbm [thread:$0]  %s2143_s0, 128, %s2145_s28, [#allocation3]  }
 0x6c4   :  { %2254 = dma.done.wait [#allocation3], 128  }
 0x6c5   :  { %2255 = vsyncadd [#allocation3], 4294967168 }
 0x6c6   :  { %2256 = dma.done.wait [#allocation5], 128  }
 0x6c7   :  { %2257 = vsyncadd [#allocation5], 4294967168 }
 0x6c8   :  { %2175 = vsyncpa [#allocation3], 1 }
 0x6c9   :  { %2176 = vsyncpa [#allocation5], 1 }

</bundles_post_ra>
